<compile_context>
chip_gen: v5e
topology: v5e:2x2
jax: 0.10.0
libtpu: 0.0.40
codegen_flags: <defaults>
</compile_context>

<pallas_src>
import functools

import jax
import jax.numpy as jnp
import numpy as np
from jax.experimental import pallas as pl
from jax.experimental.pallas import tpu as pltpu


# ------------------------------ fused Pallas kernel ------------------------------ #

def _fpn_kernel(c3_ref, c4_ref, c5_ref,
                wc3_ref, bc3_ref, wc4_ref, bc4_ref, wc5_ref, bc5_ref,
                w33_ref, b33_ref, w34_ref, b34_ref, w35_ref, b35_ref,
                s54_ref, s43_ref,
                p3_ref, p4_ref, p5_ref,
                *, H3, W3, H4, W4, H5, W5):
    f32 = jnp.float32
    bf16 = jnp.bfloat16

    def lateral(x, w_ref, b_ref):
        # 1x1 conv over channels: (HW, Cin) @ (Cin, Cout) + bias.
        # bf16 MXU inputs, f32 accumulate.
        return jnp.dot(x.astype(bf16), w_ref[...].astype(bf16),
                       preferred_element_type=f32) + b_ref[...]

    def conv3x3(p, w_ref, b_ref, H, W):
        # 'same' 3x3 conv on the row-flattened (H*W, C) channels-last tile.
        # Zero padding is done IN-KERNEL: P >= W+1 zero rows (sublane-aligned) are
        # prepended/appended, so a tap shift of (dy-1, dx-1) is a static sublane
        # slice at offset (dy-1)*W + (dx-1) + P.  Vertical out-of-image pixels land
        # in the zero rows; horizontal ones are masked.  No per-tap reshapes.
        HW, C = p.shape
        P = ((W + 1 + 7) // 8) * 8
        zpad = jnp.zeros((P, C), f32)
        q = jnp.concatenate([zpad, p, zpad], axis=0)                # (HW + 2P, C)
        col = jax.lax.broadcasted_iota(jnp.int32, (HW, 1), 0) % W
        w9 = w_ref[...].astype(bf16)                                # (9, C, C)
        # bias-initialized accumulator (saves a separate broadcast + add).
        acc = jnp.broadcast_to(b_ref[...], (HW, C)).astype(f32)
        for dy in range(3):
            for dx in range(3):
                start = (dy - 1) * W + (dx - 1) + P
                patch = q[start:start + HW, :]
                if dx != 1:                                         # x-boundary mask
                    xs = col + (dx - 1)
                    patch = jnp.where((xs >= 0) & (xs < W), patch, 0.0)
                acc = acc + jnp.dot(patch.astype(bf16), w9[dy * 3 + dx],
                                    preferred_element_type=f32)
        return acc

    # Lateral 1x1 projections + top-down pathway.  The 2x nearest upsample is a
    # constant 0/1 selection matrix applied on the MXU (kept in f32: exact gather).
    p5 = lateral(c5_ref[0], wc5_ref, bc5_ref)                                   # (HW5, C)
    p4 = lateral(c4_ref[0], wc4_ref, bc4_ref) + jnp.dot(
        s54_ref[...], p5, preferred_element_type=f32)                           # (HW4, C)
    p3 = lateral(c3_ref[0], wc3_ref, bc3_ref) + jnp.dot(
        s43_ref[...], p4, preferred_element_type=f32)                           # (HW3, C)

    # Output 3x3 convs.  All intermediates stay on-chip.
    p3_ref[0] = conv3x3(p3, w33_ref, b33_ref, H3, W3).astype(p3_ref.dtype)
    p4_ref[0] = conv3x3(p4, w34_ref, b34_ref, H4, W4).astype(p4_ref.dtype)
    p5_ref[0] = conv3x3(p5, w35_ref, b35_ref, H5, W5).astype(p5_ref.dtype)


# ------------------------------- pallas_call glue -------------------------------- #

def _upsample_matrix(h_out, w_out):
    """0/1 matrix realizing 2x nearest upsampling on row-major-flattened spatial dims
    (out_flat = S @ in_flat).  Shape: (h_out*w_out, (h_out//2)*(w_out//2))."""
    h_in, w_in = h_out // 2, w_out // 2
    r = np.arange(h_out * w_out)
    src = (r // w_out // 2) * w_in + (r % w_out) // 2
    s = np.zeros((h_out * w_out, h_in * w_in), np.float32)
    s[r, src] = 1.0
    return s


def _fpn_pallas_call(c3f, c4f, c5f, wc3, bc3, wc4, bc4, wc5, bc5,
                     w33, b33, w34, b34, w35, b35, s54, s43,
                     *, H3, W3, H4, W4, H5, W5):
    N = c3f.shape[0]
    C = wc3.shape[1]
    HW3, HW4, HW5 = H3 * W3, H4 * W4, H5 * W5

    kernel = functools.partial(_fpn_kernel, H3=H3, W3=W3, H4=H4, W4=W4,
                               H5=H5, W5=W5)

    def whole(a):  # grid-invariant block covering the whole (small) array
        nd = a.ndim
        return pl.BlockSpec(a.shape, lambda n: (0,) * nd)

    def per_batch(rows, cols):
        return pl.BlockSpec((1, rows, cols), lambda n: (n, 0, 0))

    in_specs = [
        per_batch(HW3, c3f.shape[2]),
        per_batch(HW4, c4f.shape[2]),
        per_batch(HW5, c5f.shape[2]),
        whole(wc3), whole(bc3), whole(wc4), whole(bc4), whole(wc5), whole(bc5),
        whole(w33), whole(b33), whole(w34), whole(b34), whole(w35), whole(b35),
        whole(s54), whole(s43),
    ]
    out_specs = (per_batch(HW3, C), per_batch(HW4, C), per_batch(HW5, C))
    out_shape = (jax.ShapeDtypeStruct((N, HW3, C), jnp.float32),
                 jax.ShapeDtypeStruct((N, HW4, C), jnp.float32),
                 jax.ShapeDtypeStruct((N, HW5, C), jnp.float32))

    return pl.pallas_call(
        kernel,
        out_shape=out_shape,
        grid=(N,),
        in_specs=in_specs,
        out_specs=out_specs,
        compiler_params=pltpu.CompilerParams(
            dimension_semantics=("parallel",)),  # batch axis: 2 TCs on v7x
    )(c3f, c4f, c5f, wc3, bc3, wc4, bc4, wc5, bc5,
      w33, b33, w34, b34, w35, b35, s54, s43)


# ------------------------------------- FPN --------------------------------------- #

def init_fpn_params(key, fpn_channels):
    """Deterministic synthetic parameters; shapes match the PyTorch module
    (conv_C5's contraction dim is zero-padded 400 -> 512 at init time)."""
    ks = jax.random.split(key, 12)
    c = fpn_channels

    def w1(k, cin, cout, cin_pad=None):
        w = jax.random.normal(k, (cin, cout), jnp.float32) * (cin ** -0.5)
        if cin_pad is not None and cin_pad > cin:
            w = jnp.concatenate(
                [w, jnp.zeros((cin_pad - cin, cout), jnp.float32)], axis=0)
        return w

    def w3(k, cin, cout):  # 3x3 conv weight stored HWIO
        return jax.random.normal(k, (3, 3, cin, cout), jnp.float32) * ((9 * cin) ** -0.5)

    def bias(k, cout):
        return jax.random.normal(k, (cout,), jnp.float32) * 0.01

    return {
        "conv_C3": (w1(ks[0], 64, c), bias(ks[1], c)),
        "conv_C4": (w1(ks[2], 160, c), bias(ks[3], c)),
        "conv_C5": (w1(ks[4], 400, c, cin_pad=512), bias(ks[5], c)),
        "conv_P3": (w3(ks[6], c, c), bias(ks[7], c)),
        "conv_P4": (w3(ks[8], c, c), bias(ks[9], c)),
        "conv_P5": (w3(ks[10], c, c), bias(ks[11], c)),
    }


@jax.jit
def fpn_forward(params, C3, C4, C5):
    """Inputs NCHW (PyTorch convention); returns {'p3','p4','p5'} in NCHW."""
    _, _, H3, W3 = C3.shape
    _, _, H4, W4 = C4.shape
    _, _, H5, W5 = C5.shape

    # layout glue: NCHW -> (N, H*W, C) rows for the channels-last kernel.
    def to_rows(x):
        n, c, h, w = x.shape
        return jnp.transpose(x.reshape(n, c, h * w), (0, 2, 1))

    c3f, c4f, c5f = to_rows(C3), to_rows(C4), to_rows(C5)

    wc3, bc3 = params["conv_C3"]
    wc4, bc4 = params["conv_C4"]
    wc5, bc5 = params["conv_C5"]
    w33, b33 = params["conv_P3"]
    w34, b34 = params["conv_P4"]
    w35, b35 = params["conv_P5"]
    C = wc3.shape[1]

    # C5 channels zero-padded to the padded weight's K (400 -> 512); fuses with the
    # layout transpose above.
    c5f = jnp.pad(c5f, ((0, 0), (0, 0), (0, wc5.shape[0] - c5f.shape[2])))

    s54 = jnp.asarray(_upsample_matrix(H4, W4))   # (HW4, HW5) selection matrix
    s43 = jnp.asarray(_upsample_matrix(H3, W3))   # (HW3, HW4) selection matrix

    p3f, p4f, p5f = _fpn_pallas_call(
        c3f, c4f, c5f,
        wc3, bc3.reshape(1, C), wc4, bc4.reshape(1, C), wc5, bc5.reshape(1, C),
        w33.reshape(9, C, C), b33.reshape(1, C),
        w34.reshape(9, C, C), b34.reshape(1, C),
        w35.reshape(9, C, C), b35.reshape(1, C),
        s54, s43,
        H3=H3, W3=W3, H4=H4, W4=W4, H5=H5, W5=W5)

    # layout glue back to NCHW.
    def to_nchw(xf, h, w):
        n, hw, c = xf.shape
        return jnp.transpose(xf, (0, 2, 1)).reshape(n, c, h, w)

    return {"p3": to_nchw(p3f, H3, W3),
            "p4": to_nchw(p4f, H4, W4),
            "p5": to_nchw(p5f, H5, W5)}


# ------------------------------- pure-JAX reference ------------------------------- #

def upsample2x_nearest(x):
    x = jnp.repeat(x, 2, axis=1)
    return jnp.repeat(x, 2, axis=2)


def _conv_ref(x, w_hwio, b):
    y = jax.lax.conv_general_dilated(
        x, w_hwio, window_strides=(1, 1), padding="SAME",
        dimension_numbers=("NHWC", "HWIO", "NHWC"))
    return y + b.reshape(1, 1, 1, -1)


def fpn_ref(params, C3, C4, C5):
    to_nhwc = lambda t: jnp.transpose(t, (0, 2, 3, 1))
    c3, c4, c5 = to_nhwc(C3), to_nhwc(C4), to_nhwc(C5)
    wC3, bC3 = params["conv_C3"]
    wC4, bC4 = params["conv_C4"]
    wC5, bC5 = params["conv_C5"]
    wC5 = wC5[: c5.shape[-1]]                      # drop zero-padded K rows
    P5 = _conv_ref(c5, wC5.reshape(1, 1, *wC5.shape), bC5)
    P4 = _conv_ref(c4, wC4.reshape(1, 1, *wC4.shape), bC4) + upsample2x_nearest(P5)
    P3 = _conv_ref(c3, wC3.reshape(1, 1, *wC3.shape), bC3) + upsample2x_nearest(P4)
    P3 = _conv_ref(P3, *params["conv_P3"])
    P4 = _conv_ref(P4, *params["conv_P4"])
    P5 = _conv_ref(P5, *params["conv_P5"])
    to_nchw = lambda t: jnp.transpose(t, (0, 3, 1, 2))
    return {"p3": to_nchw(P3), "p4": to_nchw(P4), "p5": to_nchw(P5)}


# ------------------------------------- main --------------------------------------- #

if __name__ == "__main__":
    key = jax.random.PRNGKey(0)
    k_p, k3, k4, k5 = jax.random.split(key, 4)

    fpn_channels = 32
    N = 2
    # Backbone feature maps (NCHW, matching the PyTorch module's in-channels).
    C3 = jax.random.normal(k3, (N, 64, 16, 16), jnp.float32)
    C4 = jax.random.normal(k4, (N, 160, 8, 8), jnp.float32)
    C5 = jax.random.normal(k5, (N, 400, 4, 4), jnp.float32)

    params = init_fpn_params(k_p, fpn_channels)

    feats = fpn_forward(params, C3, C4, C5)
    jax.block_until_ready(feats)

    # Numerical sanity check against a pure-JAX reference (bf16 MXU inputs in the
    # kernel -> keep the tolerance used previously).
    ref = fpn_ref(params, C3, C4, C5)
    for name in ("p3", "p4", "p5"):
        assert feats[name].shape == ref[name].shape, name
        assert jnp.allclose(feats[name], ref[name], atol=5e-2, rtol=5e-2), name

    print("KERNEL_OK")
</pallas_src>

<mosaic_0001>
module attributes {stable_mosaic.version = 11 : i64} {
  func.func @_fpn_kernel(%arg0: i32, %arg1: memref<1x256x64xf32, #tpu.memory_space<vmem>>, %arg2: memref<1x64x160xf32, #tpu.memory_space<vmem>>, %arg3: memref<1x16x512xf32, #tpu.memory_space<vmem>>, %arg4: memref<64x32xf32, #tpu.memory_space<vmem>>, %arg5: memref<1x32xf32, #tpu.memory_space<vmem>>, %arg6: memref<160x32xf32, #tpu.memory_space<vmem>>, %arg7: memref<1x32xf32, #tpu.memory_space<vmem>>, %arg8: memref<512x32xf32, #tpu.memory_space<vmem>>, %arg9: memref<1x32xf32, #tpu.memory_space<vmem>>, %arg10: memref<9x32x32xf32, #tpu.memory_space<vmem>>, %arg11: memref<1x32xf32, #tpu.memory_space<vmem>>, %arg12: memref<9x32x32xf32, #tpu.memory_space<vmem>>, %arg13: memref<1x32xf32, #tpu.memory_space<vmem>>, %arg14: memref<9x32x32xf32, #tpu.memory_space<vmem>>, %arg15: memref<1x32xf32, #tpu.memory_space<vmem>>, %arg16: memref<64x16xf32, #tpu.memory_space<vmem>>, %arg17: memref<256x64xf32, #tpu.memory_space<vmem>>, %arg18: memref<1x256x32xf32, #tpu.memory_space<vmem>>, %arg19: memref<1x64x32xf32, #tpu.memory_space<vmem>>, %arg20: memref<1x16x32xf32, #tpu.memory_space<vmem>>) attributes {dimension_semantics = [#tpu.dimension_semantics<parallel>], iteration_bounds = array<i64: 2>, scalar_prefetch = 0 : i64, scratch_operands = 0 : i64, tpu.core_type = #tpu.core_type<tc>, window_params = [{transform_indices = @transform_0, window_bounds = array<i64: 1, 256, 64>}, {transform_indices = @transform_1, window_bounds = array<i64: 1, 64, 160>}, {transform_indices = @transform_2, window_bounds = array<i64: 1, 16, 512>}, {pipeline_mode = #tpu.pipeline_mode<synchronous>, transform_indices = @transform_3, window_bounds = array<i64: 64, 32>}, {pipeline_mode = #tpu.pipeline_mode<synchronous>, transform_indices = @transform_4, window_bounds = array<i64: 1, 32>}, {pipeline_mode = #tpu.pipeline_mode<synchronous>, transform_indices = @transform_5, window_bounds = array<i64: 160, 32>}, {pipeline_mode = #tpu.pipeline_mode<synchronous>, transform_indices = @transform_6, window_bounds = array<i64: 1, 32>}, {pipeline_mode = #tpu.pipeline_mode<synchronous>, transform_indices = @transform_7, window_bounds = array<i64: 512, 32>}, {pipeline_mode = #tpu.pipeline_mode<synchronous>, transform_indices = @transform_8, window_bounds = array<i64: 1, 32>}, {pipeline_mode = #tpu.pipeline_mode<synchronous>, transform_indices = @transform_9, window_bounds = array<i64: 9, 32, 32>}, {pipeline_mode = #tpu.pipeline_mode<synchronous>, transform_indices = @transform_10, window_bounds = array<i64: 1, 32>}, {pipeline_mode = #tpu.pipeline_mode<synchronous>, transform_indices = @transform_11, window_bounds = array<i64: 9, 32, 32>}, {pipeline_mode = #tpu.pipeline_mode<synchronous>, transform_indices = @transform_12, window_bounds = array<i64: 1, 32>}, {pipeline_mode = #tpu.pipeline_mode<synchronous>, transform_indices = @transform_13, window_bounds = array<i64: 9, 32, 32>}, {pipeline_mode = #tpu.pipeline_mode<synchronous>, transform_indices = @transform_14, window_bounds = array<i64: 1, 32>}, {pipeline_mode = #tpu.pipeline_mode<synchronous>, transform_indices = @transform_15, window_bounds = array<i64: 64, 16>}, {pipeline_mode = #tpu.pipeline_mode<synchronous>, transform_indices = @transform_16, window_bounds = array<i64: 256, 64>}, {transform_indices = @transform_17, window_bounds = array<i64: 1, 256, 32>}, {transform_indices = @transform_18, window_bounds = array<i64: 1, 64, 32>}, {transform_indices = @transform_19, window_bounds = array<i64: 1, 16, 32>}]} {
    %c0 = arith.constant 0 : index
    %c0_0 = arith.constant 0 : index
    %c0_1 = arith.constant 0 : index
    %0 = vector.load %arg3[%c0, %c0_0, %c0_1] : memref<1x16x512xf32, #tpu.memory_space<vmem>>, vector<1x16x512xf32>
    %1 = vector.shape_cast %0 : vector<1x16x512xf32> to vector<16x512xf32>
    %2 = arith.truncf %1 : vector<16x512xf32> to vector<16x512xbf16>
    %c0_2 = arith.constant 0 : index
    %c0_3 = arith.constant 0 : index
    %3 = vector.load %arg8[%c0_2, %c0_3] : memref<512x32xf32, #tpu.memory_space<vmem>>, vector<512x32xf32>
    %4 = arith.truncf %3 : vector<512x32xf32> to vector<512x32xbf16>
    %cst = arith.constant dense<0.000000e+00> : vector<16x32xf32>
    %5 = tpu.matmul %2, %4, %cst {dimension_numbers = #tpu.dot_dimension_numbers<[1], [0], [0], [1], [0, 0, 1, 1], [], []>} : vector<16x512xbf16>, vector<512x32xbf16>, vector<16x32xf32> -> vector<16x32xf32>
    %c0_4 = arith.constant 0 : index
    %c0_5 = arith.constant 0 : index
    %6 = vector.load %arg9[%c0_4, %c0_5] : memref<1x32xf32, #tpu.memory_space<vmem>>, vector<1x32xf32>
    %7 = vector.broadcast %6 : vector<1x32xf32> to vector<16x32xf32>
    %8 = arith.addf %5, %7 : vector<16x32xf32>
    %c0_6 = arith.constant 0 : index
    %c0_7 = arith.constant 0 : index
    %c0_8 = arith.constant 0 : index
    %9 = vector.load %arg2[%c0_6, %c0_7, %c0_8] : memref<1x64x160xf32, #tpu.memory_space<vmem>>, vector<1x64x160xf32>
    %10 = vector.shape_cast %9 : vector<1x64x160xf32> to vector<64x160xf32>
    %11 = arith.truncf %10 : vector<64x160xf32> to vector<64x160xbf16>
    %c0_9 = arith.constant 0 : index
    %c0_10 = arith.constant 0 : index
    %12 = vector.load %arg6[%c0_9, %c0_10] : memref<160x32xf32, #tpu.memory_space<vmem>>, vector<160x32xf32>
    %13 = arith.truncf %12 : vector<160x32xf32> to vector<160x32xbf16>
    %cst_11 = arith.constant dense<0.000000e+00> : vector<64x32xf32>
    %14 = tpu.matmul %11, %13, %cst_11 {dimension_numbers = #tpu.dot_dimension_numbers<[1], [0], [0], [1], [0, 0, 1, 1], [], []>} : vector<64x160xbf16>, vector<160x32xbf16>, vector<64x32xf32> -> vector<64x32xf32>
    %c0_12 = arith.constant 0 : index
    %c0_13 = arith.constant 0 : index
    %15 = vector.load %arg7[%c0_12, %c0_13] : memref<1x32xf32, #tpu.memory_space<vmem>>, vector<1x32xf32>
    %16 = vector.broadcast %15 : vector<1x32xf32> to vector<64x32xf32>
    %17 = arith.addf %14, %16 : vector<64x32xf32>
    %c0_14 = arith.constant 0 : index
    %c0_15 = arith.constant 0 : index
    %18 = vector.load %arg16[%c0_14, %c0_15] : memref<64x16xf32, #tpu.memory_space<vmem>>, vector<64x16xf32>
    %cst_16 = arith.constant dense<0.000000e+00> : vector<64x32xf32>
    %19 = tpu.matmul %18, %8, %cst_16 {dimension_numbers = #tpu.dot_dimension_numbers<[1], [0], [0], [1], [0, 0, 1, 1], [], []>} : vector<64x16xf32>, vector<16x32xf32>, vector<64x32xf32> -> vector<64x32xf32>
    %20 = arith.addf %17, %19 : vector<64x32xf32>
    %c0_17 = arith.constant 0 : index
    %c0_18 = arith.constant 0 : index
    %c0_19 = arith.constant 0 : index
    %21 = vector.load %arg1[%c0_17, %c0_18, %c0_19] : memref<1x256x64xf32, #tpu.memory_space<vmem>>, vector<1x256x64xf32>
    %22 = vector.shape_cast %21 : vector<1x256x64xf32> to vector<256x64xf32>
    %23 = arith.truncf %22 : vector<256x64xf32> to vector<256x64xbf16>
    %c0_20 = arith.constant 0 : index
    %c0_21 = arith.constant 0 : index
    %24 = vector.load %arg4[%c0_20, %c0_21] : memref<64x32xf32, #tpu.memory_space<vmem>>, vector<64x32xf32>
    %25 = arith.truncf %24 : vector<64x32xf32> to vector<64x32xbf16>
    %cst_22 = arith.constant dense<0.000000e+00> : vector<256x32xf32>
    %26 = tpu.matmul %23, %25, %cst_22 {dimension_numbers = #tpu.dot_dimension_numbers<[1], [0], [0], [1], [0, 0, 1, 1], [], []>} : vector<256x64xbf16>, vector<64x32xbf16>, vector<256x32xf32> -> vector<256x32xf32>
    %c0_23 = arith.constant 0 : index
    %c0_24 = arith.constant 0 : index
    %27 = vector.load %arg5[%c0_23, %c0_24] : memref<1x32xf32, #tpu.memory_space<vmem>>, vector<1x32xf32>
    %28 = vector.broadcast %27 : vector<1x32xf32> to vector<256x32xf32>
    %29 = arith.addf %26, %28 : vector<256x32xf32>
    %c0_25 = arith.constant 0 : index
    %c0_26 = arith.constant 0 : index
    %30 = vector.load %arg17[%c0_25, %c0_26] : memref<256x64xf32, #tpu.memory_space<vmem>>, vector<256x64xf32>
    %cst_27 = arith.constant dense<0.000000e+00> : vector<256x32xf32>
    %31 = tpu.matmul %30, %20, %cst_27 {dimension_numbers = #tpu.dot_dimension_numbers<[1], [0], [0], [1], [0, 0, 1, 1], [], []>} : vector<256x64xf32>, vector<64x32xf32>, vector<256x32xf32> -> vector<256x32xf32>
    %32 = arith.addf %29, %31 : vector<256x32xf32>
    %cst_28 = arith.constant 0.000000e+00 : f32
    %33 = vector.broadcast %cst_28 : f32 to vector<24x32xf32>
    %34 = tpu.concatenate %33, %32, %33 in 0 : vector<24x32xf32>, vector<256x32xf32>, vector<24x32xf32> -> vector<304x32xf32>
    %35 = tpu.iota {dimensions = array<i32: 0>} : vector<256x1xi32>
    %c16_i32 = arith.constant 16 : i32
    %c0_i32 = arith.constant 0 : i32
    %36 = arith.cmpi eq, %c16_i32, %c0_i32 : i32
    %c1_i32 = arith.constant 1 : i32
    %37 = arith.select %36, %c1_i32, %c16_i32 : i32
    %38 = vector.broadcast %37 : i32 to vector<256x1xi32>
    %39 = arith.remsi %35, %38 : vector<256x1xi32>
    %c0_i32_29 = arith.constant 0 : i32
    %40 = vector.broadcast %c0_i32_29 : i32 to vector<256x1xi32>
    %41 = arith.cmpi ne, %39, %40 : vector<256x1xi32>
    %c0_i32_30 = arith.constant 0 : i32
    %42 = vector.broadcast %c0_i32_30 : i32 to vector<256x1xi32>
    %43 = arith.cmpi slt, %39, %42 : vector<256x1xi32>
    %c0_i32_31 = arith.constant 0 : i32
    %44 = arith.cmpi slt, %37, %c0_i32_31 : i32
    %45 = vector.broadcast %44 : i1 to vector<256x1xi1>
    %46 = vector.broadcast %45 : vector<256x1xi1> to vector<256x1xi1>
    %47 = arith.xori %43, %46 : vector<256x1xi1>
    %48 = arith.andi %47, %41 : vector<256x1xi1>
    %49 = vector.broadcast %37 : i32 to vector<256x1xi32>
    %50 = arith.addi %39, %49 : vector<256x1xi32>
    %51 = arith.select %48, %50, %39 : vector<256x1xi1>, vector<256x1xi32>
    %c0_32 = arith.constant 0 : index
    %c0_33 = arith.constant 0 : index
    %c0_34 = arith.constant 0 : index
    %52 = vector.load %arg10[%c0_32, %c0_33, %c0_34] : memref<9x32x32xf32, #tpu.memory_space<vmem>>, vector<9x32x32xf32>
    %53 = arith.truncf %52 : vector<9x32x32xf32> to vector<9x32x32xbf16>
    %c0_35 = arith.constant 0 : index
    %c0_36 = arith.constant 0 : index
    %54 = vector.load %arg11[%c0_35, %c0_36] : memref<1x32xf32, #tpu.memory_space<vmem>>, vector<1x32xf32>
    %55 = vector.shape_cast %54 : vector<1x32xf32> to vector<1x32xf32>
    %56 = vector.broadcast %55 : vector<1x32xf32> to vector<256x32xf32>
    %57 = vector.extract_strided_slice %34 {offsets = [7, 0], sizes = [256, 32], strides = [1, 1]} : vector<304x32xf32> to vector<256x32xf32>
    %c-1_i32 = arith.constant -1 : i32
    %58 = vector.broadcast %c-1_i32 : i32 to vector<256x1xi32>
    %59 = arith.addi %51, %58 : vector<256x1xi32>
    %c0_i32_37 = arith.constant 0 : i32
    %60 = vector.broadcast %c0_i32_37 : i32 to vector<256x1xi32>
    %61 = arith.cmpi sge, %59, %60 : vector<256x1xi32>
    %c16_i32_38 = arith.constant 16 : i32
    %62 = vector.broadcast %c16_i32_38 : i32 to vector<256x1xi32>
    %63 = arith.cmpi slt, %59, %62 : vector<256x1xi32>
    %64 = arith.andi %61, %63 : vector<256x1xi1>
    %cst_39 = arith.constant 0.000000e+00 : f32
    %65 = vector.shape_cast %64 : vector<256x1xi1> to vector<256x1xi1>
    %66 = vector.broadcast %65 : vector<256x1xi1> to vector<256x32xi1>
    %67 = vector.broadcast %cst_39 : f32 to vector<256x32xf32>
    %68 = arith.select %66, %57, %67 : vector<256x32xi1>, vector<256x32xf32>
    %69 = arith.truncf %68 : vector<256x32xf32> to vector<256x32xbf16>
    %70 = vector.extract_strided_slice %53 {offsets = [0, 0, 0], sizes = [1, 32, 32], strides = [1, 1, 1]} : vector<9x32x32xbf16> to vector<1x32x32xbf16>
    %71 = vector.shape_cast %70 : vector<1x32x32xbf16> to vector<32x32xbf16>
    %cst_40 = arith.constant dense<0.000000e+00> : vector<256x32xf32>
    %72 = tpu.matmul %69, %71, %cst_40 {dimension_numbers = #tpu.dot_dimension_numbers<[1], [0], [0], [1], [0, 0, 1, 1], [], []>} : vector<256x32xbf16>, vector<32x32xbf16>, vector<256x32xf32> -> vector<256x32xf32>
    %73 = arith.addf %56, %72 : vector<256x32xf32>
    %74 = vector.extract_strided_slice %34 {offsets = [8, 0], sizes = [256, 32], strides = [1, 1]} : vector<304x32xf32> to vector<256x32xf32>
    %75 = arith.truncf %74 : vector<256x32xf32> to vector<256x32xbf16>
    %76 = vector.extract_strided_slice %53 {offsets = [1, 0, 0], sizes = [1, 32, 32], strides = [1, 1, 1]} : vector<9x32x32xbf16> to vector<1x32x32xbf16>
    %77 = vector.shape_cast %76 : vector<1x32x32xbf16> to vector<32x32xbf16>
    %cst_41 = arith.constant dense<0.000000e+00> : vector<256x32xf32>
    %78 = tpu.matmul %75, %77, %cst_41 {dimension_numbers = #tpu.dot_dimension_numbers<[1], [0], [0], [1], [0, 0, 1, 1], [], []>} : vector<256x32xbf16>, vector<32x32xbf16>, vector<256x32xf32> -> vector<256x32xf32>
    %79 = arith.addf %73, %78 : vector<256x32xf32>
    %80 = vector.extract_strided_slice %34 {offsets = [9, 0], sizes = [256, 32], strides = [1, 1]} : vector<304x32xf32> to vector<256x32xf32>
    %c1_i32_42 = arith.constant 1 : i32
    %81 = vector.broadcast %c1_i32_42 : i32 to vector<256x1xi32>
    %82 = arith.addi %51, %81 : vector<256x1xi32>
    %c0_i32_43 = arith.constant 0 : i32
    %83 = vector.broadcast %c0_i32_43 : i32 to vector<256x1xi32>
    %84 = arith.cmpi sge, %82, %83 : vector<256x1xi32>
    %c16_i32_44 = arith.constant 16 : i32
    %85 = vector.broadcast %c16_i32_44 : i32 to vector<256x1xi32>
    %86 = arith.cmpi slt, %82, %85 : vector<256x1xi32>
    %87 = arith.andi %84, %86 : vector<256x1xi1>
    %cst_45 = arith.constant 0.000000e+00 : f32
    %88 = vector.shape_cast %87 : vector<256x1xi1> to vector<256x1xi1>
    %89 = vector.broadcast %88 : vector<256x1xi1> to vector<256x32xi1>
    %90 = vector.broadcast %cst_45 : f32 to vector<256x32xf32>
    %91 = arith.select %89, %80, %90 : vector<256x32xi1>, vector<256x32xf32>
    %92 = arith.truncf %91 : vector<256x32xf32> to vector<256x32xbf16>
    %93 = vector.extract_strided_slice %53 {offsets = [2, 0, 0], sizes = [1, 32, 32], strides = [1, 1, 1]} : vector<9x32x32xbf16> to vector<1x32x32xbf16>
    %94 = vector.shape_cast %93 : vector<1x32x32xbf16> to vector<32x32xbf16>
    %cst_46 = arith.constant dense<0.000000e+00> : vector<256x32xf32>
    %95 = tpu.matmul %92, %94, %cst_46 {dimension_numbers = #tpu.dot_dimension_numbers<[1], [0], [0], [1], [0, 0, 1, 1], [], []>} : vector<256x32xbf16>, vector<32x32xbf16>, vector<256x32xf32> -> vector<256x32xf32>
    %96 = arith.addf %79, %95 : vector<256x32xf32>
    %97 = vector.extract_strided_slice %34 {offsets = [23, 0], sizes = [256, 32], strides = [1, 1]} : vector<304x32xf32> to vector<256x32xf32>
    %c-1_i32_47 = arith.constant -1 : i32
    %98 = vector.broadcast %c-1_i32_47 : i32 to vector<256x1xi32>
    %99 = arith.addi %51, %98 : vector<256x1xi32>
    %c0_i32_48 = arith.constant 0 : i32
    %100 = vector.broadcast %c0_i32_48 : i32 to vector<256x1xi32>
    %101 = arith.cmpi sge, %99, %100 : vector<256x1xi32>
    %c16_i32_49 = arith.constant 16 : i32
    %102 = vector.broadcast %c16_i32_49 : i32 to vector<256x1xi32>
    %103 = arith.cmpi slt, %99, %102 : vector<256x1xi32>
    %104 = arith.andi %101, %103 : vector<256x1xi1>
    %cst_50 = arith.constant 0.000000e+00 : f32
    %105 = vector.shape_cast %104 : vector<256x1xi1> to vector<256x1xi1>
    %106 = vector.broadcast %105 : vector<256x1xi1> to vector<256x32xi1>
    %107 = vector.broadcast %cst_50 : f32 to vector<256x32xf32>
    %108 = arith.select %106, %97, %107 : vector<256x32xi1>, vector<256x32xf32>
    %109 = arith.truncf %108 : vector<256x32xf32> to vector<256x32xbf16>
    %110 = vector.extract_strided_slice %53 {offsets = [3, 0, 0], sizes = [1, 32, 32], strides = [1, 1, 1]} : vector<9x32x32xbf16> to vector<1x32x32xbf16>
    %111 = vector.shape_cast %110 : vector<1x32x32xbf16> to vector<32x32xbf16>
    %cst_51 = arith.constant dense<0.000000e+00> : vector<256x32xf32>
    %112 = tpu.matmul %109, %111, %cst_51 {dimension_numbers = #tpu.dot_dimension_numbers<[1], [0], [0], [1], [0, 0, 1, 1], [], []>} : vector<256x32xbf16>, vector<32x32xbf16>, vector<256x32xf32> -> vector<256x32xf32>
    %113 = arith.addf %96, %112 : vector<256x32xf32>
    %114 = vector.extract_strided_slice %34 {offsets = [24, 0], sizes = [256, 32], strides = [1, 1]} : vector<304x32xf32> to vector<256x32xf32>
    %115 = arith.truncf %114 : vector<256x32xf32> to vector<256x32xbf16>
    %116 = vector.extract_strided_slice %53 {offsets = [4, 0, 0], sizes = [1, 32, 32], strides = [1, 1, 1]} : vector<9x32x32xbf16> to vector<1x32x32xbf16>
    %117 = vector.shape_cast %116 : vector<1x32x32xbf16> to vector<32x32xbf16>
    %cst_52 = arith.constant dense<0.000000e+00> : vector<256x32xf32>
    %118 = tpu.matmul %115, %117, %cst_52 {dimension_numbers = #tpu.dot_dimension_numbers<[1], [0], [0], [1], [0, 0, 1, 1], [], []>} : vector<256x32xbf16>, vector<32x32xbf16>, vector<256x32xf32> -> vector<256x32xf32>
    %119 = arith.addf %113, %118 : vector<256x32xf32>
    %120 = vector.extract_strided_slice %34 {offsets = [25, 0], sizes = [256, 32], strides = [1, 1]} : vector<304x32xf32> to vector<256x32xf32>
    %c1_i32_53 = arith.constant 1 : i32
    %121 = vector.broadcast %c1_i32_53 : i32 to vector<256x1xi32>
    %122 = arith.addi %51, %121 : vector<256x1xi32>
    %c0_i32_54 = arith.constant 0 : i32
    %123 = vector.broadcast %c0_i32_54 : i32 to vector<256x1xi32>
    %124 = arith.cmpi sge, %122, %123 : vector<256x1xi32>
    %c16_i32_55 = arith.constant 16 : i32
    %125 = vector.broadcast %c16_i32_55 : i32 to vector<256x1xi32>
    %126 = arith.cmpi slt, %122, %125 : vector<256x1xi32>
    %127 = arith.andi %124, %126 : vector<256x1xi1>
    %cst_56 = arith.constant 0.000000e+00 : f32
    %128 = vector.shape_cast %127 : vector<256x1xi1> to vector<256x1xi1>
    %129 = vector.broadcast %128 : vector<256x1xi1> to vector<256x32xi1>
    %130 = vector.broadcast %cst_56 : f32 to vector<256x32xf32>
    %131 = arith.select %129, %120, %130 : vector<256x32xi1>, vector<256x32xf32>
    %132 = arith.truncf %131 : vector<256x32xf32> to vector<256x32xbf16>
    %133 = vector.extract_strided_slice %53 {offsets = [5, 0, 0], sizes = [1, 32, 32], strides = [1, 1, 1]} : vector<9x32x32xbf16> to vector<1x32x32xbf16>
    %134 = vector.shape_cast %133 : vector<1x32x32xbf16> to vector<32x32xbf16>
    %cst_57 = arith.constant dense<0.000000e+00> : vector<256x32xf32>
    %135 = tpu.matmul %132, %134, %cst_57 {dimension_numbers = #tpu.dot_dimension_numbers<[1], [0], [0], [1], [0, 0, 1, 1], [], []>} : vector<256x32xbf16>, vector<32x32xbf16>, vector<256x32xf32> -> vector<256x32xf32>
    %136 = arith.addf %119, %135 : vector<256x32xf32>
    %137 = vector.extract_strided_slice %34 {offsets = [39, 0], sizes = [256, 32], strides = [1, 1]} : vector<304x32xf32> to vector<256x32xf32>
    %c-1_i32_58 = arith.constant -1 : i32
    %138 = vector.broadcast %c-1_i32_58 : i32 to vector<256x1xi32>
    %139 = arith.addi %51, %138 : vector<256x1xi32>
    %c0_i32_59 = arith.constant 0 : i32
    %140 = vector.broadcast %c0_i32_59 : i32 to vector<256x1xi32>
    %141 = arith.cmpi sge, %139, %140 : vector<256x1xi32>
    %c16_i32_60 = arith.constant 16 : i32
    %142 = vector.broadcast %c16_i32_60 : i32 to vector<256x1xi32>
    %143 = arith.cmpi slt, %139, %142 : vector<256x1xi32>
    %144 = arith.andi %141, %143 : vector<256x1xi1>
    %cst_61 = arith.constant 0.000000e+00 : f32
    %145 = vector.shape_cast %144 : vector<256x1xi1> to vector<256x1xi1>
    %146 = vector.broadcast %145 : vector<256x1xi1> to vector<256x32xi1>
    %147 = vector.broadcast %cst_61 : f32 to vector<256x32xf32>
    %148 = arith.select %146, %137, %147 : vector<256x32xi1>, vector<256x32xf32>
    %149 = arith.truncf %148 : vector<256x32xf32> to vector<256x32xbf16>
    %150 = vector.extract_strided_slice %53 {offsets = [6, 0, 0], sizes = [1, 32, 32], strides = [1, 1, 1]} : vector<9x32x32xbf16> to vector<1x32x32xbf16>
    %151 = vector.shape_cast %150 : vector<1x32x32xbf16> to vector<32x32xbf16>
    %cst_62 = arith.constant dense<0.000000e+00> : vector<256x32xf32>
    %152 = tpu.matmul %149, %151, %cst_62 {dimension_numbers = #tpu.dot_dimension_numbers<[1], [0], [0], [1], [0, 0, 1, 1], [], []>} : vector<256x32xbf16>, vector<32x32xbf16>, vector<256x32xf32> -> vector<256x32xf32>
    %153 = arith.addf %136, %152 : vector<256x32xf32>
    %154 = vector.extract_strided_slice %34 {offsets = [40, 0], sizes = [256, 32], strides = [1, 1]} : vector<304x32xf32> to vector<256x32xf32>
    %155 = arith.truncf %154 : vector<256x32xf32> to vector<256x32xbf16>
    %156 = vector.extract_strided_slice %53 {offsets = [7, 0, 0], sizes = [1, 32, 32], strides = [1, 1, 1]} : vector<9x32x32xbf16> to vector<1x32x32xbf16>
    %157 = vector.shape_cast %156 : vector<1x32x32xbf16> to vector<32x32xbf16>
    %cst_63 = arith.constant dense<0.000000e+00> : vector<256x32xf32>
    %158 = tpu.matmul %155, %157, %cst_63 {dimension_numbers = #tpu.dot_dimension_numbers<[1], [0], [0], [1], [0, 0, 1, 1], [], []>} : vector<256x32xbf16>, vector<32x32xbf16>, vector<256x32xf32> -> vector<256x32xf32>
    %159 = arith.addf %153, %158 : vector<256x32xf32>
    %160 = vector.extract_strided_slice %34 {offsets = [41, 0], sizes = [256, 32], strides = [1, 1]} : vector<304x32xf32> to vector<256x32xf32>
    %c1_i32_64 = arith.constant 1 : i32
    %161 = vector.broadcast %c1_i32_64 : i32 to vector<256x1xi32>
    %162 = arith.addi %51, %161 : vector<256x1xi32>
    %c0_i32_65 = arith.constant 0 : i32
    %163 = vector.broadcast %c0_i32_65 : i32 to vector<256x1xi32>
    %164 = arith.cmpi sge, %162, %163 : vector<256x1xi32>
    %c16_i32_66 = arith.constant 16 : i32
    %165 = vector.broadcast %c16_i32_66 : i32 to vector<256x1xi32>
    %166 = arith.cmpi slt, %162, %165 : vector<256x1xi32>
    %167 = arith.andi %164, %166 : vector<256x1xi1>
    %cst_67 = arith.constant 0.000000e+00 : f32
    %168 = vector.shape_cast %167 : vector<256x1xi1> to vector<256x1xi1>
    %169 = vector.broadcast %168 : vector<256x1xi1> to vector<256x32xi1>
    %170 = vector.broadcast %cst_67 : f32 to vector<256x32xf32>
    %171 = arith.select %169, %160, %170 : vector<256x32xi1>, vector<256x32xf32>
    %172 = arith.truncf %171 : vector<256x32xf32> to vector<256x32xbf16>
    %173 = vector.extract_strided_slice %53 {offsets = [8, 0, 0], sizes = [1, 32, 32], strides = [1, 1, 1]} : vector<9x32x32xbf16> to vector<1x32x32xbf16>
    %174 = vector.shape_cast %173 : vector<1x32x32xbf16> to vector<32x32xbf16>
    %cst_68 = arith.constant dense<0.000000e+00> : vector<256x32xf32>
    %175 = tpu.matmul %172, %174, %cst_68 {dimension_numbers = #tpu.dot_dimension_numbers<[1], [0], [0], [1], [0, 0, 1, 1], [], []>} : vector<256x32xbf16>, vector<32x32xbf16>, vector<256x32xf32> -> vector<256x32xf32>
    %176 = arith.addf %159, %175 : vector<256x32xf32>
    %c0_69 = arith.constant 0 : index
    %c0_70 = arith.constant 0 : index
    %c0_71 = arith.constant 0 : index
    %177 = vector.load %arg18[%c0_69, %c0_70, %c0_71] : memref<1x256x32xf32, #tpu.memory_space<vmem>>, vector<1x256x32xf32>
    %178 = vector.shape_cast %177 : vector<1x256x32xf32> to vector<256x32xf32>
    %179 = vector.shape_cast %176 : vector<256x32xf32> to vector<1x256x32xf32>
    tpu.vector_store %arg18[%c0_69, %c0_70, %c0_71], %179 {strides = array<i32>} : memref<1x256x32xf32, #tpu.memory_space<vmem>>, vector<1x256x32xf32>,
    %cst_72 = arith.constant 0.000000e+00 : f32
    %180 = vector.broadcast %cst_72 : f32 to vector<16x32xf32>
    %181 = tpu.concatenate %180, %20, %180 in 0 : vector<16x32xf32>, vector<64x32xf32>, vector<16x32xf32> -> vector<96x32xf32>
    %182 = tpu.iota {dimensions = array<i32: 0>} : vector<64x1xi32>
    %c8_i32 = arith.constant 8 : i32
    %c0_i32_73 = arith.constant 0 : i32
    %183 = arith.cmpi eq, %c8_i32, %c0_i32_73 : i32
    %c1_i32_74 = arith.constant 1 : i32
    %184 = arith.select %183, %c1_i32_74, %c8_i32 : i32
    %185 = vector.broadcast %184 : i32 to vector<64x1xi32>
    %186 = arith.remsi %182, %185 : vector<64x1xi32>
    %c0_i32_75 = arith.constant 0 : i32
    %187 = vector.broadcast %c0_i32_75 : i32 to vector<64x1xi32>
    %188 = arith.cmpi ne, %186, %187 : vector<64x1xi32>
    %c0_i32_76 = arith.constant 0 : i32
    %189 = vector.broadcast %c0_i32_76 : i32 to vector<64x1xi32>
    %190 = arith.cmpi slt, %186, %189 : vector<64x1xi32>
    %c0_i32_77 = arith.constant 0 : i32
    %191 = arith.cmpi slt, %184, %c0_i32_77 : i32
    %192 = vector.broadcast %191 : i1 to vector<64x1xi1>
    %193 = vector.broadcast %192 : vector<64x1xi1> to vector<64x1xi1>
    %194 = arith.xori %190, %193 : vector<64x1xi1>
    %195 = arith.andi %194, %188 : vector<64x1xi1>
    %196 = vector.broadcast %184 : i32 to vector<64x1xi32>
    %197 = arith.addi %186, %196 : vector<64x1xi32>
    %198 = arith.select %195, %197, %186 : vector<64x1xi1>, vector<64x1xi32>
    %c0_78 = arith.constant 0 : index
    %c0_79 = arith.constant 0 : index
    %c0_80 = arith.constant 0 : index
    %199 = vector.load %arg12[%c0_78, %c0_79, %c0_80] : memref<9x32x32xf32, #tpu.memory_space<vmem>>, vector<9x32x32xf32>
    %200 = arith.truncf %199 : vector<9x32x32xf32> to vector<9x32x32xbf16>
    %c0_81 = arith.constant 0 : index
    %c0_82 = arith.constant 0 : index
    %201 = vector.load %arg13[%c0_81, %c0_82] : memref<1x32xf32, #tpu.memory_space<vmem>>, vector<1x32xf32>
    %202 = vector.shape_cast %201 : vector<1x32xf32> to vector<1x32xf32>
    %203 = vector.broadcast %202 : vector<1x32xf32> to vector<64x32xf32>
    %204 = vector.extract_strided_slice %181 {offsets = [7, 0], sizes = [64, 32], strides = [1, 1]} : vector<96x32xf32> to vector<64x32xf32>
    %c-1_i32_83 = arith.constant -1 : i32
    %205 = vector.broadcast %c-1_i32_83 : i32 to vector<64x1xi32>
    %206 = arith.addi %198, %205 : vector<64x1xi32>
    %c0_i32_84 = arith.constant 0 : i32
    %207 = vector.broadcast %c0_i32_84 : i32 to vector<64x1xi32>
    %208 = arith.cmpi sge, %206, %207 : vector<64x1xi32>
    %c8_i32_85 = arith.constant 8 : i32
    %209 = vector.broadcast %c8_i32_85 : i32 to vector<64x1xi32>
    %210 = arith.cmpi slt, %206, %209 : vector<64x1xi32>
    %211 = arith.andi %208, %210 : vector<64x1xi1>
    %cst_86 = arith.constant 0.000000e+00 : f32
    %212 = vector.shape_cast %211 : vector<64x1xi1> to vector<64x1xi1>
    %213 = vector.broadcast %212 : vector<64x1xi1> to vector<64x32xi1>
    %214 = vector.broadcast %cst_86 : f32 to vector<64x32xf32>
    %215 = arith.select %213, %204, %214 : vector<64x32xi1>, vector<64x32xf32>
    %216 = arith.truncf %215 : vector<64x32xf32> to vector<64x32xbf16>
    %217 = vector.extract_strided_slice %200 {offsets = [0, 0, 0], sizes = [1, 32, 32], strides = [1, 1, 1]} : vector<9x32x32xbf16> to vector<1x32x32xbf16>
    %218 = vector.shape_cast %217 : vector<1x32x32xbf16> to vector<32x32xbf16>
    %cst_87 = arith.constant dense<0.000000e+00> : vector<64x32xf32>
    %219 = tpu.matmul %216, %218, %cst_87 {dimension_numbers = #tpu.dot_dimension_numbers<[1], [0], [0], [1], [0, 0, 1, 1], [], []>} : vector<64x32xbf16>, vector<32x32xbf16>, vector<64x32xf32> -> vector<64x32xf32>
    %220 = arith.addf %203, %219 : vector<64x32xf32>
    %221 = vector.extract_strided_slice %181 {offsets = [8, 0], sizes = [64, 32], strides = [1, 1]} : vector<96x32xf32> to vector<64x32xf32>
    %222 = arith.truncf %221 : vector<64x32xf32> to vector<64x32xbf16>
    %223 = vector.extract_strided_slice %200 {offsets = [1, 0, 0], sizes = [1, 32, 32], strides = [1, 1, 1]} : vector<9x32x32xbf16> to vector<1x32x32xbf16>
    %224 = vector.shape_cast %223 : vector<1x32x32xbf16> to vector<32x32xbf16>
    %cst_88 = arith.constant dense<0.000000e+00> : vector<64x32xf32>
    %225 = tpu.matmul %222, %224, %cst_88 {dimension_numbers = #tpu.dot_dimension_numbers<[1], [0], [0], [1], [0, 0, 1, 1], [], []>} : vector<64x32xbf16>, vector<32x32xbf16>, vector<64x32xf32> -> vector<64x32xf32>
    %226 = arith.addf %220, %225 : vector<64x32xf32>
    %227 = vector.extract_strided_slice %181 {offsets = [9, 0], sizes = [64, 32], strides = [1, 1]} : vector<96x32xf32> to vector<64x32xf32>
    %c1_i32_89 = arith.constant 1 : i32
    %228 = vector.broadcast %c1_i32_89 : i32 to vector<64x1xi32>
    %229 = arith.addi %198, %228 : vector<64x1xi32>
    %c0_i32_90 = arith.constant 0 : i32
    %230 = vector.broadcast %c0_i32_90 : i32 to vector<64x1xi32>
    %231 = arith.cmpi sge, %229, %230 : vector<64x1xi32>
    %c8_i32_91 = arith.constant 8 : i32
    %232 = vector.broadcast %c8_i32_91 : i32 to vector<64x1xi32>
    %233 = arith.cmpi slt, %229, %232 : vector<64x1xi32>
    %234 = arith.andi %231, %233 : vector<64x1xi1>
    %cst_92 = arith.constant 0.000000e+00 : f32
    %235 = vector.shape_cast %234 : vector<64x1xi1> to vector<64x1xi1>
    %236 = vector.broadcast %235 : vector<64x1xi1> to vector<64x32xi1>
    %237 = vector.broadcast %cst_92 : f32 to vector<64x32xf32>
    %238 = arith.select %236, %227, %237 : vector<64x32xi1>, vector<64x32xf32>
    %239 = arith.truncf %238 : vector<64x32xf32> to vector<64x32xbf16>
    %240 = vector.extract_strided_slice %200 {offsets = [2, 0, 0], sizes = [1, 32, 32], strides = [1, 1, 1]} : vector<9x32x32xbf16> to vector<1x32x32xbf16>
    %241 = vector.shape_cast %240 : vector<1x32x32xbf16> to vector<32x32xbf16>
    %cst_93 = arith.constant dense<0.000000e+00> : vector<64x32xf32>
    %242 = tpu.matmul %239, %241, %cst_93 {dimension_numbers = #tpu.dot_dimension_numbers<[1], [0], [0], [1], [0, 0, 1, 1], [], []>} : vector<64x32xbf16>, vector<32x32xbf16>, vector<64x32xf32> -> vector<64x32xf32>
    %243 = arith.addf %226, %242 : vector<64x32xf32>
    %244 = vector.extract_strided_slice %181 {offsets = [15, 0], sizes = [64, 32], strides = [1, 1]} : vector<96x32xf32> to vector<64x32xf32>
    %c-1_i32_94 = arith.constant -1 : i32
    %245 = vector.broadcast %c-1_i32_94 : i32 to vector<64x1xi32>
    %246 = arith.addi %198, %245 : vector<64x1xi32>
    %c0_i32_95 = arith.constant 0 : i32
    %247 = vector.broadcast %c0_i32_95 : i32 to vector<64x1xi32>
    %248 = arith.cmpi sge, %246, %247 : vector<64x1xi32>
    %c8_i32_96 = arith.constant 8 : i32
    %249 = vector.broadcast %c8_i32_96 : i32 to vector<64x1xi32>
    %250 = arith.cmpi slt, %246, %249 : vector<64x1xi32>
    %251 = arith.andi %248, %250 : vector<64x1xi1>
    %cst_97 = arith.constant 0.000000e+00 : f32
    %252 = vector.shape_cast %251 : vector<64x1xi1> to vector<64x1xi1>
    %253 = vector.broadcast %252 : vector<64x1xi1> to vector<64x32xi1>
    %254 = vector.broadcast %cst_97 : f32 to vector<64x32xf32>
    %255 = arith.select %253, %244, %254 : vector<64x32xi1>, vector<64x32xf32>
    %256 = arith.truncf %255 : vector<64x32xf32> to vector<64x32xbf16>
    %257 = vector.extract_strided_slice %200 {offsets = [3, 0, 0], sizes = [1, 32, 32], strides = [1, 1, 1]} : vector<9x32x32xbf16> to vector<1x32x32xbf16>
    %258 = vector.shape_cast %257 : vector<1x32x32xbf16> to vector<32x32xbf16>
    %cst_98 = arith.constant dense<0.000000e+00> : vector<64x32xf32>
    %259 = tpu.matmul %256, %258, %cst_98 {dimension_numbers = #tpu.dot_dimension_numbers<[1], [0], [0], [1], [0, 0, 1, 1], [], []>} : vector<64x32xbf16>, vector<32x32xbf16>, vector<64x32xf32> -> vector<64x32xf32>
    %260 = arith.addf %243, %259 : vector<64x32xf32>
    %261 = vector.extract_strided_slice %181 {offsets = [16, 0], sizes = [64, 32], strides = [1, 1]} : vector<96x32xf32> to vector<64x32xf32>
    %262 = arith.truncf %261 : vector<64x32xf32> to vector<64x32xbf16>
    %263 = vector.extract_strided_slice %200 {offsets = [4, 0, 0], sizes = [1, 32, 32], strides = [1, 1, 1]} : vector<9x32x32xbf16> to vector<1x32x32xbf16>
    %264 = vector.shape_cast %263 : vector<1x32x32xbf16> to vector<32x32xbf16>
    %cst_99 = arith.constant dense<0.000000e+00> : vector<64x32xf32>
    %265 = tpu.matmul %262, %264, %cst_99 {dimension_numbers = #tpu.dot_dimension_numbers<[1], [0], [0], [1], [0, 0, 1, 1], [], []>} : vector<64x32xbf16>, vector<32x32xbf16>, vector<64x32xf32> -> vector<64x32xf32>
    %266 = arith.addf %260, %265 : vector<64x32xf32>
    %267 = vector.extract_strided_slice %181 {offsets = [17, 0], sizes = [64, 32], strides = [1, 1]} : vector<96x32xf32> to vector<64x32xf32>
    %c1_i32_100 = arith.constant 1 : i32
    %268 = vector.broadcast %c1_i32_100 : i32 to vector<64x1xi32>
    %269 = arith.addi %198, %268 : vector<64x1xi32>
    %c0_i32_101 = arith.constant 0 : i32
    %270 = vector.broadcast %c0_i32_101 : i32 to vector<64x1xi32>
    %271 = arith.cmpi sge, %269, %270 : vector<64x1xi32>
    %c8_i32_102 = arith.constant 8 : i32
    %272 = vector.broadcast %c8_i32_102 : i32 to vector<64x1xi32>
    %273 = arith.cmpi slt, %269, %272 : vector<64x1xi32>
    %274 = arith.andi %271, %273 : vector<64x1xi1>
    %cst_103 = arith.constant 0.000000e+00 : f32
    %275 = vector.shape_cast %274 : vector<64x1xi1> to vector<64x1xi1>
    %276 = vector.broadcast %275 : vector<64x1xi1> to vector<64x32xi1>
    %277 = vector.broadcast %cst_103 : f32 to vector<64x32xf32>
    %278 = arith.select %276, %267, %277 : vector<64x32xi1>, vector<64x32xf32>
    %279 = arith.truncf %278 : vector<64x32xf32> to vector<64x32xbf16>
    %280 = vector.extract_strided_slice %200 {offsets = [5, 0, 0], sizes = [1, 32, 32], strides = [1, 1, 1]} : vector<9x32x32xbf16> to vector<1x32x32xbf16>
    %281 = vector.shape_cast %280 : vector<1x32x32xbf16> to vector<32x32xbf16>
    %cst_104 = arith.constant dense<0.000000e+00> : vector<64x32xf32>
    %282 = tpu.matmul %279, %281, %cst_104 {dimension_numbers = #tpu.dot_dimension_numbers<[1], [0], [0], [1], [0, 0, 1, 1], [], []>} : vector<64x32xbf16>, vector<32x32xbf16>, vector<64x32xf32> -> vector<64x32xf32>
    %283 = arith.addf %266, %282 : vector<64x32xf32>
    %284 = vector.extract_strided_slice %181 {offsets = [23, 0], sizes = [64, 32], strides = [1, 1]} : vector<96x32xf32> to vector<64x32xf32>
    %c-1_i32_105 = arith.constant -1 : i32
    %285 = vector.broadcast %c-1_i32_105 : i32 to vector<64x1xi32>
    %286 = arith.addi %198, %285 : vector<64x1xi32>
    %c0_i32_106 = arith.constant 0 : i32
    %287 = vector.broadcast %c0_i32_106 : i32 to vector<64x1xi32>
    %288 = arith.cmpi sge, %286, %287 : vector<64x1xi32>
    %c8_i32_107 = arith.constant 8 : i32
    %289 = vector.broadcast %c8_i32_107 : i32 to vector<64x1xi32>
    %290 = arith.cmpi slt, %286, %289 : vector<64x1xi32>
    %291 = arith.andi %288, %290 : vector<64x1xi1>
    %cst_108 = arith.constant 0.000000e+00 : f32
    %292 = vector.shape_cast %291 : vector<64x1xi1> to vector<64x1xi1>
    %293 = vector.broadcast %292 : vector<64x1xi1> to vector<64x32xi1>
    %294 = vector.broadcast %cst_108 : f32 to vector<64x32xf32>
    %295 = arith.select %293, %284, %294 : vector<64x32xi1>, vector<64x32xf32>
    %296 = arith.truncf %295 : vector<64x32xf32> to vector<64x32xbf16>
    %297 = vector.extract_strided_slice %200 {offsets = [6, 0, 0], sizes = [1, 32, 32], strides = [1, 1, 1]} : vector<9x32x32xbf16> to vector<1x32x32xbf16>
    %298 = vector.shape_cast %297 : vector<1x32x32xbf16> to vector<32x32xbf16>
    %cst_109 = arith.constant dense<0.000000e+00> : vector<64x32xf32>
    %299 = tpu.matmul %296, %298, %cst_109 {dimension_numbers = #tpu.dot_dimension_numbers<[1], [0], [0], [1], [0, 0, 1, 1], [], []>} : vector<64x32xbf16>, vector<32x32xbf16>, vector<64x32xf32> -> vector<64x32xf32>
    %300 = arith.addf %283, %299 : vector<64x32xf32>
    %301 = vector.extract_strided_slice %181 {offsets = [24, 0], sizes = [64, 32], strides = [1, 1]} : vector<96x32xf32> to vector<64x32xf32>
    %302 = arith.truncf %301 : vector<64x32xf32> to vector<64x32xbf16>
    %303 = vector.extract_strided_slice %200 {offsets = [7, 0, 0], sizes = [1, 32, 32], strides = [1, 1, 1]} : vector<9x32x32xbf16> to vector<1x32x32xbf16>
    %304 = vector.shape_cast %303 : vector<1x32x32xbf16> to vector<32x32xbf16>
    %cst_110 = arith.constant dense<0.000000e+00> : vector<64x32xf32>
    %305 = tpu.matmul %302, %304, %cst_110 {dimension_numbers = #tpu.dot_dimension_numbers<[1], [0], [0], [1], [0, 0, 1, 1], [], []>} : vector<64x32xbf16>, vector<32x32xbf16>, vector<64x32xf32> -> vector<64x32xf32>
    %306 = arith.addf %300, %305 : vector<64x32xf32>
    %307 = vector.extract_strided_slice %181 {offsets = [25, 0], sizes = [64, 32], strides = [1, 1]} : vector<96x32xf32> to vector<64x32xf32>
    %c1_i32_111 = arith.constant 1 : i32
    %308 = vector.broadcast %c1_i32_111 : i32 to vector<64x1xi32>
    %309 = arith.addi %198, %308 : vector<64x1xi32>
    %c0_i32_112 = arith.constant 0 : i32
    %310 = vector.broadcast %c0_i32_112 : i32 to vector<64x1xi32>
    %311 = arith.cmpi sge, %309, %310 : vector<64x1xi32>
    %c8_i32_113 = arith.constant 8 : i32
    %312 = vector.broadcast %c8_i32_113 : i32 to vector<64x1xi32>
    %313 = arith.cmpi slt, %309, %312 : vector<64x1xi32>
    %314 = arith.andi %311, %313 : vector<64x1xi1>
    %cst_114 = arith.constant 0.000000e+00 : f32
    %315 = vector.shape_cast %314 : vector<64x1xi1> to vector<64x1xi1>
    %316 = vector.broadcast %315 : vector<64x1xi1> to vector<64x32xi1>
    %317 = vector.broadcast %cst_114 : f32 to vector<64x32xf32>
    %318 = arith.select %316, %307, %317 : vector<64x32xi1>, vector<64x32xf32>
    %319 = arith.truncf %318 : vector<64x32xf32> to vector<64x32xbf16>
    %320 = vector.extract_strided_slice %200 {offsets = [8, 0, 0], sizes = [1, 32, 32], strides = [1, 1, 1]} : vector<9x32x32xbf16> to vector<1x32x32xbf16>
    %321 = vector.shape_cast %320 : vector<1x32x32xbf16> to vector<32x32xbf16>
    %cst_115 = arith.constant dense<0.000000e+00> : vector<64x32xf32>
    %322 = tpu.matmul %319, %321, %cst_115 {dimension_numbers = #tpu.dot_dimension_numbers<[1], [0], [0], [1], [0, 0, 1, 1], [], []>} : vector<64x32xbf16>, vector<32x32xbf16>, vector<64x32xf32> -> vector<64x32xf32>
    %323 = arith.addf %306, %322 : vector<64x32xf32>
    %c0_116 = arith.constant 0 : index
    %c0_117 = arith.constant 0 : index
    %c0_118 = arith.constant 0 : index
    %324 = vector.load %arg19[%c0_116, %c0_117, %c0_118] : memref<1x64x32xf32, #tpu.memory_space<vmem>>, vector<1x64x32xf32>
    %325 = vector.shape_cast %324 : vector<1x64x32xf32> to vector<64x32xf32>
    %326 = vector.shape_cast %323 : vector<64x32xf32> to vector<1x64x32xf32>
    tpu.vector_store %arg19[%c0_116, %c0_117, %c0_118], %326 {strides = array<i32>} : memref<1x64x32xf32, #tpu.memory_space<vmem>>, vector<1x64x32xf32>,
    %cst_119 = arith.constant 0.000000e+00 : f32
    %327 = vector.broadcast %cst_119 : f32 to vector<8x32xf32>
    %328 = tpu.concatenate %327, %8, %327 in 0 : vector<8x32xf32>, vector<16x32xf32>, vector<8x32xf32> -> vector<32x32xf32>
    %329 = tpu.iota {dimensions = array<i32: 0>} : vector<16x1xi32>
    %c4_i32 = arith.constant 4 : i32
    %c0_i32_120 = arith.constant 0 : i32
    %330 = arith.cmpi eq, %c4_i32, %c0_i32_120 : i32
    %c1_i32_121 = arith.constant 1 : i32
    %331 = arith.select %330, %c1_i32_121, %c4_i32 : i32
    %332 = vector.broadcast %331 : i32 to vector<16x1xi32>
    %333 = arith.remsi %329, %332 : vector<16x1xi32>
    %c0_i32_122 = arith.constant 0 : i32
    %334 = vector.broadcast %c0_i32_122 : i32 to vector<16x1xi32>
    %335 = arith.cmpi ne, %333, %334 : vector<16x1xi32>
    %c0_i32_123 = arith.constant 0 : i32
    %336 = vector.broadcast %c0_i32_123 : i32 to vector<16x1xi32>
    %337 = arith.cmpi slt, %333, %336 : vector<16x1xi32>
    %c0_i32_124 = arith.constant 0 : i32
    %338 = arith.cmpi slt, %331, %c0_i32_124 : i32
    %339 = vector.broadcast %338 : i1 to vector<16x1xi1>
    %340 = vector.broadcast %339 : vector<16x1xi1> to vector<16x1xi1>
    %341 = arith.xori %337, %340 : vector<16x1xi1>
    %342 = arith.andi %341, %335 : vector<16x1xi1>
    %343 = vector.broadcast %331 : i32 to vector<16x1xi32>
    %344 = arith.addi %333, %343 : vector<16x1xi32>
    %345 = arith.select %342, %344, %333 : vector<16x1xi1>, vector<16x1xi32>
    %c0_125 = arith.constant 0 : index
    %c0_126 = arith.constant 0 : index
    %c0_127 = arith.constant 0 : index
    %346 = vector.load %arg14[%c0_125, %c0_126, %c0_127] : memref<9x32x32xf32, #tpu.memory_space<vmem>>, vector<9x32x32xf32>
    %347 = arith.truncf %346 : vector<9x32x32xf32> to vector<9x32x32xbf16>
    %c0_128 = arith.constant 0 : index
    %c0_129 = arith.constant 0 : index
    %348 = vector.load %arg15[%c0_128, %c0_129] : memref<1x32xf32, #tpu.memory_space<vmem>>, vector<1x32xf32>
    %349 = vector.shape_cast %348 : vector<1x32xf32> to vector<1x32xf32>
    %350 = vector.broadcast %349 : vector<1x32xf32> to vector<16x32xf32>
    %351 = vector.extract_strided_slice %328 {offsets = [3, 0], sizes = [16, 32], strides = [1, 1]} : vector<32x32xf32> to vector<16x32xf32>
    %c-1_i32_130 = arith.constant -1 : i32
    %352 = vector.broadcast %c-1_i32_130 : i32 to vector<16x1xi32>
    %353 = arith.addi %345, %352 : vector<16x1xi32>
    %c0_i32_131 = arith.constant 0 : i32
    %354 = vector.broadcast %c0_i32_131 : i32 to vector<16x1xi32>
    %355 = arith.cmpi sge, %353, %354 : vector<16x1xi32>
    %c4_i32_132 = arith.constant 4 : i32
    %356 = vector.broadcast %c4_i32_132 : i32 to vector<16x1xi32>
    %357 = arith.cmpi slt, %353, %356 : vector<16x1xi32>
    %358 = arith.andi %355, %357 : vector<16x1xi1>
    %cst_133 = arith.constant 0.000000e+00 : f32
    %359 = vector.shape_cast %358 : vector<16x1xi1> to vector<16x1xi1>
    %360 = vector.broadcast %359 : vector<16x1xi1> to vector<16x32xi1>
    %361 = vector.broadcast %cst_133 : f32 to vector<16x32xf32>
    %362 = arith.select %360, %351, %361 : vector<16x32xi1>, vector<16x32xf32>
    %363 = arith.truncf %362 : vector<16x32xf32> to vector<16x32xbf16>
    %364 = vector.extract_strided_slice %347 {offsets = [0, 0, 0], sizes = [1, 32, 32], strides = [1, 1, 1]} : vector<9x32x32xbf16> to vector<1x32x32xbf16>
    %365 = vector.shape_cast %364 : vector<1x32x32xbf16> to vector<32x32xbf16>
    %cst_134 = arith.constant dense<0.000000e+00> : vector<16x32xf32>
    %366 = tpu.matmul %363, %365, %cst_134 {dimension_numbers = #tpu.dot_dimension_numbers<[1], [0], [0], [1], [0, 0, 1, 1], [], []>} : vector<16x32xbf16>, vector<32x32xbf16>, vector<16x32xf32> -> vector<16x32xf32>
    %367 = arith.addf %350, %366 : vector<16x32xf32>
    %368 = vector.extract_strided_slice %328 {offsets = [4, 0], sizes = [16, 32], strides = [1, 1]} : vector<32x32xf32> to vector<16x32xf32>
    %369 = arith.truncf %368 : vector<16x32xf32> to vector<16x32xbf16>
    %370 = vector.extract_strided_slice %347 {offsets = [1, 0, 0], sizes = [1, 32, 32], strides = [1, 1, 1]} : vector<9x32x32xbf16> to vector<1x32x32xbf16>
    %371 = vector.shape_cast %370 : vector<1x32x32xbf16> to vector<32x32xbf16>
    %cst_135 = arith.constant dense<0.000000e+00> : vector<16x32xf32>
    %372 = tpu.matmul %369, %371, %cst_135 {dimension_numbers = #tpu.dot_dimension_numbers<[1], [0], [0], [1], [0, 0, 1, 1], [], []>} : vector<16x32xbf16>, vector<32x32xbf16>, vector<16x32xf32> -> vector<16x32xf32>
    %373 = arith.addf %367, %372 : vector<16x32xf32>
    %374 = vector.extract_strided_slice %328 {offsets = [5, 0], sizes = [16, 32], strides = [1, 1]} : vector<32x32xf32> to vector<16x32xf32>
    %c1_i32_136 = arith.constant 1 : i32
    %375 = vector.broadcast %c1_i32_136 : i32 to vector<16x1xi32>
    %376 = arith.addi %345, %375 : vector<16x1xi32>
    %c0_i32_137 = arith.constant 0 : i32
    %377 = vector.broadcast %c0_i32_137 : i32 to vector<16x1xi32>
    %378 = arith.cmpi sge, %376, %377 : vector<16x1xi32>
    %c4_i32_138 = arith.constant 4 : i32
    %379 = vector.broadcast %c4_i32_138 : i32 to vector<16x1xi32>
    %380 = arith.cmpi slt, %376, %379 : vector<16x1xi32>
    %381 = arith.andi %378, %380 : vector<16x1xi1>
    %cst_139 = arith.constant 0.000000e+00 : f32
    %382 = vector.shape_cast %381 : vector<16x1xi1> to vector<16x1xi1>
    %383 = vector.broadcast %382 : vector<16x1xi1> to vector<16x32xi1>
    %384 = vector.broadcast %cst_139 : f32 to vector<16x32xf32>
    %385 = arith.select %383, %374, %384 : vector<16x32xi1>, vector<16x32xf32>
    %386 = arith.truncf %385 : vector<16x32xf32> to vector<16x32xbf16>
    %387 = vector.extract_strided_slice %347 {offsets = [2, 0, 0], sizes = [1, 32, 32], strides = [1, 1, 1]} : vector<9x32x32xbf16> to vector<1x32x32xbf16>
    %388 = vector.shape_cast %387 : vector<1x32x32xbf16> to vector<32x32xbf16>
    %cst_140 = arith.constant dense<0.000000e+00> : vector<16x32xf32>
    %389 = tpu.matmul %386, %388, %cst_140 {dimension_numbers = #tpu.dot_dimension_numbers<[1], [0], [0], [1], [0, 0, 1, 1], [], []>} : vector<16x32xbf16>, vector<32x32xbf16>, vector<16x32xf32> -> vector<16x32xf32>
    %390 = arith.addf %373, %389 : vector<16x32xf32>
    %391 = vector.extract_strided_slice %328 {offsets = [7, 0], sizes = [16, 32], strides = [1, 1]} : vector<32x32xf32> to vector<16x32xf32>
    %c-1_i32_141 = arith.constant -1 : i32
    %392 = vector.broadcast %c-1_i32_141 : i32 to vector<16x1xi32>
    %393 = arith.addi %345, %392 : vector<16x1xi32>
    %c0_i32_142 = arith.constant 0 : i32
    %394 = vector.broadcast %c0_i32_142 : i32 to vector<16x1xi32>
    %395 = arith.cmpi sge, %393, %394 : vector<16x1xi32>
    %c4_i32_143 = arith.constant 4 : i32
    %396 = vector.broadcast %c4_i32_143 : i32 to vector<16x1xi32>
    %397 = arith.cmpi slt, %393, %396 : vector<16x1xi32>
    %398 = arith.andi %395, %397 : vector<16x1xi1>
    %cst_144 = arith.constant 0.000000e+00 : f32
    %399 = vector.shape_cast %398 : vector<16x1xi1> to vector<16x1xi1>
    %400 = vector.broadcast %399 : vector<16x1xi1> to vector<16x32xi1>
    %401 = vector.broadcast %cst_144 : f32 to vector<16x32xf32>
    %402 = arith.select %400, %391, %401 : vector<16x32xi1>, vector<16x32xf32>
    %403 = arith.truncf %402 : vector<16x32xf32> to vector<16x32xbf16>
    %404 = vector.extract_strided_slice %347 {offsets = [3, 0, 0], sizes = [1, 32, 32], strides = [1, 1, 1]} : vector<9x32x32xbf16> to vector<1x32x32xbf16>
    %405 = vector.shape_cast %404 : vector<1x32x32xbf16> to vector<32x32xbf16>
    %cst_145 = arith.constant dense<0.000000e+00> : vector<16x32xf32>
    %406 = tpu.matmul %403, %405, %cst_145 {dimension_numbers = #tpu.dot_dimension_numbers<[1], [0], [0], [1], [0, 0, 1, 1], [], []>} : vector<16x32xbf16>, vector<32x32xbf16>, vector<16x32xf32> -> vector<16x32xf32>
    %407 = arith.addf %390, %406 : vector<16x32xf32>
    %408 = vector.extract_strided_slice %328 {offsets = [8, 0], sizes = [16, 32], strides = [1, 1]} : vector<32x32xf32> to vector<16x32xf32>
    %409 = arith.truncf %408 : vector<16x32xf32> to vector<16x32xbf16>
    %410 = vector.extract_strided_slice %347 {offsets = [4, 0, 0], sizes = [1, 32, 32], strides = [1, 1, 1]} : vector<9x32x32xbf16> to vector<1x32x32xbf16>
    %411 = vector.shape_cast %410 : vector<1x32x32xbf16> to vector<32x32xbf16>
    %cst_146 = arith.constant dense<0.000000e+00> : vector<16x32xf32>
    %412 = tpu.matmul %409, %411, %cst_146 {dimension_numbers = #tpu.dot_dimension_numbers<[1], [0], [0], [1], [0, 0, 1, 1], [], []>} : vector<16x32xbf16>, vector<32x32xbf16>, vector<16x32xf32> -> vector<16x32xf32>
    %413 = arith.addf %407, %412 : vector<16x32xf32>
    %414 = vector.extract_strided_slice %328 {offsets = [9, 0], sizes = [16, 32], strides = [1, 1]} : vector<32x32xf32> to vector<16x32xf32>
    %c1_i32_147 = arith.constant 1 : i32
    %415 = vector.broadcast %c1_i32_147 : i32 to vector<16x1xi32>
    %416 = arith.addi %345, %415 : vector<16x1xi32>
    %c0_i32_148 = arith.constant 0 : i32
    %417 = vector.broadcast %c0_i32_148 : i32 to vector<16x1xi32>
    %418 = arith.cmpi sge, %416, %417 : vector<16x1xi32>
    %c4_i32_149 = arith.constant 4 : i32
    %419 = vector.broadcast %c4_i32_149 : i32 to vector<16x1xi32>
    %420 = arith.cmpi slt, %416, %419 : vector<16x1xi32>
    %421 = arith.andi %418, %420 : vector<16x1xi1>
    %cst_150 = arith.constant 0.000000e+00 : f32
    %422 = vector.shape_cast %421 : vector<16x1xi1> to vector<16x1xi1>
    %423 = vector.broadcast %422 : vector<16x1xi1> to vector<16x32xi1>
    %424 = vector.broadcast %cst_150 : f32 to vector<16x32xf32>
    %425 = arith.select %423, %414, %424 : vector<16x32xi1>, vector<16x32xf32>
    %426 = arith.truncf %425 : vector<16x32xf32> to vector<16x32xbf16>
    %427 = vector.extract_strided_slice %347 {offsets = [5, 0, 0], sizes = [1, 32, 32], strides = [1, 1, 1]} : vector<9x32x32xbf16> to vector<1x32x32xbf16>
    %428 = vector.shape_cast %427 : vector<1x32x32xbf16> to vector<32x32xbf16>
    %cst_151 = arith.constant dense<0.000000e+00> : vector<16x32xf32>
    %429 = tpu.matmul %426, %428, %cst_151 {dimension_numbers = #tpu.dot_dimension_numbers<[1], [0], [0], [1], [0, 0, 1, 1], [], []>} : vector<16x32xbf16>, vector<32x32xbf16>, vector<16x32xf32> -> vector<16x32xf32>
    %430 = arith.addf %413, %429 : vector<16x32xf32>
    %431 = vector.extract_strided_slice %328 {offsets = [11, 0], sizes = [16, 32], strides = [1, 1]} : vector<32x32xf32> to vector<16x32xf32>
    %c-1_i32_152 = arith.constant -1 : i32
    %432 = vector.broadcast %c-1_i32_152 : i32 to vector<16x1xi32>
    %433 = arith.addi %345, %432 : vector<16x1xi32>
    %c0_i32_153 = arith.constant 0 : i32
    %434 = vector.broadcast %c0_i32_153 : i32 to vector<16x1xi32>
    %435 = arith.cmpi sge, %433, %434 : vector<16x1xi32>
    %c4_i32_154 = arith.constant 4 : i32
    %436 = vector.broadcast %c4_i32_154 : i32 to vector<16x1xi32>
    %437 = arith.cmpi slt, %433, %436 : vector<16x1xi32>
    %438 = arith.andi %435, %437 : vector<16x1xi1>
    %cst_155 = arith.constant 0.000000e+00 : f32
    %439 = vector.shape_cast %438 : vector<16x1xi1> to vector<16x1xi1>
    %440 = vector.broadcast %439 : vector<16x1xi1> to vector<16x32xi1>
    %441 = vector.broadcast %cst_155 : f32 to vector<16x32xf32>
    %442 = arith.select %440, %431, %441 : vector<16x32xi1>, vector<16x32xf32>
    %443 = arith.truncf %442 : vector<16x32xf32> to vector<16x32xbf16>
    %444 = vector.extract_strided_slice %347 {offsets = [6, 0, 0], sizes = [1, 32, 32], strides = [1, 1, 1]} : vector<9x32x32xbf16> to vector<1x32x32xbf16>
    %445 = vector.shape_cast %444 : vector<1x32x32xbf16> to vector<32x32xbf16>
    %cst_156 = arith.constant dense<0.000000e+00> : vector<16x32xf32>
    %446 = tpu.matmul %443, %445, %cst_156 {dimension_numbers = #tpu.dot_dimension_numbers<[1], [0], [0], [1], [0, 0, 1, 1], [], []>} : vector<16x32xbf16>, vector<32x32xbf16>, vector<16x32xf32> -> vector<16x32xf32>
    %447 = arith.addf %430, %446 : vector<16x32xf32>
    %448 = vector.extract_strided_slice %328 {offsets = [12, 0], sizes = [16, 32], strides = [1, 1]} : vector<32x32xf32> to vector<16x32xf32>
    %449 = arith.truncf %448 : vector<16x32xf32> to vector<16x32xbf16>
    %450 = vector.extract_strided_slice %347 {offsets = [7, 0, 0], sizes = [1, 32, 32], strides = [1, 1, 1]} : vector<9x32x32xbf16> to vector<1x32x32xbf16>
    %451 = vector.shape_cast %450 : vector<1x32x32xbf16> to vector<32x32xbf16>
    %cst_157 = arith.constant dense<0.000000e+00> : vector<16x32xf32>
    %452 = tpu.matmul %449, %451, %cst_157 {dimension_numbers = #tpu.dot_dimension_numbers<[1], [0], [0], [1], [0, 0, 1, 1], [], []>} : vector<16x32xbf16>, vector<32x32xbf16>, vector<16x32xf32> -> vector<16x32xf32>
    %453 = arith.addf %447, %452 : vector<16x32xf32>
    %454 = vector.extract_strided_slice %328 {offsets = [13, 0], sizes = [16, 32], strides = [1, 1]} : vector<32x32xf32> to vector<16x32xf32>
    %c1_i32_158 = arith.constant 1 : i32
    %455 = vector.broadcast %c1_i32_158 : i32 to vector<16x1xi32>
    %456 = arith.addi %345, %455 : vector<16x1xi32>
    %c0_i32_159 = arith.constant 0 : i32
    %457 = vector.broadcast %c0_i32_159 : i32 to vector<16x1xi32>
    %458 = arith.cmpi sge, %456, %457 : vector<16x1xi32>
    %c4_i32_160 = arith.constant 4 : i32
    %459 = vector.broadcast %c4_i32_160 : i32 to vector<16x1xi32>
    %460 = arith.cmpi slt, %456, %459 : vector<16x1xi32>
    %461 = arith.andi %458, %460 : vector<16x1xi1>
    %cst_161 = arith.constant 0.000000e+00 : f32
    %462 = vector.shape_cast %461 : vector<16x1xi1> to vector<16x1xi1>
    %463 = vector.broadcast %462 : vector<16x1xi1> to vector<16x32xi1>
    %464 = vector.broadcast %cst_161 : f32 to vector<16x32xf32>
    %465 = arith.select %463, %454, %464 : vector<16x32xi1>, vector<16x32xf32>
    %466 = arith.truncf %465 : vector<16x32xf32> to vector<16x32xbf16>
    %467 = vector.extract_strided_slice %347 {offsets = [8, 0, 0], sizes = [1, 32, 32], strides = [1, 1, 1]} : vector<9x32x32xbf16> to vector<1x32x32xbf16>
    %468 = vector.shape_cast %467 : vector<1x32x32xbf16> to vector<32x32xbf16>
    %cst_162 = arith.constant dense<0.000000e+00> : vector<16x32xf32>
    %469 = tpu.matmul %466, %468, %cst_162 {dimension_numbers = #tpu.dot_dimension_numbers<[1], [0], [0], [1], [0, 0, 1, 1], [], []>} : vector<16x32xbf16>, vector<32x32xbf16>, vector<16x32xf32> -> vector<16x32xf32>
    %470 = arith.addf %453, %469 : vector<16x32xf32>
    %c0_163 = arith.constant 0 : index
    %c0_164 = arith.constant 0 : index
    %c0_165 = arith.constant 0 : index
    %471 = vector.load %arg20[%c0_163, %c0_164, %c0_165] : memref<1x16x32xf32, #tpu.memory_space<vmem>>, vector<1x16x32xf32>
    %472 = vector.shape_cast %471 : vector<1x16x32xf32> to vector<16x32xf32>
    %473 = vector.shape_cast %470 : vector<16x32xf32> to vector<1x16x32xf32>
    tpu.vector_store %arg20[%c0_163, %c0_164, %c0_165], %473 {strides = array<i32>} : memref<1x16x32xf32, #tpu.memory_space<vmem>>, vector<1x16x32xf32>,
    return
  }
  func.func @transform_0(%arg0: i32) -> (i32, i32, i32) {
    %c0_i32 = arith.constant 0 : i32
    %c0_i32_0 = arith.constant 0 : i32
    %c0_i32_1 = arith.constant 0 : i32
    return %arg0, %c0_i32, %c0_i32_0 : i32, i32, i32
  }
  func.func @transform_1(%arg0: i32) -> (i32, i32, i32) {
    %c0_i32 = arith.constant 0 : i32
    %c0_i32_0 = arith.constant 0 : i32
    %c0_i32_1 = arith.constant 0 : i32
    return %arg0, %c0_i32, %c0_i32_0 : i32, i32, i32
  }
  func.func @transform_2(%arg0: i32) -> (i32, i32, i32) {
    %c0_i32 = arith.constant 0 : i32
    %c0_i32_0 = arith.constant 0 : i32
    %c0_i32_1 = arith.constant 0 : i32
    return %arg0, %c0_i32, %c0_i32_0 : i32, i32, i32
  }
  func.func @transform_3(%arg0: i32) -> (i32, i32) {
    %c0_i32 = arith.constant 0 : i32
    %c0_i32_0 = arith.constant 0 : i32
    %c0_i32_1 = arith.constant 0 : i32
    return %c0_i32, %c0_i32_0 : i32, i32
  }
  func.func @transform_4(%arg0: i32) -> (i32, i32) {
    %c0_i32 = arith.constant 0 : i32
    %c0_i32_0 = arith.constant 0 : i32
    %c0_i32_1 = arith.constant 0 : i32
    return %c0_i32, %c0_i32_0 : i32, i32
  }
  func.func @transform_5(%arg0: i32) -> (i32, i32) {
    %c0_i32 = arith.constant 0 : i32
    %c0_i32_0 = arith.constant 0 : i32
    %c0_i32_1 = arith.constant 0 : i32
    return %c0_i32, %c0_i32_0 : i32, i32
  }
  func.func @transform_6(%arg0: i32) -> (i32, i32) {
    %c0_i32 = arith.constant 0 : i32
    %c0_i32_0 = arith.constant 0 : i32
    %c0_i32_1 = arith.constant 0 : i32
    return %c0_i32, %c0_i32_0 : i32, i32
  }
  func.func @transform_7(%arg0: i32) -> (i32, i32) {
    %c0_i32 = arith.constant 0 : i32
    %c0_i32_0 = arith.constant 0 : i32
    %c0_i32_1 = arith.constant 0 : i32
    return %c0_i32, %c0_i32_0 : i32, i32
  }
  func.func @transform_8(%arg0: i32) -> (i32, i32) {
    %c0_i32 = arith.constant 0 : i32
    %c0_i32_0 = arith.constant 0 : i32
    %c0_i32_1 = arith.constant 0 : i32
    return %c0_i32, %c0_i32_0 : i32, i32
  }
  func.func @transform_9(%arg0: i32) -> (i32, i32, i32) {
    %c0_i32 = arith.constant 0 : i32
    %c0_i32_0 = arith.constant 0 : i32
    %c0_i32_1 = arith.constant 0 : i32
    %c0_i32_2 = arith.constant 0 : i32
    return %c0_i32, %c0_i32_0, %c0_i32_1 : i32, i32, i32
  }
  func.func @transform_10(%arg0: i32) -> (i32, i32) {
    %c0_i32 = arith.constant 0 : i32
    %c0_i32_0 = arith.constant 0 : i32
    %c0_i32_1 = arith.constant 0 : i32
    return %c0_i32, %c0_i32_0 : i32, i32
  }
  func.func @transform_11(%arg0: i32) -> (i32, i32, i32) {
    %c0_i32 = arith.constant 0 : i32
    %c0_i32_0 = arith.constant 0 : i32
    %c0_i32_1 = arith.constant 0 : i32
    %c0_i32_2 = arith.constant 0 : i32
    return %c0_i32, %c0_i32_0, %c0_i32_1 : i32, i32, i32
  }
  func.func @transform_12(%arg0: i32) -> (i32, i32) {
    %c0_i32 = arith.constant 0 : i32
    %c0_i32_0 = arith.constant 0 : i32
    %c0_i32_1 = arith.constant 0 : i32
    return %c0_i32, %c0_i32_0 : i32, i32
  }
  func.func @transform_13(%arg0: i32) -> (i32, i32, i32) {
    %c0_i32 = arith.constant 0 : i32
    %c0_i32_0 = arith.constant 0 : i32
    %c0_i32_1 = arith.constant 0 : i32
    %c0_i32_2 = arith.constant 0 : i32
    return %c0_i32, %c0_i32_0, %c0_i32_1 : i32, i32, i32
  }
  func.func @transform_14(%arg0: i32) -> (i32, i32) {
    %c0_i32 = arith.constant 0 : i32
    %c0_i32_0 = arith.constant 0 : i32
    %c0_i32_1 = arith.constant 0 : i32
    return %c0_i32, %c0_i32_0 : i32, i32
  }
  func.func @transform_15(%arg0: i32) -> (i32, i32) {
    %c0_i32 = arith.constant 0 : i32
    %c0_i32_0 = arith.constant 0 : i32
    %c0_i32_1 = arith.constant 0 : i32
    return %c0_i32, %c0_i32_0 : i32, i32
  }
  func.func @transform_16(%arg0: i32) -> (i32, i32) {
    %c0_i32 = arith.constant 0 : i32
    %c0_i32_0 = arith.constant 0 : i32
    %c0_i32_1 = arith.constant 0 : i32
    return %c0_i32, %c0_i32_0 : i32, i32
  }
  func.func @transform_17(%arg0: i32) -> (i32, i32, i32) {
    %c0_i32 = arith.constant 0 : i32
    %c0_i32_0 = arith.constant 0 : i32
    %c0_i32_1 = arith.constant 0 : i32
    return %arg0, %c0_i32, %c0_i32_0 : i32, i32, i32
  }
  func.func @transform_18(%arg0: i32) -> (i32, i32, i32) {
    %c0_i32 = arith.constant 0 : i32
    %c0_i32_0 = arith.constant 0 : i32
    %c0_i32_1 = arith.constant 0 : i32
    return %arg0, %c0_i32, %c0_i32_0 : i32, i32, i32
  }
  func.func @transform_19(%arg0: i32) -> (i32, i32, i32) {
    %c0_i32 = arith.constant 0 : i32
    %c0_i32_0 = arith.constant 0 : i32
    %c0_i32_1 = arith.constant 0 : i32
    return %arg0, %c0_i32, %c0_i32_0 : i32, i32, i32
  }
}

</mosaic_0001>

<bundles_post_ra>
// kernel: fpn_forward.1
= control target key start
LH: loop header
LB: loop body
LE: loop exit
PB: predicated region body
PF: predicated region fallthrough
CT: control target
= control target key end

     0   :  { %s10444_s0 = inlined_call_operand.vmem [shape: f32[2,256,64], index: 0, kind: input, shape index: {}]   ;;  %s10445_s1 = inlined_call_operand.hbm [shape: f32[2,64,160], index: 1, kind: input, shape index: {}]   ;;  %s10446_s2 = inlined_call_operand.vmem [shape: f32[2,16,512], index: 2, kind: input, shape index: {}]   ;;  %s10447_s3 = inlined_call_operand.vmem [shape: f32[64,32], index: 3, kind: input, shape index: {}]   ;;  %s10448_s4 = inlined_call_operand.vmem [shape: f32[1,32], index: 4, kind: input, shape index: {}]   ;;  %s10449_s5 = inlined_call_operand.vmem [shape: f32[160,32], index: 5, kind: input, shape index: {}]   ;;  %s10450_s6 = inlined_call_operand.vmem [shape: f32[1,32], index: 6, kind: input, shape index: {}]   ;;  %s10451_s7 = inlined_call_operand.vmem [shape: f32[512,32], index: 7, kind: input, shape index: {}]   ;;  %s10452_s8 = inlined_call_operand.vmem [shape: f32[1,32], index: 8, kind: input, shape index: {}]   ;;  %s10453_s9 = inlined_call_operand.vmem [shape: f32[9,32,32], index: 9, kind: input, shape index: {}]   ;;  %s10454_s10 = inlined_call_operand.vmem [shape: f32[1,32], index: 10, kind: input, shape index: {}]   ;;  %s10455_s11 = inlined_call_operand.vmem [shape: f32[9,32,32], index: 11, kind: input, shape index: {}]   ;;  %s10456_s12 = inlined_call_operand.vmem [shape: f32[1,32], index: 12, kind: input, shape index: {}]   ;;  %s10457_s13 = inlined_call_operand.hbm [shape: f32[9,32,32], index: 13, kind: input, shape index: {}]   ;;  %s10458_s14 = inlined_call_operand.vmem [shape: f32[1,32], index: 14, kind: input, shape index: {}]   ;;  %s10459_s15 = inlined_call_operand.vmem [shape: f32[64,16], index: 15, kind: input, shape index: {}]   ;;  %s10460_s16 = inlined_call_operand.hbm [shape: f32[256,64], index: 16, kind: input, shape index: {}]   ;;  %s10461_s17 = inlined_call_operand.hbm [shape: f32[2,256,32], index: 17, kind: output, shape index: {0}]   ;;  %s10462_s18 = inlined_call_operand.hbm [shape: f32[2,64,32], index: 18, kind: output, shape index: {1}]   ;;  %s10463_s19 = inlined_call_operand.hbm [shape: f32[2,16,32], index: 19, kind: output, shape index: {2}]  }
   0x1   :  { %10674 = sst [smem:[#allocation174_spill]] %s10444_s0 }
   0x2   :  { %10675 = sst [smem:[#allocation175_spill]] %s10445_s1 }
   0x3   :  { %10676 = sst [smem:[#allocation176_spill]] %s10446_s2 }
   0x4   :  { %10677 = sst [smem:[#allocation177_spill]] %s10447_s3 }
   0x5   :  { %10678 = sst [smem:[#allocation178_spill]] %s10457_s13 }
   0x6   :  { %10679 = sst [smem:[#allocation179_spill]] %s10458_s14 }
   0x7   :  { %10680 = sst [smem:[#allocation180_spill]] %s10460_s16 }
   0x8   :  { %10681 = sst [smem:[#allocation181_spill]] %s10462_s18 }
   0x9   :  { %10682 = sst [smem:[#allocation182_spill]] %s10463_s19 }
   0xa   :  { %25 = vsyncpa [#allocation3], 0 }
   0xb   :  { %27 = vsyncpa [#allocation3 + $0x1], 0 }
   0xc   :  { %28 = vsyncpa [#allocation6], 0 }
   0xd   :  { %29 = vsyncpa [#allocation4], 0 }
   0xe   :  { %31 = vsyncpa [#allocation4 + $0x1], 0 }
   0xf   :  { %32 = vsyncpa [#allocation10], 0 }
  0x10   :  { %34 = vsyncpa [#allocation10 + $0x1], 0  ;;  %s6931_s0 = smov 0   ;;  %s6933_s30 = smov 0  }
  0x11   :  { %s6935_s20 = smov 0   ;;  %s6937_s21 = smov 0  }
  0x12 LB: > { %10683 = sst [smem:[#allocation16_spill]] %s6807_s0  ;;  %s6952_s1 = sadd.s32 4294967295, %s6819_s21   ;;  %s6819_s21 = sphi %s6937_s21, %s11140_s21   ;;  %s6815_s20 = sphi %s6935_s20, %s11142_s20   ;;  %s6811_s30 = sphi %s6933_s30, %s11144_s30   ;;  %s6807_s0 = sphi %s6931_s0, %s11143_s0  }
  0x13   : > { %10684 = sst [smem:[#allocation17_spill]] %s6815_s20  ;;  %s10466_s22 = sadd.s32 4294967294, %s6819_s21  }
  0x14   : > { %p86_p0 = scmp.ne.s32.totalorder %s6811_s30, %s6807_s0  ;;  %p87_p1 = scmp.eq.s32.totalorder %s6952_s1, 0 }
  0x15   : > { %p430_p2 = scmp.eq.s32.totalorder %s6952_s1, 1  ;;  %p436_p3 = scmp.eq.s32.totalorder %s10466_s22, 1 }
  0x16   : > { %p6963_p4 = por %p87_p1, %p86_p0  ;;  %p6224_p5 = scmp.ge.s32.totalorder %s6819_s21, 1 }
  0x17   : > { %p6968_p6 = por %p436_p3, %p86_p0  ;;  %p495_p7 = scmp.lt.s32.totalorder %s6819_s21, 3 }
  0x18   : > { %s10688_s13 = sld [smem:[#allocation178_spill]]  ;;  %s6821_s27 = smov [#allocation5]  }
  0x19   : > { %s10686_s23 = scalar_select %p6968_p6, 1, 0 }
  0x1a   : > { %p6976_p8 = pnand %p6224_p5, %p495_p7  ;;  %s538_s28 = sshll.u32 %s6821_s27, 4  ;;  %s539_s28 = int_to_ptr.vmem [resolvable:$true] %s538_s28 }
  0x1b   : > { %10687 = sst [smem:[#allocation18_spill]] %s10686_s23  ;;  %s6822_s22 = smov 128  }
  0x1c   : > { %p6522_p9 = pneg %p6976_p8  ;;  %s10690_s16 = sld [smem:[#allocation180_spill]] }
  0x1d   : > { %s6824_s27 = smov [#allocation7]   ;;  %s6989_s0 = sadd.s32 1, %s6819_s21  }
  0x1e   : > { %s536_s3 = sshll.u32 %s10688_s13, 4  ;;  %p6523_p10 = pnand %p6522_p9, %p87_p1  ;;  %s537_s3 = int_to_ptr.hbm [resolvable:$true] %s536_s3 }
  0x1f   : > { %s6823_s13 = smov 8   ;;  %s558_s23 = sshll.u32 %s6824_s27, 4  ;;  %s559_s23 = int_to_ptr.vmem [resolvable:$true] %s558_s23 }
  0x20   : > { %6525 = dma.hbm_to_vmem [thread:$0]  (!%p6523_p10), %s537_s3, 4608, %s539_s28, [#allocation6], %s6822_s22, %s6822_s22, %s6823_s13  }
  0x21   : > { %10691 = sst [smem:[#allocation19_spill]] %s6989_s0  ;;  %s73_s19 = sadd.s32 1, %s6815_s20 }
  0x22   : > { %s556_s25 = sshll.u32 %s10690_s16, 4  ;;  %s70_s14 = ssub.s32 %s6819_s21, %s6989_s0  ;;  %s557_s25 = int_to_ptr.hbm [resolvable:$true] %s556_s25 }
  0x23   : > { %6528 = dma.hbm_to_vmem [thread:$0]  (!%p6523_p10), %s557_s25, 4096, %s559_s23, [#allocation6], %s6822_s22, %s6822_s22, %s6823_s13  }
  0x24   : > { %p80_p12 = scmp.ne.s32.totalorder %s6815_s20, %s6811_s30  ;;  %p71_p13 = scmp.eq.s32.totalorder %s70_s14, 0 }
  0x25   : > { %p81_p0 = scmp.eq.s32.totalorder %s6819_s21, 0  ;;  %p6545_p5 = scmp.lt.s32.totalorder %s6819_s21, 2 }
  0x26   : > { %p6999_p3 = por %p430_p2, %p80_p12  ;;  %s580_s28 = sand.u32 1, %s6815_s20  }
  0x27   : > { %s7005_s3 = scalar_select %p71_p13, %s6815_s20, %s73_s19  }
  0x28   : > { %p82_p7 = por %p81_p0, %p80_p12  ;;  %s6228_s24 = sshll.u32 %s580_s28, 7 }
  0x29   : > { %10693 = sst [smem:[#allocation20_spill]] %s7005_s3  ;;  %s6500_s13 = sshll.u32 %s6819_s21, 7 }
  0x2a   : > { %s10694_s25 = sld [smem:[#allocation175_spill]]  ;;  %s584_s16 = scalar_lea.vmem [#allocation2], %s6228_s24 }
  0x2b   : > { %s592_s0 = sshll.u32 %s584_s16, 4  ;;  %p7012_p2 = pnand %p6545_p5, %p82_p7  ;;  %s593_s0 = int_to_ptr.vmem [resolvable:$true] %s592_s0 }
  0x2c   : > { %s581_s19 = scalar_lea.sflag [#allocation3], %s580_s28 }
  0x2d   : > { %p6663_p10 = pneg %p7012_p2 }
  0x30   : > { %s589_s27 = scalar_lea.hbm %s10694_s25, %s6500_s13  ;;  %s6666_s16 = scalar_lea.hbm %s10694_s25, 256 }
  0x31   : > { %s590_s14 = sshll.u32 %s589_s27, 4  ;;  %s591_s14 = int_to_ptr.hbm [resolvable:$true] %s590_s14 }
  0x32   : > { %s6659_s3 = sshra.s32 %s591_s14, 4  ;;  %s6660_s3 = int_to_ptr.hbm [resolvable:$true] %s6659_s3 }
  0x33   : > { %s6661_s20 = scalar_lea.hbm %s6660_s3, 128  ;;  %p6667_p0 = scmp.lt.s32.totalorder %s6660_s3, %s10694_s25 }
  0x34   : > { %p6662_p9 = scmp.ne.s32.totalorder %s6660_s3, %s6661_s20  ;;  %p6668_p5 = scmp.lt.s32.totalorder %s6666_s16, %s6661_s20 }
  0x36   : > { %p6664_p12 = pnand %p6663_p10, %p6662_p9  ;;  %p6669_p7 = por %p6668_p5, %p6667_p0 }
  0x38   : > { %p6665_p13 = pneg %p6664_p12 }
  0x3a   : > { %p6670_p11 = pnand %p6669_p7, %p6665_p13 }
  0x3c   : > { %6673 = shalt.err (!%p6670_p11)
}
  0x3d   : > { %s6825_s28 = smov 256   ;;  %s6826_s27 = smov 16  }
  0x3e   : > { %6532 = dma.hbm_to_vmem [thread:$0]  (!%p7012_p2), %s591_s14, 2048, %s593_s0, %s581_s19, %s6825_s28, %s6825_s28, %s6826_s27  }
  0x3f   : > { %612 = sbr.rel (%p6976_p8) target bundleno = 1586 (0x632), region = 88 }
  0x44   : > { %s7029_s13 = sand.u32 1, %s6811_s30  }
  0x45   : > { %s6232_s24 = sshll.u32 %s7029_s13, 7  ;;  %s615_s3 = scalar_lea.sflag [#allocation3], %s7029_s13 }
  0x46   : > { %s7033_s20 = scalar_lea.vmem [#allocation2], %s6232_s24 }
  0x47   : > { %6790 = dma.done.wait (%p6963_p4), %s615_s3, 2048  }
  0x48   : > { %6792 = vsyncadd (%p6963_p4), %s615_s3, 4294965248 }
  0x49   : > { %6794 = dma.done.wait (%p87_p1), [#allocation6], 8704  }
  0x4a   : > { %6796 = vsyncadd (%p87_p1), [#allocation6], 4294958592  ;;  %v741_v0 = vld [vmem:[%s10451_s7 + $0x70] sm:$0xff]  ;;  %v742_v1 = vld [vmem:[%s10451_s7 + $0x78] sm:$0xff]  ;;  %p704_p1 = scmp.lt.s32.totalorder %s6952_s1, 1  ;;  %s10696_s19 = sld [smem:[#allocation176_spill]] }
  0x4b   : > { %v757_v2 = vld [vmem:[%s10451_s7 + $0xf0] sm:$0xff]  ;;  %v798_v3 = vpack.c.bf16 %v742_v1, %v741_v0  ;;  %v758_v4 = vld [vmem:[%s10451_s7 + $0xf8] sm:$0xff]  ;;  %v739_v11 = vld [vmem:[%s10451_s7 + $0x60] sm:$0xff]  ;;  %vm941_vm0 = vcmask 261120   ;;  %vm2285_vm1 = vcmask 1040384   ;;  %vm5720_vm3 = vcmask 1042432  }
  0x4c   : > { %v773_v5 = vld [vmem:[%s10451_s7 + $0x170] sm:$0xff]  ;;  %v774_v6 = vld [vmem:[%s10451_s7 + $0x178] sm:$0xff]  ;;  %v806_v7 = vpack.c.bf16 %v758_v4, %v757_v2  ;;  %v740_v13 = vld [vmem:[%s10451_s7 + $0x68] sm:$0xff]  ;;  %s7167_s26 = scalar_select %p704_p1, %s6952_s1, 1  ;;  %vm5627_vm4 = vcmask 1044480   ;;  %vm1020_vm6 = vcmask 130048  }
  0x4d   : > { %v814_v8 = vpack.c.bf16 %v774_v6, %v773_v5  ;;  %v789_v9 = vld [vmem:[%s10451_s7 + $0x1f0] sm:$0xff]  ;;  %v790_v10 = vld [vmem:[%s10451_s7 + $0x1f8] sm:$0xff]  ;;  %827 = vmatpush.bf16.msra.mxu0 %v798_v3  ;;  %v755_v14 = vld [vmem:[%s10451_s7 + $0xe0] sm:$0xff]  ;;  %v797_v16 = vpack.c.bf16 %v740_v13, %v739_v11  ;;  %vm2998_vm7 = vcmask 1046528   ;;  %vm5673_vm10 = vcmask 1045504   ;;  %s10715_s24 = sld [smem:[#allocation174_spill]] }
  0x4e   : > { %v822_v12 = vpack.c.bf16 %v790_v10, %v789_v9  ;;  %v756_v15 = vld [vmem:[%s10451_s7 + $0xe8] sm:$0xff]  ;;  %841 = vmatpush.bf16.msra.mxu1 %v806_v7  ;;  %v771_v18 = vld [vmem:[%s10451_s7 + $0x160] sm:$0xff]  ;;  %v737_v23 = vld [vmem:[%s10451_s7 + $0x50] sm:$0xff]  ;;  %s6502_s22 = sshll.u32 %s7167_s26, 6  ;;  %s6501_s2 = sshll.u32 %s7167_s26, 8  ;;  %vm1158_vm11 = vcmask 523264  }
  0x4f   : > { %855 = vmatpush.bf16.msra.mxu2 %v814_v8  ;;  %v805_v17 = vpack.c.bf16 %v756_v15, %v755_v14  ;;  %v772_v19 = vld [vmem:[%s10451_s7 + $0x168] sm:$0xff]  ;;  %v787_v20 = vld [vmem:[%s10451_s7 + $0x1e0] sm:$0xff]  ;;  %v738_v24 = vld [vmem:[%s10451_s7 + $0x58] sm:$0xff]  ;;  %s6503_s0 = sshll.u32 %s6952_s1, 8  ;;  %s6709_s18 = scalar_lea.hbm %s10461_s17, 512 }
  0x50   : > { %869 = vmatpush.bf16.msra.mxu3 %v822_v12  ;;  %v813_v21 = vpack.c.bf16 %v772_v19, %v771_v18  ;;  %v788_v22 = vld [vmem:[%s10451_s7 + $0x1e8] sm:$0xff]  ;;  %v753_v26 = vld [vmem:[%s10451_s7 + $0xd0] sm:$0xff]  ;;  %v754_v27 = vld [vmem:[%s10451_s7 + $0xd8] sm:$0xff]  ;;  %v796_v29 = vpack.c.bf16 %v738_v24, %v737_v23  ;;  %s7224_s16 = scalar_lea.vmem %s10696_s19, %s6502_s22 }
  0x51   : > { %v821_v25 = vpack.c.bf16 %v788_v22, %v787_v20  ;;  %v769_v28 = vld [vmem:[%s10451_s7 + $0x150] sm:$0xff]  ;;  %828 = vmatpush.bf16.msra.mxu0 %v797_v16  ;;  %v770_v30 = vld [vmem:[%s10451_s7 + $0x158] sm:$0xff]  ;;  %v804_v33 = vpack.c.bf16 %v754_v27, %v753_v26  ;;  %v735_v35 = vld [vmem:[%s10451_s7 + $0x40] sm:$0xff] }
  0x52   : > { %v785_v31 = vld [vmem:[%s10451_s7 + $0x1d0] sm:$0xff]  ;;  %v786_v32 = vld [vmem:[%s10451_s7 + $0x1d8] sm:$0xff]  ;;  %842 = vmatpush.bf16.msra.mxu1 %v805_v17  ;;  %v812_v34 = vpack.c.bf16 %v770_v30, %v769_v28  ;;  %v736_v36 = vld [vmem:[%s10451_s7 + $0x48] sm:$0xff] }
  0x53   : > { %856 = vmatpush.bf16.msra.mxu2 %v813_v21  ;;  %v751_v37 = vld [vmem:[%s10451_s7 + $0xc0] sm:$0xff]  ;;  %v820_v38 = vpack.c.bf16 %v786_v32, %v785_v31  ;;  %v752_v39 = vld [vmem:[%s10451_s7 + $0xc8] sm:$0xff]  ;;  %v795_v44 = vpack.c.bf16 %v736_v36, %v735_v35  ;;  %v733_v47 = vld [vmem:[%s10451_s7 + $0x30] sm:$0xff]  ;;  %s7487_s22 = scalar_lea.vmem %s10715_s24, %s6501_s2 }
  0x54   : > { %870 = vmatpush.bf16.msra.mxu3 %v821_v25  ;;  %v767_v40 = vld [vmem:[%s10451_s7 + $0x140] sm:$0xff]  ;;  %v768_v41 = vld [vmem:[%s10451_s7 + $0x148] sm:$0xff]  ;;  %v803_v45 = vpack.c.bf16 %v752_v39, %v751_v37  ;;  %v734_v48 = vld [vmem:[%s10451_s7 + $0x38] sm:$0xff] }
  0x55   : > { %v783_v42 = vld [vmem:[%s10451_s7 + $0x1c0] sm:$0xff]  ;;  %v784_v43 = vld [vmem:[%s10451_s7 + $0x1c8] sm:$0xff]  ;;  %829 = vmatpush.bf16.msra.mxu0 %v796_v29  ;;  %v811_v46 = vpack.c.bf16 %v768_v41, %v767_v40  ;;  %v749_v49 = vld [vmem:[%s10451_s7 + $0xb0] sm:$0xff]  ;;  %v794_v56 = vpack.c.bf16 %v734_v48, %v733_v47 }
  0x56   : > { %843 = vmatpush.bf16.msra.mxu1 %v804_v33  ;;  %v819_v50 = vpack.c.bf16 %v784_v43, %v783_v42  ;;  %v750_v51 = vld [vmem:[%s10451_s7 + $0xb8] sm:$0xff]  ;;  %v765_v52 = vld [vmem:[%s10451_s7 + $0x130] sm:$0xff]  ;;  %v731_v59 = vld [vmem:[%s10451_s7 + $0x20] sm:$0xff] }
  0x57   : > { %857 = vmatpush.bf16.msra.mxu2 %v812_v34  ;;  %v766_v53 = vld [vmem:[%s10451_s7 + $0x138] sm:$0xff]  ;;  %v781_v54 = vld [vmem:[%s10451_s7 + $0x1b0] sm:$0xff]  ;;  %v802_v57 = vpack.c.bf16 %v750_v51, %v749_v49  ;;  %v732_v60 = vld [vmem:[%s10451_s7 + $0x28] sm:$0xff] }
  0x58   : > { %871 = vmatpush.bf16.msra.mxu3 %v820_v38  ;;  %v782_v55 = vld [vmem:[%s10451_s7 + $0x1b8] sm:$0xff]  ;;  %v810_v58 = vpack.c.bf16 %v766_v53, %v765_v52  ;;  %v747_v61 = vld [vmem:[%s10451_s7 + $0xa0] sm:$0xff]  ;;  %v748_v63 = vld [vmem:[%s10451_s7 + $0xa8] sm:$0xff]  ;;  %v793_v4 = vpack.c.bf16 %v732_v60, %v731_v59 }
  0x59   : > { %830 = vmatpush.bf16.msra.mxu0 %v795_v44  ;;  %v818_v62 = vpack.c.bf16 %v782_v55, %v781_v54  ;;  %v763_v0 = vld [vmem:[%s10451_s7 + $0x120] sm:$0xff]  ;;  %v764_v1 = vld [vmem:[%s10451_s7 + $0x128] sm:$0xff]  ;;  %v801_v5 = vpack.c.bf16 %v748_v63, %v747_v61  ;;  %v729_v7 = vld [vmem:[%s10451_s7 + $0x10] sm:$0xff] }
  0x5a   : > { %844 = vmatpush.bf16.msra.mxu1 %v803_v45  ;;  %v779_v2 = vld [vmem:[%s10451_s7 + $0x1a0] sm:$0xff]  ;;  %v780_v3 = vld [vmem:[%s10451_s7 + $0x1a8] sm:$0xff]  ;;  %v809_v6 = vpack.c.bf16 %v764_v1, %v763_v0  ;;  %v730_v8 = vld [vmem:[%s10451_s7 + $0x18] sm:$0xff] }
  0x5b   : > { %858 = vmatpush.bf16.msra.mxu2 %v811_v46  ;;  %v745_v9 = vld [vmem:[%s10451_s7 + $0x90] sm:$0xff]  ;;  %v817_v10 = vpack.c.bf16 %v780_v3, %v779_v2  ;;  %v746_v11 = vld [vmem:[%s10451_s7 + $0x98] sm:$0xff]  ;;  %v727_v16 = vld [vmem:[%s10451_s7] sm:$0xff]  ;;  %v792_v17 = vpack.c.bf16 %v730_v8, %v729_v7 }
  0x5c   : > { %872 = vmatpush.bf16.msra.mxu3 %v819_v50  ;;  %v761_v12 = vld [vmem:[%s10451_s7 + $0x110] sm:$0xff]  ;;  %v762_v13 = vld [vmem:[%s10451_s7 + $0x118] sm:$0xff]  ;;  %v728_v18 = vld [vmem:[%s10451_s7 + $0x8] sm:$0xff]  ;;  %v800_v21 = vpack.c.bf16 %v746_v11, %v745_v9 }
  0x5d   : > { %831 = vmatpush.bf16.msra.mxu0 %v794_v56  ;;  %v777_v14 = vld [vmem:[%s10451_s7 + $0x190] sm:$0xff]  ;;  %v778_v15 = vld [vmem:[%s10451_s7 + $0x198] sm:$0xff]  ;;  %v743_v19 = vld [vmem:[%s10451_s7 + $0x80] sm:$0xff]  ;;  %v808_v22 = vpack.c.bf16 %v762_v13, %v761_v12  ;;  %v791_v35 = vpack.c.bf16 %v728_v18, %v727_v16  ;;  %v1569_v16 = vlaneseq }
  0x5e   : > { %845 = vmatpush.bf16.msra.mxu1 %v802_v57  ;;  %v744_v20 = vld [vmem:[%s10451_s7 + $0x88] sm:$0xff]  ;;  %v759_v23 = vld [vmem:[%s10451_s7 + $0x100] sm:$0xff]  ;;  %v816_v26 = vpack.c.bf16 %v778_v15, %v777_v14  ;;  %v717_v32 = vld [vmem:[%s7224_s16 + $0x10] sm:$0xff] }
  0x5f   : > { %859 = vmatpush.bf16.msra.mxu2 %v810_v58  ;;  %v760_v24 = vld [vmem:[%s10451_s7 + $0x108] sm:$0xff]  ;;  %v775_v25 = vld [vmem:[%s10451_s7 + $0x180] sm:$0xff]  ;;  %v921_v33 = vld [vmem:[%s10449_s5 + $0x70] sm:$0xff]  ;;  %v799_v37 = vpack.c.bf16 %v744_v20, %v743_v19 }
  0x60   : > { %873 = vmatpush.bf16.msra.mxu3 %v818_v62  ;;  %v776_v27 = vld [vmem:[%s10451_s7 + $0x188] sm:$0xff]  ;;  %v715_v28 = vld [vmem:[%s7224_s16] sm:$0xff]  ;;  %v922_v34 = vld [vmem:[%s10449_s5 + $0x78] sm:$0xff]  ;;  %v807_v38 = vpack.c.bf16 %v760_v24, %v759_v23  ;;  %v7327_v24 = vshrl.u32 %v1569_v16, 7 }
  0x61   : > { %832 = vmatpush.bf16.msra.mxu0 %v793_v4  ;;  %v719_v29 = vld [vmem:[%s7224_s16 + $0x20] sm:$0xff]  ;;  %v716_v30 = vld [vmem:[%s7224_s16 + $0x8] sm:$0xff]  ;;  %v721_v36 = vld [vmem:[%s7224_s16 + $0x30] sm:$0xff]  ;;  %v815_v39 = vpack.c.bf16 %v776_v27, %v775_v25  ;;  %v934_v42 = vpack.c.bf16 %v922_v34, %v921_v33 }
  0x62   : > { %846 = vmatpush.bf16.msra.mxu1 %v801_v5  ;;  %v720_v31 = vld [vmem:[%s7224_s16 + $0x28] sm:$0xff]  ;;  %v718_v40 = vld [vmem:[%s7224_s16 + $0x18] sm:$0xff]  ;;  %v723_v43 = vpack.c.bf16 %v719_v29, %v715_v28  ;;  %v919_v44 = vld [vmem:[%s10449_s5 + $0x60] sm:$0xff]  ;;  %v725_v47 = vpack.c.bf16 %v721_v36, %v717_v32  ;;  %v5517_v29 = vand.u32 3, %v7327_v24 }
  0x63   : > { %860 = vmatpush.bf16.msra.mxu2 %v809_v6  ;;  %v722_v41 = vld [vmem:[%s7224_s16 + $0x38] sm:$0xff]  ;;  %v920_v45 = vld [vmem:[%s10449_s5 + $0x68] sm:$0xff]  ;;  %v724_v46 = vpack.c.bf16 %v720_v31, %v716_v30  ;;  %v917_v50 = vld [vmem:[%s10449_s5 + $0x50] sm:$0xff]  ;;  %v7332_v30 = vadd.s32 8, %v7327_v24 }
  0x64   : > { %874 = vmatpush.bf16.msra.mxu3 %v817_v10  ;;  %v726_v48 = vpack.c.bf16 %v722_v41, %v718_v40  ;;  %v933_v49 = vpack.c.bf16 %v920_v45, %v919_v44  ;;  %v918_v51 = vld [vmem:[%s10449_s5 + $0x58] sm:$0xff]  ;;  %v915_v53 = vld [vmem:[%s10449_s5 + $0x40] sm:$0xff]  ;;  %v916_v54 = vld [vmem:[%s10449_s5 + $0x48] sm:$0xff]  ;;  %v7342_v41 = vadd.s32 1, %v5517_v29 }
  0x65   : > { %833 = vmatpush.bf16.msra.mxu0 %v792_v17  ;;  %v932_v52 = vpack.c.bf16 %v918_v51, %v917_v50  ;;  %v931_v55 = vpack.c.bf16 %v916_v54, %v915_v53  ;;  %v913_v56 = vld [vmem:[%s10449_s5 + $0x30] sm:$0xff]  ;;  %v914_v57 = vld [vmem:[%s10449_s5 + $0x38] sm:$0xff]  ;;  %v911_v59 = vld [vmem:[%s10449_s5 + $0x20] sm:$0xff]  ;;  %v5524_v40 = vand.u32 3, %v7332_v30 }
  0x66   : > { %847 = vmatpush.bf16.msra.mxu1 %v800_v21  ;;  %v930_v58 = vpack.c.bf16 %v914_v57, %v913_v56  ;;  %v912_v60 = vld [vmem:[%s10449_s5 + $0x28] sm:$0xff]  ;;  %v909_v62 = vld [vmem:[%s10449_s5 + $0x10] sm:$0xff]  ;;  %v910_v63 = vld [vmem:[%s10449_s5 + $0x18] sm:$0xff]  ;;  %vm5712_vm5 = vcmp.lt.s32.totalorder %v7342_v41, 4 }
  0x67   : > { %861 = vmatpush.bf16.msra.mxu2 %v808_v22  ;;  %v929_v61 = vpack.c.bf16 %v912_v60, %v911_v59  ;;  %v928_v0 = vpack.c.bf16 %v910_v63, %v909_v62  ;;  %v925_v1 = vld [vmem:[%s10449_s5 + $0x90] sm:$0xff]  ;;  %v926_v2 = vld [vmem:[%s10449_s5 + $0x98] sm:$0xff]  ;;  %v907_v4 = vld [vmem:[%s10449_s5] sm:$0xff] }
  0x68   : > { %875 = vmatpush.bf16.msra.mxu3 %v816_v26  ;;  %v936_v3 = vpack.c.bf16 %v926_v2, %v925_v1  ;;  %v908_v5 = vld [vmem:[%s10449_s5 + $0x8] sm:$0xff]  ;;  %v923_v7 = vld [vmem:[%s10449_s5 + $0x80] sm:$0xff]  ;;  %v885_v11 = vld [vmem:[%s7033_s20 + $0x10] sm:$0xff] }
  0x69   : > { %834 = vmatpush.bf16.msra.mxu0 %v791_v35  ;;  %v927_v6 = vpack.c.bf16 %v908_v5, %v907_v4  ;;  %v924_v8 = vld [vmem:[%s10449_s5 + $0x88] sm:$0xff]  ;;  %v883_v10 = vld [vmem:[%s7033_s20] sm:$0xff]  ;;  %v886_v14 = vld [vmem:[%s7033_s20 + $0x18] sm:$0xff]  ;;  %v7334_v35 = vadd.s32 4294967295, %v5517_v29 }
  0x6a   : > { %848 = vmatpush.bf16.msra.mxu1 %v799_v37  ;;  %v935_v9 = vpack.c.bf16 %v924_v8, %v923_v7  ;;  %v899_v12 = vpack.c.bf16 %v885_v11, %v883_v10  ;;  %v884_v13 = vld [vmem:[%s7033_s20 + $0x8] sm:$0xff]  ;;  %v6591_v17 = vld [vmem:[%s10452_s8] ss:$0 sm:$0xff]  ;;  %v889_v19 = vld [vmem:[%s7033_s20 + $0x30] sm:$0xff] }
  0x6b   : > { %862 = vmatpush.bf16.msra.mxu2 %v807_v38  ;;  %v900_v15 = vpack.c.bf16 %v886_v14, %v884_v13  ;;  %v887_v18 = vld [vmem:[%s7033_s20 + $0x20] sm:$0xff]  ;;  %v888_v20 = vld [vmem:[%s7033_s20 + $0x28] sm:$0xff]  ;;  %v890_v23 = vld [vmem:[%s7033_s20 + $0x38] sm:$0xff]  ;;  %v10475_v38 = vmov 0.0   ;;  %vm5615_vm2 = vcmp.ge.s32.totalorder %v7334_v35, 0 }
  0x6c   : > { %876 = vmatpush.bf16.msra.mxu3 %v815_v39  ;;  %835 = vmatmul.bf16.vlgmr.msra.gmra.mxu0 %v723_v43  ;;  %v901_v22 = vpack.c.bf16 %v889_v19, %v887_v18  ;;  %v902_v26 = vpack.c.bf16 %v890_v23, %v888_v20  ;;  %v7339_v39 = vrot.slane %v10475_v38, 7  ;;  %v5721_v44 = vrot.slane %v10475_v38, 5  ;;  %v893_v53 = vld [vmem:[%s7033_s20 + $0x50] sm:$0xff]  ;;  %v892_v54 = vld [vmem:[%s7033_s20 + $0x48] sm:$0xff]  ;;  %v894_v59 = vld [vmem:[%s7033_s20 + $0x58] sm:$0xff] }
  0x6d   : > { %954 = vmatpush.bf16.msrb.mxu0 %v934_v42  ;;  %849 = vmatmul.bf16.vlgmr.msra.gmra.mxu1 %v724_v46  ;;  %v5628_v46 = vrot.slane %v10475_v38, 3  ;;  %v7364_v62 = vrot.slane %v10475_v38, 1  ;;  %v1012_v4 = vld [vmem:[%s10459_s15] sm:$0xff]  ;;  %v898_v41 = vld [vmem:[%s7033_s20 + $0x78] sm:$0xff] }
  0x6e   : > { %863 = vmatmul.bf16.vlgmr.msra.gmra.mxu2 %v725_v47  ;;  %989 = vmatpush.bf16.msrb.mxu1 %v936_v3  ;;  %10697 = vst [vmem:[#allocation21_spill] sm:$0xff] %v7339_v39 }
  0x6f   : > { %877 = vmatmul.bf16.vlgmr.msra.gmra.mxu3 %v726_v48  ;;  %v7349_v48 = vadd.s32 1, %v5524_v40  ;;  %10699 = vst [vmem:[#allocation23_spill] sm:$0xff] %v7364_v62 }
  0x71   : > { %955 = vmatpush.bf16.msrb.mxu0 %v933_v49  ;;  %vm5713_vm8 = vcmp.lt.s32.totalorder %v7349_v48, 4  ;;  %v1015_v48 = vld [vmem:[%s10459_s15 + $0x18] sm:$0xff] }
  0x72   : > { %990 = vmatpush.bf16.msrb.mxu1 %v935_v9 }
  0x75   : > { %956 = vmatpush.bf16.msrb.mxu0 %v932_v52  ;;  %v891_v52 = vld [vmem:[%s7033_s20 + $0x40] sm:$0xff] }
  0x79   : > { %957 = vmatpush.bf16.msrb.mxu0 %v931_v55  ;;  %v5614_v55 = vadd.s32 4294967295, %v5524_v40  ;;  %v1013_v40 = vld [vmem:[%s10459_s15 + $0x8] sm:$0xff] }
  0x7b   : > { %vm5616_vm9 = vcmp.ge.s32.totalorder %v5614_v55, 0 }
  0x7d   : > { %958 = vmatpush.bf16.msrb.mxu0 %v930_v58  ;;  %6242 = vmatmul.msk.bf16.vlgmr.msrb.gmra.mxu1 %vm941_vm0, %v900_v15  ;;  %v903_v58 = vpack.c.bf16 %v893_v53, %v891_v52 }
  0x81   : > { %959 = vmatpush.bf16.msrb.mxu0 %v929_v61  ;;  %v904_v61 = vpack.c.bf16 %v894_v59, %v892_v54 }
  0x85   : > { %960 = vmatpush.bf16.msrb.mxu0 %v928_v0 }
  0x89   : > { %961 = vmatpush.bf16.msrb.mxu0 %v927_v6 }
  0x8c   : > { %962 = vmatmul.bf16.vlgmr.msrb.gmra.mxu0 %v899_v12 }
  0x8d   : > { %6243 = vmatmul.msk.bf16.gmra.mxu1 %vm941_vm0, %v902_v26 }
  0x9c   : > { %967 = vmatmul.bf16.gmra.mxu0 %v901_v22 }
  0x9d   : > { %6244 = vmatmul.msk.bf16.gmra.mxu1 %vm941_vm0, %v904_v61 }
  0xac   : > { %972 = vmatmul.bf16.gmra.mxu0 %v903_v58 }
  0xe9   : > { %v836_v21 = vpop.f32.mrf.mxu0 }
  0xea   : > { %v837_v25 = vadd.f32 %v6591_v17, %v836_v21  ;;  %v850_v27 = vpop.f32.mrf.mxu1 }
  0xec   : > { %v851_v28 = vadd.f32 %v850_v27, %v837_v25 }
  0xf1   : > { %v864_v31 = vpop.f32.mrf.mxu2  ;;  %v838_v34 = vpop.f32.mrf.mxu0 }
  0xf2   : > { %v865_v32 = vadd.f32 %v864_v31, %v851_v28  ;;  %v878_v33 = vpop.f32.mrf.mxu3  ;;  %v839_v37 = vadd.f32 %v6591_v17, %v838_v34  ;;  %v852_v43 = vpop.f32.mrf.mxu1 }
  0xf4   : > { %v7336_v36 = vadd.f32 %v878_v33, %v865_v32  ;;  %v853_v47 = vadd.f32 %v852_v43, %v839_v37 }
  0xf6   : > { %v5762_v42 = vrot.slane %v7336_v36, 7  ;;  %v5722_v45 = vrot.slane %v7336_v36, 5  ;;  %v5629_v49 = vrot.slane %v7336_v36, 3  ;;  %v5669_v2 = vpack.c.bf16 %v7336_v36, %v10475_v38 }
  0xf7   : > { %v5834_v3 = vrot.slane %v7336_v36, 1 }
  0xf8   : > { %v5763_v50 = vsel %vm2285_vm1, %v7339_v39, %v5762_v42  ;;  %v5723_v63 = vsel %vm5720_vm3, %v5721_v44, %v5722_v45  ;;  %v5630_v1 = vsel %vm5627_vm4, %v5628_v46, %v5629_v49  ;;  %v5674_v28 = vrot.slane %v5669_v2, 2  ;;  %v1094_v2 = vld [vmem:[%s7487_s22] sm:$0xff] }
  0xf9   : > { %v866_v51 = vpop.f32.mrf.mxu2  ;;  %v7359_v56 = vsel %vm5615_vm2, %v5763_v50, 0.0  ;;  %v7378_v6 = vsel %vm5712_vm5, %v5723_v63, 0.0  ;;  %v7385_v9 = vsel %vm5615_vm2, %v5630_v1, 0.0  ;;  %v1014_v50 = vld [vmem:[%s10459_s15 + $0x10] sm:$0xff] }
  0xfa   : > { %10698 = vst [vmem:[#allocation22_spill] sm:$0xff] %v7359_v56  ;;  %v867_v57 = vadd.f32 %v866_v51, %v853_v47  ;;  %v880_v60 = vpop.f32.mrf.mxu3 }
  0xfb   : > { %10700 = vst [vmem:[#allocation24_spill] sm:$0xff] %v7378_v6  ;;  %v1113_v6 = vld [vmem:[%s7487_s22 + $0x98] sm:$0xff] }
  0xfc   : > { %v881_v0 = vadd.f32 %v880_v60, %v867_v57  ;;  %10702 = vst [vmem:[#allocation26_spill] sm:$0xff] %v7385_v9  ;;  %v1016_v60 = vld [vmem:[%s10459_s15 + $0x20] sm:$0xff] }
  0xfe   : > { %1059 = vmatpush.msrb.mxu2 %v881_v0  ;;  %v5724_v5 = vrot.slane %v881_v0, 5  ;;  %v5631_v7 = vrot.slane %v881_v0, 3  ;;  %v7381_v8 = vpack.c.bf16 %v881_v0, %v7336_v36  ;;  %v5764_v10 = vrot.slane %v881_v0, 7 }
  0xff   : > { %v5670_v11 = vpack.c.bf16 %v881_v0, %v881_v0  ;;  %v5835_v12 = vrot.slane %v881_v0, 1 }
 0x100   : > { %10701 = vst [vmem:[#allocation25_spill] sm:$0xff] %v7381_v8  ;;  %1060 = vmatpush.msrb.mxu2 %v7336_v36  ;;  %v5725_v13 = vsel %vm5720_vm3, %v5722_v45, %v5724_v5  ;;  %v5632_v14 = vsel %vm5627_vm4, %v5629_v49, %v5631_v7  ;;  %v5874_v15 = vsel %vm5627_vm4, %v5631_v7, %v5628_v46  ;;  %v897_v45 = vld [vmem:[%s7033_s20 + $0x70] sm:$0xff]  ;;  %v896_v46 = vld [vmem:[%s7033_s20 + $0x68] sm:$0xff] }
 0x101   : > { %v5946_v16 = vsel %vm5720_vm3, %v5724_v5, %v5721_v44  ;;  %6246 = vmatmul.msk.f32.vlgmr.msrb.gmra.mxu2 %vm1020_vm6, %v1012_v4  ;;  %v7395_v17 = vsel %vm5713_vm8, %v5725_v13, 0.0  ;;  %v7399_v18 = vsel %vm5615_vm2, %v5632_v14, 0.0  ;;  %v7402_v19 = vsel %vm5616_vm9, %v5874_v15, 0.0  ;;  %v895_v44 = vld [vmem:[%s7033_s20 + $0x60] sm:$0xff]  ;;  %s10713_s20 = sld [smem:[#allocation177_spill]]  ;;  %v1017_v4 = vld [vmem:[%s10459_s15 + $0x28] sm:$0xff] }
 0x102   : > { %10703 = vst [vmem:[#allocation27_spill] sm:$0xff] %v7395_v17  ;;  %v7405_v20 = vsel %vm5616_vm9, %v5632_v14, 0.0  ;;  %v7415_v25 = vsel %vm5712_vm5, %v5725_v13, 0.0  ;;  %v7419_v26 = vsel %vm5713_vm8, %v5946_v16, 0.0  ;;  %v5765_v27 = vsel %vm2285_vm1, %v5762_v42, %v5764_v10  ;;  %v1018_v7 = vld [vmem:[%s10459_s15 + $0x30] sm:$0xff]  ;;  %v1098_v14 = vld [vmem:[%s7487_s22 + $0x20] sm:$0xff] }
 0x103   : > { %10704 = vst [vmem:[#allocation28_spill] sm:$0xff] %v7399_v18  ;;  %v5675_v29 = vrot.slane %v5670_v11, 2  ;;  %v7425_v32 = vsel %vm5616_vm9, %v5765_v27, 0.0  ;;  %v5836_v33 = vsel %vm2998_vm7, %v5834_v3, %v5835_v12  ;;  %v5837_v34 = vsel %vm2998_vm7, %v5835_v12, %v7364_v62  ;;  %v1095_v3 = vld [vmem:[%s7487_s22 + $0x8] sm:$0xff]  ;;  %v1096_v10 = vld [vmem:[%s7487_s22 + $0x10] sm:$0xff]  ;;  %v1097_v11 = vld [vmem:[%s7487_s22 + $0x18] sm:$0xff] }
 0x104   : > { %10705 = vst [vmem:[#allocation29_spill] sm:$0xff] %v7402_v19  ;;  %v7437_v37 = vsel %vm5712_vm5, %v5836_v33, 0.0  ;;  %v7444_v42 = vsel %vm5713_vm8, %v5837_v34, 0.0  ;;  %v905_v47 = vpack.c.bf16 %v897_v45, %v895_v44  ;;  %v906_v49 = vpack.c.bf16 %v898_v41, %v896_v46  ;;  %v1019_v12 = vld [vmem:[%s10459_s15 + $0x38] sm:$0xff]  ;;  %v1099_v15 = vld [vmem:[%s7487_s22 + $0x28] sm:$0xff]  ;;  %v1100_v27 = vld [vmem:[%s7487_s22 + $0x30] sm:$0xff]  ;;  %v992_v34 = vpop.f32.mrf.mxu1 }
 0x105   : > { %10706 = vst [vmem:[#allocation30_spill] sm:$0xff] %v7405_v20  ;;  %v7433_v36 = vsel %vm5673_vm10, %v5674_v28, %v5675_v29  ;;  %v1126_v5 = vpack.c.bf16 %v1095_v3, %v1094_v2  ;;  %v1127_v13 = vpack.c.bf16 %v1097_v11, %v1096_v10  ;;  %v1128_v16 = vpack.c.bf16 %v1099_v15, %v1098_v14  ;;  %v1101_v28 = vld [vmem:[%s7487_s22 + $0x38] sm:$0xff]  ;;  %v1103_v44 = vld [vmem:[%s7487_s22 + $0x48] sm:$0xff] }
 0x106   : > { %10707 = vst [vmem:[#allocation31_spill] sm:$0xff] %v7415_v25  ;;  %977 = vmatmul.bf16.gmra.mxu0 %v905_v47  ;;  %6245 = vmatmul.msk.bf16.gmra.mxu1 %vm941_vm0, %v906_v49  ;;  %v1129_v29 = vpack.c.bf16 %v1101_v28, %v1100_v27  ;;  %v7526_v47 = vld [vmem:[%s10450_s6] ss:$0 sm:$0xff] }
 0x107   : > { %10708 = vst [vmem:[#allocation32_spill] sm:$0xff] %v7419_v26  ;;  %s10714_s28 = smov %s10713_s20  ;;  %v1148_v51 = vld [vmem:[%s10713_s20 + $0x30] sm:$0xff]  ;;  %s5985_s20 = scalar_lea.sflag [#allocation4], %s7029_s13 }
 0x108   : > { %10709 = vst [vmem:[#allocation33_spill] sm:$0xff] %v7425_v32  ;;  %v1149_v52 = vld [vmem:[%s10714_s28 + $0x38] sm:$0xff]  ;;  %v1146_v53 = vld [vmem:[%s10714_s28 + $0x20] sm:$0xff]  ;;  %v1147_v55 = vld [vmem:[%s10714_s28 + $0x28] sm:$0xff] }
 0x109   : > { %10710 = vst [vmem:[#allocation34_spill] sm:$0xff] %v7433_v36  ;;  %6247 = vmatmul.msk.f32.gmra.mxu2 %vm1020_vm6, %v1013_v40  ;;  %v1153_v54 = vpack.c.bf16 %v1149_v52, %v1148_v51  ;;  %v1152_v57 = vpack.c.bf16 %v1147_v55, %v1146_v53  ;;  %v1144_v58 = vld [vmem:[%s10714_s28 + $0x10] sm:$0xff]  ;;  %v1145_v59 = vld [vmem:[%s10714_s28 + $0x18] sm:$0xff]  ;;  %v1142_v63 = vld [vmem:[%s10714_s28] sm:$0xff]  ;;  %v963_v33 = vpop.f32.mrf.mxu0 }
 0x10a   : > { %10711 = vst [vmem:[#allocation35_spill] sm:$0xff] %v7437_v37  ;;  %v1151_v61 = vpack.c.bf16 %v1145_v59, %v1144_v58  ;;  %v1143_v0 = vld [vmem:[%s10714_s28 + $0x8] sm:$0xff]  ;;  %v1102_v40 = vld [vmem:[%s7487_s22 + $0x40] sm:$0xff]  ;;  %v964_v49 = vadd.f32 %v7526_v47, %v963_v33  ;;  %v1104_v51 = vld [vmem:[%s7487_s22 + $0x50] sm:$0xff]  ;;  %v4560_v59 = vand.u32 7, %v7327_v24 }
 0x10b   : > { %10712 = vst [vmem:[#allocation36_spill] sm:$0xff] %v7444_v42  ;;  %1211 = vmatpush.bf16.msrb.mxu3 %v1153_v54  ;;  %v1150_v1 = vpack.c.bf16 %v1143_v0, %v1142_v63  ;;  %v1130_v45 = vpack.c.bf16 %v1103_v44, %v1102_v40  ;;  %v1105_v52 = vld [vmem:[%s7487_s22 + $0x58] sm:$0xff]  ;;  %v4567_v63 = vand.u32 7, %v7332_v30  ;;  %v1106_v40 = vld [vmem:[%s7487_s22 + $0x60] sm:$0xff]  ;;  %v1107_v44 = vld [vmem:[%s7487_s22 + $0x68] sm:$0xff] }
 0x10c   : > { %v994_v41 = vpop.f32.mrf.mxu1  ;;  %v1131_v53 = vpack.c.bf16 %v1105_v52, %v1104_v51  ;;  %v7549_v11 = vadd.s32 4294967295, %v4560_v59  ;;  %v1108_v37 = vld [vmem:[%s7487_s22 + $0x70] sm:$0xff]  ;;  %v1109_v42 = vld [vmem:[%s7487_s22 + $0x78] sm:$0xff] }
 0x10e   : > { %10718 = vst [vmem:[#allocation39_spill] sm:$0xff] %v7549_v11  ;;  %vm4736_vm14 = vcmp.ge.s32.totalorder %v7549_v11, 0 }
 0x10f   : > { %1212 = vmatpush.bf16.msrb.mxu3 %v1152_v57 }
 0x111   : > { %6248 = vmatmul.msk.f32.gmra.mxu2 %vm1020_vm6, %v1014_v50  ;;  %v965_v46 = vpop.f32.mrf.mxu0 }
 0x112   : > { %v966_v58 = vadd.f32 %v7526_v47, %v965_v46 }
 0x113   : > { %1213 = vmatpush.bf16.msrb.mxu3 %v1151_v61  ;;  %v7537_v61 = vadd.s32 16, %v7327_v24 }
 0x114   : > { %v997_v55 = vpop.f32.mrf.mxu1  ;;  %v995_v0 = vadd.f32 %v994_v41, %v966_v58  ;;  %v1132_v41 = vpack.c.bf16 %v1107_v44, %v1106_v40 }
 0x117   : > { %1214 = vmatpush.bf16.msrb.mxu3 %v1150_v1  ;;  %v7541_v1 = vadd.s32 24, %v7327_v24 }
 0x119   : > { %6249 = vmatmul.msk.f32.gmra.mxu2 %vm1020_vm6, %v1015_v48  ;;  %v968_v50 = vpop.f32.mrf.mxu0  ;;  %v993_v48 = vadd.f32 %v992_v34, %v964_v49  ;;  %v4581_v27 = vand.u32 7, %v7541_v1 }
 0x11a   : > { %6254 = vmatmul.msk.bf16.vlgmr.msrb.gmra.mxu3 %vm1158_vm11, %v1126_v5  ;;  %v7544_v5 = vadd.s32 1, %v4567_v63 }
 0x11b   : > { %v7575_v49 = vadd.s32 4294967295, %v4581_v27 }
 0x11c   : > { %vm4959_vm13 = vcmp.lt.s32.totalorder %v7544_v5, 8 }
 0x11d   : > { %vm4739_vm2 = vcmp.ge.s32.totalorder %v7575_v49, 0 }
 0x121   : > { %6250 = vmatmul.msk.f32.gmra.mxu2 %vm1020_vm6, %v1016_v60  ;;  %v970_v60 = vpop.f32.mrf.mxu0 }
 0x122   : > { %v971_v51 = vadd.f32 %v7526_v47, %v970_v60 }
 0x129   : > { %6251 = vmatmul.msk.f32.gmra.mxu2 %vm1020_vm6, %v1017_v4  ;;  %v4942_v4 = vadd.s32 1, %v4560_v59 }
 0x12a   : > { %6255 = vmatmul.msk.bf16.gmra.mxu3 %vm1158_vm11, %v1127_v13  ;;  %v4574_v13 = vand.u32 7, %v7537_v61 }
 0x12b   : > { %vm4958_vm12 = vcmp.lt.s32.totalorder %v4942_v4, 8 }
 0x131   : > { %6252 = vmatmul.msk.f32.gmra.mxu2 %vm1020_vm6, %v1018_v7  ;;  %v969_v7 = vadd.f32 %v7526_v47, %v968_v50 }
 0x139   : > { %6253 = vmatmul.msk.f32.gmra.mxu2 %vm1020_vm6, %v1019_v12  ;;  %v999_v12 = vpop.f32.mrf.mxu1 }
 0x13a   : > { %6256 = vmatmul.msk.bf16.gmra.mxu3 %vm1158_vm11, %v1128_v16 }
 0x14a   : > { %6257 = vmatmul.msk.bf16.gmra.mxu3 %vm1158_vm11, %v1129_v29  ;;  %v998_v29 = vadd.f32 %v997_v55, %v969_v7  ;;  %v1002_v7 = vpop.f32.mrf.mxu1 }
 0x15a   : > { %6258 = vmatmul.msk.bf16.gmra.mxu3 %vm1158_vm11, %v1130_v45  ;;  %v7568_v45 = vadd.s32 4294967295, %v4574_v13 }
 0x15c   : > { %vm4738_vm15 = vcmp.ge.s32.totalorder %v7568_v45, 0 }
 0x16a   : > { %6259 = vmatmul.msk.bf16.gmra.mxu3 %vm1158_vm11, %v1131_v53  ;;  %v973_v53 = vpop.f32.mrf.mxu0 }
 0x16b   : > { %v974_v43 = vadd.f32 %v7526_v47, %v973_v53 }
 0x16d   : > { %v1003_v38 = vadd.f32 %v1002_v7, %v974_v43 }
 0x17a   : > { %6260 = vmatmul.msk.bf16.gmra.mxu3 %vm1158_vm11, %v1132_v41 }
 0x184   : > { %v1062_v54 = vpop.f32.mrf.mxu2 }
 0x185   : > { %v7531_v57 = vadd.f32 %v1062_v54, %v993_v48  ;;  %v7585_v54 = vadd.s32 4294967295, %v4567_v63 }
 0x187   : > { %10716 = vst [vmem:[#allocation37_spill] sm:$0xff] %v7531_v57  ;;  %v4991_v2 = vrot.slane %v7531_v57, 1  ;;  %v10476_v14 = vrot.slane %v7531_v57, 7  ;;  %vm4737_vm3 = vcmp.ge.s32.totalorder %v7585_v54, 0 }
 0x188   : > { %10723 = vst [vmem:[#allocation44_spill] sm:$0xff] %v7585_v54 }
 0x189   : > { %v4992_v28 = vsel %vm2998_vm7, %v7364_v62, %v4991_v2 }
 0x18a   : > { %v7578_v50 = vsel %vm4958_vm12, %v4992_v28, 0.0  ;;  %v7606_v28 = vadd.s32 32, %v7327_v24 }
 0x18b   : > { %10721 = vst [vmem:[#allocation42_spill] sm:$0xff] %v7578_v50 }
 0x18c   : > { %v1065_v3 = vpop.f32.mrf.mxu2  ;;  %v4588_v31 = vand.u32 7, %v7606_v28 }
 0x18d   : > { %v7547_v10 = vadd.f32 %v1065_v3, %v995_v0  ;;  %v7595_v0 = vadd.s32 1, %v4574_v13  ;;  %v1000_v3 = vadd.f32 %v999_v12, %v971_v51 }
 0x18e   : > { %v7657_v4 = vadd.s32 4294967295, %v4588_v31 }
 0x18f   : > { %10717 = vst [vmem:[#allocation38_spill] sm:$0xff] %v7547_v10  ;;  %v4785_v15 = vrot.slane %v7547_v10, 7  ;;  %v4993_v16 = vrot.slane %v7547_v10, 1  ;;  %vm4960_vm4 = vcmp.lt.s32.totalorder %v7595_v0, 8  ;;  %v1110_v0 = vld [vmem:[%s7487_s22 + $0x80] sm:$0xff] }
 0x190   : > { %vm4740_vm6 = vcmp.ge.s32.totalorder %v7657_v4, 0 }
 0x191   : > { %v7562_v33 = vsel %vm2285_vm1, %v10476_v14, %v4785_v15  ;;  %v4994_v34 = vsel %vm2998_vm7, %v4991_v2, %v4993_v16  ;;  %v1004_v14 = vpop.f32.mrf.mxu1 }
 0x192   : > { %10719 = vst [vmem:[#allocation40_spill] sm:$0xff] %v7562_v33  ;;  %v7573_v46 = vsel %vm4736_vm14, %v7562_v33, 0.0  ;;  %v7582_v48 = vsel %vm4959_vm13, %v4994_v34, 0.0  ;;  %v7590_v58 = vsel %vm4958_vm12, %v4994_v34, 0.0  ;;  %v7618_v40 = vsel %vm4738_vm15, %v7562_v33, 0.0 }
 0x193   : > { %10720 = vst [vmem:[#allocation41_spill] sm:$0xff] %v7573_v46 }
 0x194   : > { %10722 = vst [vmem:[#allocation43_spill] sm:$0xff] %v7582_v48  ;;  %v1068_v52 = vpop.f32.mrf.mxu2 }
 0x195   : > { %10724 = vst [vmem:[#allocation45_spill] sm:$0xff] %v7590_v58  ;;  %v7592_v59 = vadd.f32 %v1068_v52, %v998_v29  ;;  %v7611_v29 = vadd.s32 40, %v7327_v24  ;;  %v7638_v52 = vadd.s32 1, %v4581_v27  ;;  %v975_v27 = vpop.f32.mrf.mxu0 }
 0x196   : > { %10727 = vst [vmem:[#allocation48_spill] sm:$0xff] %v7618_v40 }
 0x197   : > { %10725 = vst [vmem:[#allocation46_spill] sm:$0xff] %v7592_v59  ;;  %v4787_v60 = vrot.slane %v7592_v59, 7  ;;  %v7601_v63 = vpack.c.bf16 %v7592_v59, %v7547_v10  ;;  %v4995_v2 = vrot.slane %v7592_v59, 1  ;;  %v4595_v21 = vand.u32 7, %v7611_v29 }
 0x198   : > { %vm4961_vm5 = vcmp.lt.s32.totalorder %v7638_v52, 8 }
 0x199   : > { %10726 = vst [vmem:[#allocation47_spill] sm:$0xff] %v7601_v63  ;;  %v4996_v13 = vsel %vm2998_vm7, %v4993_v16, %v4995_v2  ;;  %v4788_v34 = vsel %vm2285_vm1, %v4785_v15, %v4787_v60  ;;  %v7660_v15 = vadd.s32 4294967295, %v4595_v21  ;;  %v7718_v46 = vadd.s32 1, %v4595_v21  ;;  %v1007_v25 = vpop.f32.mrf.mxu1 }
 0x19a   : > { %v7622_v12 = vsel %vm4739_vm2, %v4788_v34, 0.0  ;;  %v7626_v44 = vsel %vm4737_vm3, %v4788_v34, 0.0  ;;  %v7630_v16 = vsel %vm4959_vm13, %v4996_v13, 0.0  ;;  %v7644_v23 = vsel %vm4960_vm4, %v4996_v13, 0.0 }
 0x19b   : > { %10728 = vst [vmem:[#allocation49_spill] sm:$0xff] %v7622_v12  ;;  %v7647_v22 = vsel %vm4958_vm12, %v4996_v13, 0.0  ;;  %v7669_v36 = vsel %vm4738_vm15, %v4788_v34, 0.0  ;;  %vm4741_vm8 = vcmp.ge.s32.totalorder %v7660_v15, 0  ;;  %vm4963_vm12 = vcmp.lt.s32.totalorder %v7718_v46, 8  ;;  %v1298_v46 = vld [vmem:[#allocation7 + $0x10] sm:$0xff] }
 0x19c   : > { %10729 = vst [vmem:[#allocation50_spill] sm:$0xff] %v7626_v44  ;;  %v1071_v35 = vpop.f32.mrf.mxu2 }
 0x19d   : > { %10730 = vst [vmem:[#allocation51_spill] sm:$0xff] %v7630_v16  ;;  %v7649_v41 = vadd.f32 %v1071_v35, %v1000_v3  ;;  %v7663_v3 = vadd.s32 1, %v4588_v31  ;;  %v1133_v31 = vpack.c.bf16 %v1109_v42, %v1108_v37  ;;  %v976_v37 = vadd.f32 %v7526_v47, %v975_v27  ;;  %v978_v45 = vpop.f32.mrf.mxu0 }
 0x19e   : > { %10731 = vst [vmem:[#allocation52_spill] sm:$0xff] %v7644_v23 }
 0x19f   : > { %10732 = vst [vmem:[#allocation53_spill] sm:$0xff] %v7647_v22  ;;  %v4789_v51 = vrot.slane %v7649_v41, 7  ;;  %v4997_v53 = vrot.slane %v7649_v41, 1  ;;  %6261 = vmatmul.msk.bf16.gmra.mxu3 %vm1158_vm11, %v1133_v31  ;;  %vm4962_vm9 = vcmp.lt.s32.totalorder %v7663_v3, 8  ;;  %v1005_v27 = vadd.f32 %v1004_v14, %v976_v37 }
 0x1a0   : > { %10733 = vst [vmem:[#allocation54_spill] sm:$0xff] %v7649_v41  ;;  %v979_v37 = vadd.f32 %v7526_v47, %v978_v45 }
 0x1a1   : > { %v4790_v13 = vsel %vm2285_vm1, %v4787_v60, %v4789_v51  ;;  %v4998_v35 = vsel %vm2998_vm7, %v4995_v2, %v4997_v53  ;;  %10734 = vst [vmem:[#allocation55_spill] sm:$0xff] %v7669_v36 }
 0x1a2   : > { %v7673_v43 = vsel %vm4739_vm2, %v4790_v13, 0.0  ;;  %v7677_v60 = vsel %vm4961_vm5, %v4998_v35, 0.0  ;;  %v7681_v2 = vsel %vm4959_vm13, %v4998_v35, 0.0  ;;  %v7691_v32 = vsel %vm4960_vm4, %v4998_v35, 0.0 }
 0x1a3   : > { %10735 = vst [vmem:[#allocation56_spill] sm:$0xff] %v7673_v43  ;;  %v7695_v5 = vsel %vm4738_vm15, %v4790_v13, 0.0  ;;  %v7722_v44 = vsel %vm4740_vm6, %v4790_v13, 0.0  ;;  %v1008_v18 = vadd.f32 %v1007_v25, %v979_v37  ;;  %v1319_v43 = vld [vmem:[#allocation7 + $0xb8] sm:$0xff] }
 0x1a4   : > { %10736 = vst [vmem:[#allocation57_spill] sm:$0xff] %v7677_v60  ;;  %v1074_v56 = vpop.f32.mrf.mxu2 }
 0x1a5   : > { %10737 = vst [vmem:[#allocation58_spill] sm:$0xff] %v7681_v2  ;;  %v7698_v42 = vadd.f32 %v1074_v56, %v1003_v38  ;;  %v7711_v38 = vadd.s32 48, %v7327_v24  ;;  %v7714_v56 = vadd.s32 56, %v7327_v24 }
 0x1a6   : > { %10738 = vst [vmem:[#allocation59_spill] sm:$0xff] %v7691_v32 }
 0x1a7   : > { %10739 = vst [vmem:[#allocation60_spill] sm:$0xff] %v7695_v5  ;;  %v4791_v55 = vrot.slane %v7698_v42, 7  ;;  %v4999_v34 = vrot.slane %v7698_v42, 1  ;;  %v7707_v35 = vpack.c.bf16 %v7698_v42, %v7649_v41  ;;  %v4602_v8 = vand.u32 7, %v7711_v38  ;;  %v980_v5 = vpop.f32.mrf.mxu0 }
 0x1a8   : > { %10740 = vst [vmem:[#allocation61_spill] sm:$0xff] %v7698_v42  ;;  %v4609_v9 = vand.u32 7, %v7714_v56  ;;  %v981_v23 = vadd.f32 %v7526_v47, %v980_v5 }
 0x1a9   : > { %10741 = vst [vmem:[#allocation62_spill] sm:$0xff] %v7707_v35  ;;  %v4792_v31 = vsel %vm2285_vm1, %v4789_v51, %v4791_v55  ;;  %v5000_v7 = vsel %vm2998_vm7, %v4997_v53, %v4999_v34  ;;  %v7762_v19 = vadd.s32 4294967295, %v4602_v8  ;;  %v7768_v21 = vadd.s32 1, %v4602_v8  ;;  %v1009_v8 = vpop.f32.mrf.mxu1 }
 0x1aa   : > { %10742 = vst [vmem:[#allocation63_spill] sm:$0xff] %v7722_v44  ;;  %v7726_v22 = vsel %vm4741_vm8, %v4792_v31, 0.0  ;;  %v7730_v2 = vsel %vm4961_vm5, %v5000_v7, 0.0  ;;  %v7734_v14 = vsel %vm4962_vm9, %v5000_v7, 0.0  ;;  %v7742_v53 = vsel %vm4960_vm4, %v5000_v7, 0.0  ;;  %v1111_v7 = vld [vmem:[%s7487_s22 + $0x88] sm:$0xff] }
 0x1ab   : > { %10743 = vst [vmem:[#allocation64_spill] sm:$0xff] %v7726_v22  ;;  %v7746_v13 = vsel %vm4739_vm2, %v4792_v31, 0.0  ;;  %v7764_v32 = vadd.s32 4294967295, %v4609_v9  ;;  %vm4742_vm13 = vcmp.ge.s32.totalorder %v7762_v19, 0  ;;  %vm4964_vm2 = vcmp.lt.s32.totalorder %v7768_v21, 8  ;;  %v1296_v19 = vld [vmem:[#allocation7] sm:$0xff] }
 0x1ac   : > { %10744 = vst [vmem:[#allocation65_spill] sm:$0xff] %v7730_v2  ;;  %v1077_v26 = vpop.f32.mrf.mxu2  ;;  %v1134_v2 = vpack.c.bf16 %v1111_v7, %v1110_v0  ;;  %v4949_v5 = vadd.s32 1, %v4609_v9 }
 0x1ad   : > { %10745 = vst [vmem:[#allocation66_spill] sm:$0xff] %v7734_v14  ;;  %v7753_v51 = vadd.f32 %v1077_v26, %v1005_v27  ;;  %vm4743_vm15 = vcmp.ge.s32.totalorder %v7764_v32, 0 }
 0x1ae   : > { %10746 = vst [vmem:[#allocation67_spill] sm:$0xff] %v7742_v53  ;;  %vm4965_vm4 = vcmp.lt.s32.totalorder %v4949_v5, 8 }
 0x1af   : > { %10747 = vst [vmem:[#allocation68_spill] sm:$0xff] %v7746_v13  ;;  %v4793_v20 = vrot.slane %v7753_v51, 7  ;;  %v5001_v49 = vrot.slane %v7753_v51, 1  ;;  %v7772_v13 = vsel %vm4740_vm6, %v4792_v31, 0.0  ;;  %6262 = vmatmul.msk.bf16.gmra.mxu3 %vm1158_vm11, %v1134_v2 }
 0x1b0   : > { %10748 = vst [vmem:[#allocation69_spill] sm:$0xff] %v7753_v51 }
 0x1b1   : > { %v4794_v26 = vsel %vm2285_vm1, %v4791_v55, %v4793_v20  ;;  %v5002_v27 = vsel %vm2998_vm7, %v4999_v34, %v5001_v49  ;;  %10749 = vst [vmem:[#allocation70_spill] sm:$0xff] %v7772_v13  ;;  %v7804_v34 = vpop.f32.mrf.mxu3 }
 0x1b2   : > { %v7776_v45 = vsel %vm4741_vm8, %v4794_v26, 0.0  ;;  %v7780_v25 = vsel %vm4963_vm12, %v5002_v27, 0.0  ;;  %v7784_v55 = vsel %vm4962_vm9, %v5002_v27, 0.0  ;;  %v7792_v31 = vsel %vm4961_vm5, %v5002_v27, 0.0 }
 0x1b3   : > { %10750 = vst [vmem:[#allocation71_spill] sm:$0xff] %v7776_v45  ;;  %v7796_v37 = vsel %vm4740_vm6, %v4794_v26, 0.0 }
 0x1b4   : > { %10751 = vst [vmem:[#allocation72_spill] sm:$0xff] %v7780_v25  ;;  %v1080_v0 = vpop.f32.mrf.mxu2 }
 0x1b5   : > { %10752 = vst [vmem:[#allocation73_spill] sm:$0xff] %v7784_v55  ;;  %v7801_v60 = vadd.f32 %v1080_v0, %v1008_v18  ;;  %v1010_v18 = vadd.f32 %v1009_v8, %v981_v23  ;;  %v7819_v0 = vsel %vm4742_vm13, %v4794_v26, 0.0  ;;  %v1112_v23 = vld [vmem:[%s7487_s22 + $0x90] sm:$0xff] }
 0x1b6   : > { %10753 = vst [vmem:[#allocation74_spill] sm:$0xff] %v7792_v31  ;;  %v1135_v15 = vpack.c.bf16 %v1113_v6, %v1112_v23 }
 0x1b7   : > { %10754 = vst [vmem:[#allocation75_spill] sm:$0xff] %v7796_v37  ;;  %v4795_v52 = vrot.slane %v7801_v60, 7  ;;  %v5003_v4 = vrot.slane %v7801_v60, 1  ;;  %v7812_v27 = vpack.c.bf16 %v7801_v60, %v7753_v51 }
 0x1b8   : > { %10755 = vst [vmem:[#allocation76_spill] sm:$0xff] %v7801_v60 }
 0x1b9   : > { %10756 = vst [vmem:[#allocation77_spill] sm:$0xff] %v7812_v27  ;;  %v4796_v47 = vsel %vm2285_vm1, %v4793_v20, %v4795_v52  ;;  %v5004_v2 = vsel %vm2998_vm7, %v5001_v49, %v5003_v4  ;;  %v7849_v25 = vpop.f32.mrf.mxu3  ;;  %v1307_v27 = vld [vmem:[#allocation7 + $0x58] sm:$0xff] }
 0x1ba   : > { %10757 = vst [vmem:[#allocation78_spill] sm:$0xff] %v7819_v0  ;;  %v7823_v7 = vsel %vm4743_vm15, %v4796_v47, 0.0  ;;  %v7827_v53 = vsel %vm4963_vm12, %v5004_v2, 0.0  ;;  %v7831_v20 = vsel %vm4964_vm2, %v5004_v2, 0.0  ;;  %v7839_v49 = vsel %vm4962_vm9, %v5004_v2, 0.0 }
 0x1bb   : > { %10758 = vst [vmem:[#allocation79_spill] sm:$0xff] %v7823_v7  ;;  %v7843_v26 = vsel %vm4741_vm8, %v4796_v47, 0.0  ;;  %v7858_v2 = vsel %vm4742_vm13, %v4796_v47, 0.0 }
 0x1bc   : > { %10759 = vst [vmem:[#allocation80_spill] sm:$0xff] %v7827_v53  ;;  %v1083_v8 = vpop.f32.mrf.mxu2  ;;  %v1124_v53 = vld [vmem:[%s7487_s22 + $0xf0] sm:$0xff] }
 0x1bd   : > { %10760 = vst [vmem:[#allocation81_spill] sm:$0xff] %v7831_v20  ;;  %v7847_v14 = vadd.f32 %v1083_v8, %v1010_v18  ;;  %v7864_v8 = vsel %vm4965_vm4, %v7364_v62, 0.0  ;;  %v1606_v20 = vand.u32 15, %v7327_v24 }
 0x1be   : > { %10761 = vst [vmem:[#allocation82_spill] sm:$0xff] %v7839_v49 }
 0x1bf   : > { %10762 = vst [vmem:[#allocation83_spill] sm:$0xff] %v7843_v26  ;;  %v5005_v9 = vrot.slane %v7847_v14, 1  ;;  %1432 = vmatpush.msra.mxu1 %v7847_v14  ;;  %v5088_v3 = vrot.slane %v7847_v14, 7  ;;  %6263 = vmatmul.msk.bf16.gmra.mxu3 %vm1158_vm11, %v1135_v15  ;;  %v1115_v15 = vld [vmem:[%s7487_s22 + $0xa8] sm:$0xff] }
 0x1c0   : > { %10763 = vst [vmem:[#allocation84_spill] sm:$0xff] %v7847_v14 }
 0x1c1   : > { %10764 = vst [vmem:[#allocation85_spill] sm:$0xff] %v7858_v2  ;;  %1433 = vmatpush.msra.mxu1 %v7801_v60  ;;  %v5089_v31 = vsel %vm2285_vm1, %v4795_v52, %v5088_v3  ;;  %v5006_v37 = vsel %vm2998_vm7, %v5003_v4, %v5005_v9  ;;  %v5229_v6 = vsel %vm2998_vm7, %v5005_v9, %v7364_v62  ;;  %v1117_v9 = vld [vmem:[%s7487_s22 + $0xb8] sm:$0xff] }
 0x1c2   : > { %10765 = vst [vmem:[#allocation86_spill] sm:$0xff] %v7864_v8  ;;  %v5304_v47 = vsel %vm2285_vm1, %v5088_v3, %v7339_v39  ;;  %v7875_v23 = vsel %vm4743_vm15, %v5089_v31, 0.0  ;;  %v7878_v18 = vsel %vm4965_vm4, %v5006_v37, 0.0  ;;  %v7882_v26 = vsel %vm4964_vm2, %v5006_v37, 0.0  ;;  %v1301_v8 = vld [vmem:[#allocation7 + $0x28] sm:$0xff] }
 0x1c3   : > { %10766 = vst [vmem:[#allocation87_spill] sm:$0xff] %v7875_v23  ;;  %v7885_v52 = vsel %vm4965_vm4, %v5229_v6, 0.0  ;;  %1434 = vmatpush.msra.mxu1 %v7753_v51  ;;  %v7896_v60 = vsel %vm4963_vm12, %v5006_v37, 0.0  ;;  %v7902_v51 = vsel %vm4964_vm2, %v5229_v6, 0.0  ;;  %v7906_v4 = vsel %vm4742_vm13, %v5089_v31, 0.0  ;;  %v7918_v37 = vpop.f32.mrf.mxu3  ;;  %v1114_v31 = vld [vmem:[%s7487_s22 + $0xa0] sm:$0xff] }
 0x1c4   : > { %10767 = vst [vmem:[#allocation88_spill] sm:$0xff] %v7878_v18  ;;  %v7910_v3 = vsel %vm4743_vm15, %v5304_v47, 0.0  ;;  %v1136_v6 = vpack.c.bf16 %v1115_v15, %v1114_v31  ;;  %v1297_v47 = vld [vmem:[#allocation7 + $0x8] sm:$0xff]  ;;  %v1300_v15 = vld [vmem:[#allocation7 + $0x20] sm:$0xff]  ;;  %v1634_v23 = vand.u32 15, %v7606_v28 }
 0x1c5   : > { %10768 = vst [vmem:[#allocation89_spill] sm:$0xff] %v7882_v26  ;;  %1435 = vmatpush.msra.mxu1 %v7698_v42 }
 0x1c6   : > { %10769 = vst [vmem:[#allocation90_spill] sm:$0xff] %v7885_v52 }
 0x1c7   : > { %10770 = vst [vmem:[#allocation91_spill] sm:$0xff] %v7896_v60  ;;  %1436 = vmatpush.msra.mxu1 %v7649_v41  ;;  %v1303_v60 = vld [vmem:[#allocation7 + $0x38] sm:$0xff] }
 0x1c8   : > { %10771 = vst [vmem:[#allocation92_spill] sm:$0xff] %v7902_v51 }
 0x1c9   : > { %10772 = vst [vmem:[#allocation93_spill] sm:$0xff] %v7906_v4  ;;  %1437 = vmatpush.msra.mxu1 %v7592_v59  ;;  %v1305_v59 = vld [vmem:[#allocation7 + $0x48] sm:$0xff] }
 0x1ca   : > { %10773 = vst [vmem:[#allocation94_spill] sm:$0xff] %v7910_v3  ;;  %v1299_v3 = vld [vmem:[#allocation7 + $0x18] sm:$0xff] }
 0x1cb   : > { %1438 = vmatpush.msra.mxu1 %v7547_v10  ;;  %v7925_v32 = vpop.f32.mrf.mxu3 }
 0x1cd   : > { %1439 = vmatpush.msra.mxu1 %v7531_v57 }
 0x1ce   : > { %6270 = vmatmul.msk.f32.vlgmr.msra.gmra.mxu1 %vm1158_vm11, %v1296_v19  ;;  %v1116_v19 = vld [vmem:[%s7487_s22 + $0xb0] sm:$0xff] }
 0x1cf   : > { %6264 = vmatmul.msk.bf16.gmra.mxu3 %vm1158_vm11, %v1136_v6  ;;  %v1137_v4 = vpack.c.bf16 %v1117_v9, %v1116_v19  ;;  %v1118_v6 = vld [vmem:[%s7487_s22 + $0xc0] sm:$0xff]  ;;  %v1302_v9 = vld [vmem:[#allocation7 + $0x30] sm:$0xff]  ;;  %v1121_v19 = vld [vmem:[%s7487_s22 + $0xd8] sm:$0xff] }
 0x1d3   : > { %v7931_v21 = vpop.f32.mrf.mxu3 }
 0x1d6   : > { %6271 = vmatmul.msk.f32.gmra.mxu1 %vm1158_vm11, %v1297_v47  ;;  %v1119_v47 = vld [vmem:[%s7487_s22 + $0xc8] sm:$0xff] }
 0x1d7   : > { %v1138_v51 = vpack.c.bf16 %v1119_v47, %v1118_v6  ;;  %v1123_v47 = vld [vmem:[%s7487_s22 + $0xe8] sm:$0xff] }
 0x1db   : > { %v7934_v5 = vpop.f32.mrf.mxu3 }
 0x1de   : > { %6272 = vmatmul.msk.f32.gmra.mxu1 %vm1158_vm11, %v1298_v46 }
 0x1df   : > { %6265 = vmatmul.msk.bf16.gmra.mxu3 %vm1158_vm11, %v1137_v4 }
 0x1e3   : > { %v7940_v31 = vpop.f32.mrf.mxu3 }
 0x1e6   : > { %6273 = vmatmul.msk.f32.gmra.mxu1 %vm1158_vm11, %v1299_v3  ;;  %v1120_v3 = vld [vmem:[%s7487_s22 + $0xd0] sm:$0xff] }
 0x1e7   : > { %v1139_v49 = vpack.c.bf16 %v1121_v19, %v1120_v3 }
 0x1eb   : > { %v7945_v46 = vpop.f32.mrf.mxu3 }
 0x1ee   : > { %6274 = vmatmul.msk.f32.gmra.mxu1 %vm1158_vm11, %v1300_v15 }
 0x1ef   : > { %6266 = vmatmul.msk.bf16.gmra.mxu3 %vm1158_vm11, %v1138_v51  ;;  %v1304_v51 = vld [vmem:[#allocation7 + $0x40] sm:$0xff] }
 0x1f3   : > { %v7949_v4 = vpop.f32.mrf.mxu3 }
 0x1f6   : > { %6275 = vmatmul.msk.f32.gmra.mxu1 %vm1158_vm11, %v1301_v8  ;;  %v1122_v8 = vld [vmem:[%s7487_s22 + $0xe0] sm:$0xff] }
 0x1fb   : > { %v7954_v15 = vpop.f32.mrf.mxu3 }
 0x1fe   : > { %6276 = vmatmul.msk.f32.gmra.mxu1 %vm1158_vm11, %v1302_v9  ;;  %v1140_v9 = vpack.c.bf16 %v1123_v47, %v1122_v8  ;;  %v1986_v8 = vld [vmem:[%s10453_s9] sm:$0xff]  ;;  %v1306_v47 = vld [vmem:[#allocation7 + $0x50] sm:$0xff] }
 0x1ff   : > { %6267 = vmatmul.msk.bf16.gmra.mxu3 %vm1158_vm11, %v1139_v49  ;;  %v1988_v49 = vld [vmem:[%s10453_s9 + $0x10] sm:$0xff] }
 0x200   : > { %v2024_v3 = vpack.c.bf16 %v1988_v49, %v1988_v49  ;;  %v1992_v49 = vld [vmem:[%s10453_s9 + $0x30] sm:$0xff] }
 0x201   : > { %v2028_v26 = vpack.c.bf16 %v1992_v49, %v1992_v49  ;;  %v7996_v49 = vadd.s32 4294967295, %v1606_v20 }
 0x202   : > { %v2433_v41 = vunpack.c.l.b16 %v2024_v3  ;;  %v2022_v3 = vpack.c.bf16 %v1986_v8, %v1986_v8 }
 0x203   : > { %v7958_v6 = vpop.f32.mrf.mxu3  ;;  %v2630_v8 = vunpack.c.l.b16 %v2028_v26  ;;  %vm2094_vm5 = vcmp.ge.s32.totalorder %v7996_v49, 0 }
 0x204   : > { %v2431_v18 = vunpack.c.l.b16 %v2022_v3  ;;  %v1991_v3 = vld [vmem:[%s10453_s9 + $0x28] sm:$0xff]  ;;  %v2379_v14 = vsel %vm2094_vm5, %v7339_v39, 0.0 }
 0x206   : > { %6277 = vmatmul.msk.f32.gmra.mxu1 %vm1158_vm11, %v1303_v60  ;;  %v1989_v60 = vld [vmem:[%s10453_s9 + $0x18] sm:$0xff] }
 0x207   : > { %v2025_v19 = vpack.c.bf16 %v1989_v60, %v1989_v60  ;;  %v1993_v60 = vld [vmem:[%s10453_s9 + $0x38] sm:$0xff] }
 0x208   : > { %v2029_v52 = vpack.c.bf16 %v1993_v60, %v1993_v60 }
 0x209   : > { %v2434_v10 = vunpack.c.l.b16 %v2025_v19 }
 0x20b   : > { %v7963_v42 = vpop.f32.mrf.mxu3 }
 0x20e   : > { %6278 = vmatmul.msk.f32.gmra.mxu1 %vm1158_vm11, %v1304_v51 }
 0x20f   : > { %6268 = vmatmul.msk.bf16.gmra.mxu3 %vm1158_vm11, %v1140_v9  ;;  %v2436_v9 = vpack.c.b16 %v2434_v10, %v2433_v41  ;;  %v1996_v10 = vld [vmem:[%s10453_s9 + $0x50] sm:$0xff]  ;;  %v1997_v41 = vld [vmem:[%s10453_s9 + $0x58] sm:$0xff] }
 0x210   : > { %v2032_v60 = vpack.c.bf16 %v1996_v10, %v1996_v10  ;;  %v2033_v17 = vpack.c.bf16 %v1997_v41, %v1997_v41 }
 0x211   : > { %2493 = vmatpush.bf16.msra.mxu2 %v2436_v9  ;;  %v1125_v9 = vld [vmem:[%s7487_s22 + $0xf8] sm:$0xff]  ;;  %s6235_s22 = sshll.u32 %s7029_s13, 8 }
 0x212   : > { %v3149_v50 = vunpack.c.l.b16 %v2032_v60  ;;  %v3150_v20 = vunpack.c.l.b16 %v2033_v17  ;;  %v1141_v10 = vpack.c.bf16 %v1125_v9, %v1124_v53  ;;  %v1308_v53 = vld [vmem:[#allocation7 + $0x60] sm:$0xff]  ;;  %s9910_s19 = scalar_lea.vmem [#allocation8], %s6235_s22  ;;  %s6006_s22 = scalar_lea.hbm %s10461_s17, %s6503_s0 }
 0x213   : > { %v7973_v51 = vpop.f32.mrf.mxu3  ;;  %s6007_s2 = sshll.u32 %s9910_s19, 4  ;;  %s6009_s23 = sshll.u32 %s6006_s22, 4  ;;  %s6008_s2 = int_to_ptr.vmem [resolvable:$true] %s6007_s2  ;;  %s6010_s23 = int_to_ptr.hbm [resolvable:$true] %s6009_s23 }
 0x214   : > { %s6703_s27 = sshra.s32 %s6010_s23, 4  ;;  %s6704_s27 = int_to_ptr.hbm [resolvable:$true] %s6703_s27 }
 0x215   : > { %s6705_s25 = scalar_lea.hbm %s6704_s27, 256  ;;  %p6710_p2 = scmp.lt.s32.totalorder %s6704_s27, %s10461_s17 }
 0x216   : > { %6279 = vmatmul.msk.f32.gmra.mxu1 %vm1158_vm11, %v1305_v59  ;;  %v1987_v59 = vld [vmem:[%s10453_s9 + $0x8] sm:$0xff]  ;;  %p6706_p4 = scmp.ne.s32.totalorder %s6704_s27, %s6705_s25  ;;  %p6711_p9 = scmp.lt.s32.totalorder %s6709_s18, %s6705_s25 }
 0x217   : > { %v2023_v19 = vpack.c.bf16 %v1987_v59, %v1987_v59  ;;  %v2631_v59 = vunpack.c.l.b16 %v2029_v52  ;;  %v2027_v52 = vpack.c.bf16 %v1991_v3, %v1991_v3  ;;  %v1309_v3 = vld [vmem:[#allocation7 + $0x68] sm:$0xff] }
 0x218   : > { %p6707_p8 = pnand %p6706_p4, %p6999_p3  ;;  %p6712_p10 = por %p6711_p9, %p6710_p2 }
 0x219   : > { %v2432_v55 = vunpack.c.l.b16 %v2023_v19  ;;  %v2633_v16 = vpack.c.b16 %v2631_v59, %v2630_v8  ;;  %v2629_v48 = vunpack.c.l.b16 %v2027_v52 }
 0x21a   : > { %p6708_p11 = pneg %p6707_p8 }
 0x21b   : > { %v2435_v19 = vpack.c.b16 %v2432_v55, %v2431_v18  ;;  %v8005_v58 = vpop.f32.mrf.mxu3  ;;  %2690 = vmatpush.bf16.msra.mxu0 %v2633_v16  ;;  %v3152_v55 = vpack.c.b16 %v3150_v20, %v3149_v50  ;;  %v2411_v18 = vpack.c.bf16 %v7339_v39, %v2379_v14  ;;  %v10531_v16 = vmov 0.0|0.0   ;;  %v1994_v50 = vld [vmem:[%s10453_s9 + $0x40] sm:$0xff]  ;;  %v1311_v20 = vld [vmem:[#allocation7 + $0x78] sm:$0xff] }
 0x21c   : > { %v2030_v14 = vpack.c.bf16 %v1994_v50, %v1994_v50  ;;  %p6713_p12 = pnand %p6712_p10, %p6708_p11 }
 0x21d   : > { %2494 = vmatpush.bf16.msra.mxu2 %v2435_v19  ;;  %3209 = vmatpush.bf16.msra.mxu3 %v3152_v55 }
 0x21e   : > { %6280 = vmatmul.msk.f32.gmra.mxu1 %vm1158_vm11, %v1306_v47  ;;  %v1990_v47 = vld [vmem:[%s10453_s9 + $0x20] sm:$0xff] }
 0x21f   : > { %v2026_v26 = vpack.c.bf16 %v1990_v47, %v1990_v47  ;;  %6269 = vmatmul.msk.bf16.gmra.mxu3 %vm1158_vm11, %v1141_v10  ;;  %v8036_v10 = vld [vmem:[%s10448_s4] ss:$0 sm:$0xff] }
 0x220   : > { %6302 = vmatmul.msk.bf16.vlgmr.msra.gmra.mxu2 %vm941_vm0, %v2411_v18  ;;  %v1217_v55 = vadd.f32 %v8036_v10, %v7804_v34  ;;  %v1224_v28 = vadd.f32 %v8036_v10, %v7925_v32 }
 0x221   : > { %v2628_v41 = vunpack.c.l.b16 %v2026_v26  ;;  %v1310_v26 = vld [vmem:[#allocation7 + $0x70] sm:$0xff] }
 0x223   : > { %v2632_v8 = vpack.c.b16 %v2629_v48, %v2628_v41  ;;  %v8015_v17 = vpop.f32.mrf.mxu3  ;;  %v1995_v48 = vld [vmem:[%s10453_s9 + $0x48] sm:$0xff]  ;;  %v1613_v41 = vand.u32 15, %v7332_v30 }
 0x224   : > { %v2031_v59 = vpack.c.bf16 %v1995_v48, %v1995_v48 }
 0x225   : > { %2691 = vmatpush.bf16.msra.mxu0 %v2632_v8  ;;  %v8042_v18 = vadd.s32 1, %v1613_v41  ;;  %v1313_v41 = vld [vmem:[#allocation7 + $0x88] sm:$0xff] }
 0x226   : > { %6281 = vmatmul.msk.f32.gmra.mxu1 %vm1158_vm11, %v1307_v27  ;;  %v3147_v27 = vunpack.c.l.b16 %v2030_v14  ;;  %v3148_v60 = vunpack.c.l.b16 %v2031_v59  ;;  %v1620_v14 = vand.u32 15, %v7537_v61 }
 0x227   : > { %vm2870_vm6 = vcmp.lt.s32.totalorder %v8042_v18, 16 }
 0x228   : > { %2692 = vmatmul.bf16.vlgmr.msra.gmra.mxu0 %v10531_v16  ;;  %v3151_v47 = vpack.c.b16 %v3148_v60, %v3147_v27  ;;  %v1627_v16 = vand.u32 15, %v7541_v1  ;;  %v2001_v1 = vld [vmem:[%s10453_s9 + $0x78] sm:$0xff] }
 0x22a   : > { %3210 = vmatpush.bf16.msra.mxu3 %v3151_v47  ;;  %v8055_v47 = vadd.s32 4294967295, %v1620_v14 }
 0x22b   : > { %v8025_v9 = vpop.f32.mrf.mxu3 }
 0x22c   : > { %vm2096_vm8 = vcmp.ge.s32.totalorder %v8055_v47, 0  ;;  %v1232_v47 = vadd.f32 %v8036_v10, %v7940_v31 }
 0x22e   : > { %6282 = vmatmul.msk.f32.gmra.mxu1 %vm1158_vm11, %v1308_v53  ;;  %v1312_v53 = vld [vmem:[#allocation7 + $0x80] sm:$0xff] }
 0x233   : > { %v8028_v19 = vpop.f32.mrf.mxu3 }
 0x236   : > { %6283 = vmatmul.msk.f32.gmra.mxu1 %vm1158_vm11, %v1309_v3  ;;  %v1219_v3 = vadd.f32 %v8036_v10, %v7849_v25  ;;  %v1222_v25 = vadd.f32 %v8036_v10, %v7918_v37 }
 0x23b   : > { %v8031_v52 = vpop.f32.mrf.mxu3 }
 0x23e   : > { %6284 = vmatmul.msk.f32.gmra.mxu1 %vm1158_vm11, %v1310_v26 }
 0x243   : > { %v8044_v50 = vpop.f32.mrf.mxu3 }
 0x246   : > { %6285 = vmatmul.msk.f32.gmra.mxu1 %vm1158_vm11, %v1311_v20 }
 0x24b   : > { %v1441_v8 = vpop.f32.mrf.mxu1 }
 0x24c   : > { %v1537_v48 = vadd.f32 %v1441_v8, %v1217_v55  ;;  %v8066_v8 = vpop.f32.mrf.mxu3 }
 0x24e   : > { %v2288_v59 = vrot.slane %v1537_v48, 7  ;;  %v3001_v27 = vrot.slane %v1537_v48, 1  ;;  %6286 = vmatmul.msk.f32.gmra.mxu1 %vm1158_vm11, %v1312_v53 }
 0x250   : > { %v3002_v30 = vsel %vm2998_vm7, %v7364_v62, %v3001_v27  ;;  %v2289_v34 = vsel %vm2285_vm1, %v7339_v39, %v2288_v59 }
 0x251   : > { %v3096_v60 = vsel %vm2870_vm6, %v3002_v30, 0.0  ;;  %v8059_v61 = vsel %vm2094_vm5, %v2289_v34, 0.0 }
 0x252   : > { %v3127_v26 = vpack.c.bf16 %v3096_v60, %v7364_v62 }
 0x253   : > { %v1444_v20 = vpop.f32.mrf.mxu1 }
 0x254   : > { %v1538_v55 = vadd.f32 %v1444_v20, %v1219_v3  ;;  %6333 = vmatmul.msk.bf16.vlgmr.msra.gmra.mxu3 %vm941_vm0, %v3127_v26  ;;  %v2381_v3 = vsel %vm2096_vm8, %v2289_v34, 0.0  ;;  %v2037_v34 = vpack.c.bf16 %v2001_v1, %v2001_v1  ;;  %v8105_v1 = vpop.f32.mrf.mxu3 }
 0x256   : > { %v2290_v53 = vrot.slane %v1538_v55, 7  ;;  %v3003_v14 = vrot.slane %v1538_v55, 1  ;;  %6287 = vmatmul.msk.f32.gmra.mxu1 %vm1158_vm11, %v1313_v41  ;;  %v8069_v30 = vpack.c.bf16 %v1538_v55, %v1537_v48  ;;  %v2000_v48 = vld [vmem:[%s10453_s9 + $0x70] sm:$0xff]  ;;  %v8093_v41 = vadd.s32 1, %v1627_v16 }
 0x257   : > { %v2036_v20 = vpack.c.bf16 %v2000_v48, %v2000_v48  ;;  %v3386_v2 = vunpack.c.l.b16 %v2037_v34  ;;  %v2004_v16 = vld [vmem:[%s10453_s9 + $0x90] sm:$0xff]  ;;  %v2005_v48 = vld [vmem:[%s10453_s9 + $0x98] sm:$0xff] }
 0x258   : > { %6318 = vmatmul.msk.bf16.gmra.mxu0 %vm941_vm0, %v8069_v30  ;;  %v8077_v60 = vsel %vm2285_vm1, %v2288_v59, %v2290_v53  ;;  %v8082_v26 = vsel %vm2998_vm7, %v3001_v27, %v3003_v14  ;;  %v1314_v27 = vld [vmem:[#allocation7 + $0x90] sm:$0xff]  ;;  %vm2872_vm9 = vcmp.lt.s32.totalorder %v8093_v41, 16  ;;  %v1237_v41 = vadd.f32 %v8036_v10, %v7949_v4 }
 0x259   : > { %v2412_v37 = vpack.c.bf16 %v8077_v60, %v2381_v3  ;;  %v3385_v35 = vunpack.c.l.b16 %v2036_v20 }
 0x25b   : > { %v1447_v55 = vpop.f32.mrf.mxu1  ;;  %6303 = vmatmul.msk.bf16.gmra.mxu2 %vm941_vm0, %v2412_v37  ;;  %v3388_v3 = vpack.c.b16 %v3386_v2, %v3385_v35  ;;  %v2041_v37 = vpack.c.bf16 %v2005_v48, %v2005_v48  ;;  %v1315_v48 = vld [vmem:[#allocation7 + $0x98] sm:$0xff] }
 0x25c   : > { %v1539_v63 = vadd.f32 %v1447_v55, %v1222_v25  ;;  %v2040_v25 = vpack.c.bf16 %v2004_v16, %v2004_v16  ;;  %v8117_v55 = vadd.s32 4294967295, %v1634_v23 }
 0x25d   : > { %3445 = vmatpush.bf16.msrb.mxu1 %v3388_v3  ;;  %v3568_v3 = vunpack.c.l.b16 %v2041_v37  ;;  %v2008_v37 = vld [vmem:[%s10453_s9 + $0xb0] sm:$0xff] }
 0x25e   : > { %v2292_v0 = vrot.slane %v1539_v63, 7  ;;  %v3005_v7 = vrot.slane %v1539_v63, 1  ;;  %6288 = vmatmul.msk.f32.gmra.mxu1 %vm1158_vm11, %v1314_v27  ;;  %vm2098_vm12 = vcmp.ge.s32.totalorder %v8117_v55, 0 }
 0x260   : > { %v3006_v20 = vsel %vm2998_vm7, %v3003_v14, %v3005_v7  ;;  %v2293_v34 = vsel %vm2285_vm1, %v2290_v53, %v2292_v0  ;;  %v3567_v53 = vunpack.c.l.b16 %v2040_v25  ;;  %v1641_v25 = vand.u32 15, %v7611_v29 }
 0x261   : > { %v3098_v35 = vsel %vm2872_vm9, %v3006_v20, 0.0  ;;  %v8115_v2 = vsel %vm2870_vm6, %v3006_v20, 0.0  ;;  %v8121_v27 = vsel %vm2094_vm5, %v2293_v34, 0.0  ;;  %v8128_v59 = vsel %vm2096_vm8, %v2293_v34, 0.0 }
 0x262   : > { %10774 = vst [vmem:[#allocation95_spill] sm:$0xff] %v8121_v27  ;;  %v3128_v32 = vpack.c.bf16 %v3098_v35, %v8082_v26  ;;  %v3570_v23 = vpack.c.b16 %v3568_v3, %v3567_v53  ;;  %v1227_v3 = vadd.f32 %v8036_v10, %v7931_v21  ;;  %v2383_v29 = vsel %vm2098_vm12, %v2293_v34, 0.0  ;;  %v1316_v34 = vld [vmem:[#allocation7 + $0xa0] sm:$0xff] }
 0x263   : > { %v1450_v16 = vpop.f32.mrf.mxu1 }
 0x264   : > { %v1540_v20 = vadd.f32 %v1450_v16, %v1224_v28  ;;  %6334 = vmatmul.msk.bf16.gmra.mxu3 %vm941_vm0, %v3128_v32  ;;  %3582 = vmatpush.bf16.msrb.mxu2 %v3570_v23  ;;  %v2009_v28 = vld [vmem:[%s10453_s9 + $0xb8] sm:$0xff]  ;;  %v2044_v32 = vpack.c.bf16 %v2008_v37, %v2008_v37  ;;  %v8157_v23 = vpop.f32.mrf.mxu3 }
 0x265   : > { %v2045_v53 = vpack.c.bf16 %v2009_v28, %v2009_v28  ;;  %v8159_v28 = vadd.s32 1, %v1641_v25 }
 0x266   : > { %v2294_v49 = vrot.slane %v1540_v20, 7  ;;  %v3007_v13 = vrot.slane %v1540_v20, 1  ;;  %6289 = vmatmul.msk.f32.gmra.mxu1 %vm1158_vm11, %v1315_v48  ;;  %v8133_v35 = vpack.c.bf16 %v1540_v20, %v1539_v63  ;;  %v3756_v21 = vunpack.c.l.b16 %v2044_v32 }
 0x267   : > { %v3757_v37 = vunpack.c.l.b16 %v2045_v53  ;;  %vm2874_vm13 = vcmp.lt.s32.totalorder %v8159_v28, 16 }
 0x268   : > { %10775 = vst [vmem:[#allocation96_spill] sm:$0xff] %v8133_v35  ;;  %6319 = vmatmul.msk.bf16.gmra.mxu0 %vm941_vm0, %v8133_v35  ;;  %v8147_v63 = vsel %vm2285_vm1, %v2292_v0, %v2294_v49  ;;  %v8152_v16 = vsel %vm2998_vm7, %v3005_v7, %v3007_v13  ;;  %v1257_v35 = vadd.f32 %v8036_v10, %v8028_v19 }
 0x269   : > { %10776 = vst [vmem:[#allocation97_spill] sm:$0xff] %v8147_v63  ;;  %v2413_v48 = vpack.c.bf16 %v8147_v63, %v2383_v29  ;;  %v3759_v7 = vpack.c.b16 %v3757_v37, %v3756_v21  ;;  %v1648_v29 = vand.u32 15, %v7711_v38  ;;  %v1229_v38 = vadd.f32 %v8036_v10, %v7934_v5  ;;  %v1317_v37 = vld [vmem:[#allocation7 + $0xa8] sm:$0xff] }
 0x26a   : > { %10777 = vst [vmem:[#allocation98_spill] sm:$0xff] %v8152_v16 }
 0x26b   : > { %v1453_v14 = vpop.f32.mrf.mxu1  ;;  %6304 = vmatmul.msk.bf16.gmra.mxu2 %vm941_vm0, %v2413_v48  ;;  %3816 = vmatpush.bf16.msrb.mxu0 %v3759_v7 }
 0x26c   : > { %v1541_v45 = vadd.f32 %v1453_v14, %v1227_v3  ;;  %v8175_v14 = vadd.s32 4294967295, %v1648_v29  ;;  %v1318_v29 = vld [vmem:[#allocation7 + $0xb0] sm:$0xff] }
 0x26e   : > { %v2296_v44 = vrot.slane %v1541_v45, 7  ;;  %v3009_v20 = vrot.slane %v1541_v45, 1  ;;  %6290 = vmatmul.msk.f32.gmra.mxu1 %vm1158_vm11, %v1316_v34  ;;  %vm2100_vm15 = vcmp.ge.s32.totalorder %v8175_v14, 0 }
 0x270   : > { %v3010_v25 = vsel %vm2998_vm7, %v3007_v13, %v3009_v20  ;;  %v2297_v32 = vsel %vm2285_vm1, %v2294_v49, %v2296_v44  ;;  %v8182_v49 = vpop.f32.mrf.mxu3 }
 0x271   : > { %v3100_v53 = vsel %vm2874_vm13, %v3010_v25, 0.0  ;;  %v8173_v48 = vsel %vm2870_vm6, %v3010_v25, 0.0  ;;  %v8186_v34 = vsel %vm2098_vm12, %v2297_v32, 0.0  ;;  %v8190_v18 = vsel %vm2872_vm9, %v3010_v25, 0.0 }
 0x272   : > { %10778 = vst [vmem:[#allocation99_spill] sm:$0xff] %v8173_v48  ;;  %v3129_v3 = vpack.c.bf16 %v3100_v53, %v8152_v16  ;;  %v8194_v5 = vsel %vm2096_vm8, %v2297_v32, 0.0  ;;  %v1655_v25 = vand.u32 15, %v7714_v56 }
 0x273   : > { %v1456_v13 = vpop.f32.mrf.mxu1  ;;  %10779 = vst [vmem:[#allocation100_spill] sm:$0xff] %v8190_v18 }
 0x274   : > { %10780 = vst [vmem:[#allocation101_spill] sm:$0xff] %v8194_v5  ;;  %v1542_v7 = vadd.f32 %v1456_v13, %v1229_v38  ;;  %6335 = vmatmul.msk.bf16.gmra.mxu3 %vm941_vm0, %v3129_v3  ;;  %v2385_v3 = vsel %vm2100_vm15, %v2297_v32, 0.0 }
 0x276   : > { %v2298_v53 = vrot.slane %v1542_v7, 7  ;;  %v3011_v21 = vrot.slane %v1542_v7, 1  ;;  %6291 = vmatmul.msk.f32.gmra.mxu1 %vm1158_vm11, %v1317_v37  ;;  %v8201_v0 = vpack.c.bf16 %v1542_v7, %v1541_v45  ;;  %v1578_v37 = vadd.s32 64, %v7327_v24 }
 0x277   : > { %v8222_v7 = vadd.s32 1, %v1655_v25  ;;  %v1234_v25 = vadd.f32 %v8036_v10, %v7945_v46 }
 0x278   : > { %10781 = vst [vmem:[#allocation102_spill] sm:$0xff] %v8201_v0  ;;  %6320 = vmatmul.msk.bf16.gmra.mxu0 %vm941_vm0, %v8201_v0  ;;  %v8209_v38 = vsel %vm2285_vm1, %v2296_v44, %v2298_v53  ;;  %v8214_v13 = vsel %vm2998_vm7, %v3009_v20, %v3011_v21  ;;  %v1662_v22 = vand.u32 15, %v1578_v37  ;;  %v8225_v20 = vpop.f32.mrf.mxu3 }
 0x279   : > { %10782 = vst [vmem:[#allocation103_spill] sm:$0xff] %v8214_v13  ;;  %v2414_v45 = vpack.c.bf16 %v8209_v38, %v2385_v3  ;;  %vm2876_vm2 = vcmp.lt.s32.totalorder %v8222_v7, 16  ;;  %v1999_v7 = vld [vmem:[%s10453_s9 + $0x68] sm:$0xff] }
 0x27b   : > { %v1459_v44 = vpop.f32.mrf.mxu1  ;;  %6305 = vmatmul.msk.bf16.gmra.mxu2 %vm941_vm0, %v2414_v45 }
 0x27c   : > { %v1543_v32 = vadd.f32 %v1459_v44, %v1232_v47  ;;  %v8235_v47 = vadd.s32 4294967295, %v1662_v22  ;;  %v1579_v44 = vadd.s32 72, %v7327_v24 }
 0x27e   : > { %v2300_v36 = vrot.slane %v1543_v32, 7  ;;  %v3013_v3 = vrot.slane %v1543_v32, 1  ;;  %6292 = vmatmul.msk.f32.gmra.mxu1 %vm1158_vm11, %v1318_v29  ;;  %vm2102_vm4 = vcmp.ge.s32.totalorder %v8235_v47, 0  ;;  %v1669_v55 = vand.u32 15, %v1579_v44  ;;  %v1998_v47 = vld [vmem:[%s10453_s9 + $0x60] sm:$0xff] }
 0x280   : > { %v3014_v56 = vsel %vm2998_vm7, %v3011_v21, %v3013_v3  ;;  %v2301_v31 = vsel %vm2285_vm1, %v2298_v53, %v2300_v36  ;;  %v8264_v54 = vpop.f32.mrf.mxu3  ;;  %v8284_v44 = vadd.s32 1, %v1669_v55  ;;  %v1239_v55 = vadd.f32 %v8036_v10, %v7954_v15 }
 0x281   : > { %v3102_v45 = vsel %vm2876_vm2, %v3014_v56, 0.0  ;;  %v8241_v29 = vsel %vm2100_vm15, %v2301_v31, 0.0  ;;  %v8245_v21 = vsel %vm2874_vm13, %v3014_v56, 0.0  ;;  %v8251_v22 = vsel %vm2098_vm12, %v2301_v31, 0.0 }
 0x282   : > { %v3130_v37 = vpack.c.bf16 %v3102_v45, %v8214_v13  ;;  %10783 = vst [vmem:[#allocation104_spill] sm:$0xff] %v8245_v21  ;;  %v8255_v45 = vsel %vm2872_vm9, %v3014_v56, 0.0  ;;  %vm2878_vm5 = vcmp.lt.s32.totalorder %v8284_v44, 16 }
 0x283   : > { %v1462_v53 = vpop.f32.mrf.mxu1  ;;  %10784 = vst [vmem:[#allocation105_spill] sm:$0xff] %v8251_v22 }
 0x284   : > { %10785 = vst [vmem:[#allocation106_spill] sm:$0xff] %v8255_v45  ;;  %v1544_v40 = vadd.f32 %v1462_v53, %v1234_v25  ;;  %6336 = vmatmul.msk.bf16.gmra.mxu3 %vm941_vm0, %v3130_v37  ;;  %v2387_v25 = vsel %vm2102_vm4, %v2301_v31, 0.0  ;;  %v1320_v53 = vld [vmem:[#allocation7 + $0xc0] sm:$0xff] }
 0x286   : > { %v2302_v33 = vrot.slane %v1544_v40, 7  ;;  %v3015_v48 = vrot.slane %v1544_v40, 1  ;;  %6293 = vmatmul.msk.f32.gmra.mxu1 %vm1158_vm11, %v1319_v43  ;;  %v8262_v46 = vpack.c.bf16 %v1544_v40, %v1543_v32  ;;  %v1580_v43 = vadd.s32 80, %v7327_v24 }
 0x288   : > { %10786 = vst [vmem:[#allocation107_spill] sm:$0xff] %v8262_v46  ;;  %6321 = vmatmul.msk.bf16.gmra.mxu0 %vm941_vm0, %v8262_v46  ;;  %v8271_v56 = vsel %vm2285_vm1, %v2300_v36, %v2302_v33  ;;  %v8276_v37 = vsel %vm2998_vm7, %v3013_v3, %v3015_v48  ;;  %v1676_v12 = vand.u32 15, %v1580_v43 }
 0x289   : > { %10787 = vst [vmem:[#allocation108_spill] sm:$0xff] %v8276_v37  ;;  %v2415_v40 = vpack.c.bf16 %v8271_v56, %v2387_v25 }
 0x28b   : > { %v1465_v36 = vpop.f32.mrf.mxu1  ;;  %6306 = vmatmul.msk.bf16.gmra.mxu2 %vm941_vm0, %v2415_v40  ;;  %v8295_v40 = vadd.s32 4294967295, %v1676_v12 }
 0x28c   : > { %v1545_v31 = vadd.f32 %v1465_v36, %v1237_v41  ;;  %v8297_v41 = vpop.f32.mrf.mxu3  ;;  %v1581_v36 = vadd.s32 88, %v7327_v24 }
 0x28d   : > { %vm2104_vm6 = vcmp.ge.s32.totalorder %v8295_v40, 0 }
 0x28e   : > { %v2304_v3 = vrot.slane %v1545_v31, 7  ;;  %v3017_v45 = vrot.slane %v1545_v31, 1  ;;  %6294 = vmatmul.msk.f32.gmra.mxu1 %vm1158_vm11, %v1320_v53  ;;  %v1683_v14 = vand.u32 15, %v1581_v36 }
 0x290   : > { %v3018_v25 = vsel %vm2998_vm7, %v3015_v48, %v3017_v45  ;;  %v2305_v32 = vsel %vm2285_vm1, %v2302_v33, %v2304_v3  ;;  %v1321_v48 = vld [vmem:[#allocation7 + $0xc8] sm:$0xff] }
 0x291   : > { %v3104_v4 = vsel %vm2878_vm5, %v3018_v25, 0.0  ;;  %v8303_v53 = vsel %vm2102_vm4, %v2305_v32, 0.0  ;;  %v8307_v33 = vsel %vm2876_vm2, %v3018_v25, 0.0  ;;  %v8313_v11 = vsel %vm2100_vm15, %v2305_v32, 0.0 }
 0x292   : > { %v3131_v43 = vpack.c.bf16 %v3104_v4, %v8276_v37  ;;  %10788 = vst [vmem:[#allocation109_spill] sm:$0xff] %v8307_v33  ;;  %v8317_v4 = vsel %vm2874_vm13, %v3018_v25, 0.0  ;;  %v1242_v33 = vadd.f32 %v8036_v10, %v7958_v6  ;;  %v2389_v25 = vsel %vm2104_vm6, %v2305_v32, 0.0 }
 0x293   : > { %v1468_v15 = vpop.f32.mrf.mxu1  ;;  %10789 = vst [vmem:[#allocation110_spill] sm:$0xff] %v8313_v11  ;;  %v8341_v6 = vadd.s32 1, %v1683_v14  ;;  %v1247_v37 = vadd.f32 %v8036_v10, %v7973_v51 }
 0x294   : > { %10790 = vst [vmem:[#allocation111_spill] sm:$0xff] %v8317_v4  ;;  %v1546_v57 = vadd.f32 %v1468_v15, %v1239_v55  ;;  %6337 = vmatmul.msk.bf16.gmra.mxu3 %vm941_vm0, %v3131_v43  ;;  %v1582_v43 = vadd.s32 96, %v7327_v24 }
 0x295   : > { %vm2880_vm8 = vcmp.lt.s32.totalorder %v8341_v6, 16 }
 0x296   : > { %v2306_v22 = vrot.slane %v1546_v57, 7  ;;  %6295 = vmatmul.msk.f32.gmra.mxu1 %vm1158_vm11, %v1321_v48  ;;  %v8324_v12 = vpack.c.bf16 %v1546_v57, %v1545_v31  ;;  %v8344_v48 = vpop.f32.mrf.mxu3  ;;  %v3019_v32 = vrot.slane %v1546_v57, 1 }
 0x298   : > { %10791 = vst [vmem:[#allocation112_spill] sm:$0xff] %v8324_v12  ;;  %6322 = vmatmul.msk.bf16.gmra.mxu0 %vm941_vm0, %v8324_v12  ;;  %v8331_v28 = vsel %vm2285_vm1, %v2304_v3, %v2306_v22  ;;  %v1322_v3 = vld [vmem:[#allocation7 + $0xd0] sm:$0xff] }
 0x299   : > { %v2416_v55 = vpack.c.bf16 %v8331_v28, %v2389_v25  ;;  %v1690_v25 = vand.u32 15, %v1582_v43 }
 0x29b   : > { %v1471_v15 = vpop.f32.mrf.mxu1  ;;  %6307 = vmatmul.msk.bf16.gmra.mxu2 %vm941_vm0, %v2416_v55  ;;  %v1244_v55 = vadd.f32 %v8036_v10, %v7963_v42  ;;  %v8361_v43 = vadd.s32 4294967295, %v1690_v25 }
 0x29c   : > { %v8346_v46 = vadd.f32 %v1471_v15, %v1242_v33  ;;  %v8357_v33 = vsel %vm2998_vm7, %v3017_v45, %v3019_v32  ;;  %v1323_v45 = vld [vmem:[#allocation7 + $0xd8] sm:$0xff] }
 0x29d   : > { %10792 = vst [vmem:[#allocation113_spill] sm:$0xff] %v8357_v33  ;;  %vm2106_vm9 = vcmp.ge.s32.totalorder %v8361_v43, 0 }
 0x29e   : > { %v2308_v4 = vrot.slane %v8346_v46, 7  ;;  %v3021_v12 = vrot.slane %v8346_v46, 1  ;;  %6296 = vmatmul.msk.f32.gmra.mxu1 %vm1158_vm11, %v1322_v3  ;;  %v1583_v3 = vadd.s32 104, %v7327_v24  ;;  %v8387_v0 = vpop.f32.mrf.mxu3 }
 0x2a0   : > { %v3022_v14 = vsel %vm2998_vm7, %v3019_v32, %v3021_v12  ;;  %v2309_v36 = vsel %vm2285_vm1, %v2306_v22, %v2308_v4  ;;  %v2035_v32 = vpack.c.bf16 %v1999_v7, %v1999_v7 }
 0x2a1   : > { %v3106_v57 = vsel %vm2880_vm8, %v3022_v14, 0.0  ;;  %v8367_v31 = vsel %vm2104_vm6, %v2309_v36, 0.0  ;;  %v8371_v22 = vsel %vm2878_vm5, %v3022_v14, 0.0  ;;  %v8377_v25 = vsel %vm2102_vm4, %v2309_v36, 0.0 }
 0x2a2   : > { %v3132_v15 = vpack.c.bf16 %v3106_v57, %v8357_v33  ;;  %10793 = vst [vmem:[#allocation114_spill] sm:$0xff] %v8371_v22  ;;  %v8381_v57 = vsel %vm2876_vm2, %v3022_v14, 0.0  ;;  %v2391_v33 = vsel %vm2106_vm9, %v2309_v36, 0.0 }
 0x2a3   : > { %v1474_v42 = vpop.f32.mrf.mxu1  ;;  %10794 = vst [vmem:[#allocation115_spill] sm:$0xff] %v8377_v25 }
 0x2a4   : > { %10795 = vst [vmem:[#allocation116_spill] sm:$0xff] %v8381_v57  ;;  %v1548_v11 = vadd.f32 %v1474_v42, %v1244_v55  ;;  %6338 = vmatmul.msk.bf16.gmra.mxu3 %vm941_vm0, %v3132_v15  ;;  %v1697_v15 = vand.u32 15, %v1583_v3  ;;  %v2034_v42 = vpack.c.bf16 %v1998_v47, %v1998_v47  ;;  %v3384_v3 = vunpack.c.l.b16 %v2035_v32  ;;  %v8422_v32 = vld [vmem:[%s10454_s10] ss:$0 sm:$0xff] }
 0x2a6   : > { %v2310_v14 = vrot.slane %v1548_v11, 7  ;;  %6297 = vmatmul.msk.f32.gmra.mxu1 %vm1158_vm11, %v1323_v45  ;;  %v8397_v55 = vpack.c.bf16 %v1548_v11, %v8346_v46  ;;  %v1584_v45 = vadd.s32 112, %v7327_v24  ;;  %v3383_v22 = vunpack.c.l.b16 %v2034_v42 }
 0x2a7   : > { %v8414_v7 = vadd.s32 1, %v1697_v15  ;;  %v3023_v62 = vrot.slane %v1548_v11, 1  ;;  %v8424_v15 = vpop.f32.mrf.mxu3 }
 0x2a8   : > { %10796 = vst [vmem:[#allocation117_spill] sm:$0xff] %v8397_v55  ;;  %6323 = vmatmul.msk.bf16.gmra.mxu0 %vm941_vm0, %v8397_v55  ;;  %v8404_v57 = vsel %vm2285_vm1, %v2308_v4, %v2310_v14  ;;  %v1324_v4 = vld [vmem:[#allocation7 + $0xe0] sm:$0xff]  ;;  %v3387_v39 = vpack.c.b16 %v3384_v3, %v3383_v22  ;;  %v1704_v13 = vand.u32 15, %v1584_v45  ;;  %v2693_v3 = vpop.f32.mrf.mxu0 }
 0x2a9   : > { %10797 = vst [vmem:[#allocation118_spill] sm:$0xff] %v8404_v57  ;;  %v2417_v46 = vpack.c.bf16 %v8404_v57, %v2391_v33  ;;  %vm2882_vm12 = vcmp.lt.s32.totalorder %v8414_v7, 16  ;;  %v1262_v7 = vadd.f32 %v8036_v10, %v8044_v50  ;;  %v10818_v50 = vpack.c.bf16 %v8147_v63, %v8128_v59  ;;  %v2002_v59 = vld [vmem:[%s10453_s9 + $0x80] sm:$0xff] }
 0x2aa   : > { %3446 = vmatpush.bf16.msrb.mxu1 %v3387_v39  ;;  %v8434_v45 = vadd.s32 4294967295, %v1704_v13 }
 0x2ab   : > { %v1477_v55 = vpop.f32.mrf.mxu1  ;;  %6308 = vmatmul.msk.bf16.gmra.mxu2 %vm941_vm0, %v2417_v46  ;;  %v2496_v46 = vpop.f32.mrf.mxu2 }
 0x2ac   : > { %v1549_v36 = vadd.f32 %v1477_v55, %v1247_v37  ;;  %v2576_v39 = vadd.f32 %v8422_v32, %v2496_v46  ;;  %v8430_v37 = vsel %vm2998_vm7, %v3021_v12, %v3023_v62  ;;  %v1325_v46 = vld [vmem:[#allocation7 + $0xe8] sm:$0xff]  ;;  %vm2108_vm13 = vcmp.ge.s32.totalorder %v8434_v45, 0 }
 0x2ad   : > { %10798 = vst [vmem:[#allocation119_spill] sm:$0xff] %v8430_v37 }
 0x2ae   : > { %v2312_v42 = vrot.slane %v1549_v36, 7  ;;  %v3025_v33 = vrot.slane %v1549_v36, 1  ;;  %6298 = vmatmul.msk.f32.gmra.mxu1 %vm1158_vm11, %v1324_v4  ;;  %v1249_v4 = vadd.f32 %v8036_v10, %v8005_v58  ;;  %v8440_v47 = vadd.f32 %v2693_v3, %v2576_v39 }
 0x2b0   : > { %v2313_v22 = vsel %vm2285_vm1, %v2310_v14, %v2312_v42  ;;  %v3026_v11 = vsel %vm2998_vm7, %v3023_v62, %v3025_v33  ;;  %v1585_v14 = vadd.s32 120, %v7327_v24 }
 0x2b1   : > { %v3108_v55 = vsel %vm2882_vm12, %v3026_v11, 0.0  ;;  %v8444_v62 = vsel %vm2106_vm9, %v2313_v22, 0.0  ;;  %v8448_v13 = vsel %vm2880_vm8, %v3026_v11, 0.0  ;;  %v8452_v12 = vsel %vm2104_vm6, %v2313_v22, 0.0 }
 0x2b2   : > { %v3133_v51 = vpack.c.bf16 %v3108_v55, %v8430_v37  ;;  %10799 = vst [vmem:[#allocation120_spill] sm:$0xff] %v8448_v13  ;;  %v8459_v55 = vsel %vm2878_vm5, %v3026_v11, 0.0  ;;  %v1711_v40 = vand.u32 15, %v1585_v14  ;;  %v1586_v11 = vadd.s32 128, %v7327_v24 }
 0x2b3   : > { %v1480_v25 = vpop.f32.mrf.mxu1  ;;  %10800 = vst [vmem:[#allocation121_spill] sm:$0xff] %v8452_v12 }
 0x2b4   : > { %v1550_v58 = vadd.f32 %v1480_v25, %v1249_v4  ;;  %6339 = vmatmul.msk.bf16.gmra.mxu3 %vm941_vm0, %v3133_v51  ;;  %10801 = vst [vmem:[#allocation122_spill] sm:$0xff] %v8459_v55  ;;  %v1252_v25 = vadd.f32 %v8036_v10, %v8015_v17  ;;  %v2393_v51 = vsel %vm2108_vm13, %v2313_v22, 0.0  ;;  %v8478_v4 = vpop.f32.mrf.mxu3  ;;  %v1718_v22 = vand.u32 15, %v1586_v11 }
 0x2b6   : > { %v2314_v21 = vrot.slane %v1550_v58, 7  ;;  %v8464_v5 = vpack.c.bf16 %v1550_v58, %v1549_v36  ;;  %6299 = vmatmul.msk.f32.gmra.mxu1 %vm1158_vm11, %v1325_v46  ;;  %v8484_v46 = vadd.s32 1, %v1711_v40  ;;  %v3027_v55 = vrot.slane %v1550_v58, 1 }
 0x2b7   : > { %v8491_v17 = vadd.s32 4294967295, %v1718_v22 }
 0x2b8   : > { %10802 = vst [vmem:[#allocation123_spill] sm:$0xff] %v8464_v5  ;;  %6324 = vmatmul.msk.bf16.gmra.mxu0 %vm941_vm0, %v8464_v5  ;;  %v8472_v44 = vsel %vm2285_vm1, %v2312_v42, %v2314_v21  ;;  %v1326_v42 = vld [vmem:[#allocation7 + $0xf0] sm:$0xff]  ;;  %vm2884_vm15 = vcmp.lt.s32.totalorder %v8484_v46, 16  ;;  %v8494_v40 = vsel %vm2998_vm7, %v3025_v33, %v3027_v55  ;;  %v2007_v46 = vld [vmem:[%s10453_s9 + $0xa8] sm:$0xff] }
 0x2b9   : > { %10803 = vst [vmem:[#allocation124_spill] sm:$0xff] %v8472_v44  ;;  %v2418_v36 = vpack.c.bf16 %v8472_v44, %v2393_v51  ;;  %vm2110_vm2 = vcmp.ge.s32.totalorder %v8491_v17, 0 }
 0x2ba   : > { %10804 = vst [vmem:[#allocation125_spill] sm:$0xff] %v8494_v40 }
 0x2bb   : > { %v1483_v3 = vpop.f32.mrf.mxu1  ;;  %6309 = vmatmul.msk.bf16.gmra.mxu2 %vm941_vm0, %v2418_v36  ;;  %v1587_v36 = vadd.s32 136, %v7327_v24 }
 0x2bc   : > { %v1551_v39 = vadd.f32 %v1483_v3, %v1252_v25  ;;  %v8512_v22 = vpop.f32.mrf.mxu3 }
 0x2bd   : > { %v1725_v43 = vand.u32 15, %v1587_v36 }
 0x2be   : > { %v2316_v5 = vrot.slane %v1551_v39, 7  ;;  %v3029_v37 = vrot.slane %v1551_v39, 1  ;;  %6300 = vmatmul.msk.f32.gmra.mxu1 %vm1158_vm11, %v1326_v42  ;;  %v1327_v42 = vld [vmem:[#allocation7 + $0xf8] sm:$0xff] }
 0x2bf   : > { %v8544_v19 = vadd.s32 1, %v1725_v43 }
 0x2c0   : > { %v2317_v51 = vsel %vm2285_vm1, %v2314_v21, %v2316_v5  ;;  %v3030_v14 = vsel %vm2998_vm7, %v3027_v55, %v3029_v37  ;;  %v1254_v21 = vadd.f32 %v8036_v10, %v8025_v9 }
 0x2c1   : > { %v3110_v3 = vsel %vm2884_vm15, %v3030_v14, 0.0  ;;  %v8500_v58 = vsel %vm2108_vm13, %v2317_v51, 0.0  ;;  %v8504_v25 = vsel %vm2882_vm12, %v3030_v14, 0.0  ;;  %v8516_v12 = vsel %vm2106_vm9, %v2317_v51, 0.0 }
 0x2c2   : > { %10805 = vst [vmem:[#allocation126_spill] sm:$0xff] %v8504_v25  ;;  %v3134_v11 = vpack.c.bf16 %v3110_v3, %v8494_v40  ;;  %v8520_v13 = vsel %vm2880_vm8, %v3030_v14, 0.0  ;;  %v2395_v14 = vsel %vm2110_vm2, %v2317_v51, 0.0 }
 0x2c3   : > { %v1486_v55 = vpop.f32.mrf.mxu1  ;;  %10806 = vst [vmem:[#allocation127_spill] sm:$0xff] %v8516_v12 }
 0x2c4   : > { %10807 = vst [vmem:[#allocation128_spill] sm:$0xff] %v8520_v13  ;;  %v1552_v9 = vadd.f32 %v1486_v55, %v1254_v21  ;;  %6340 = vmatmul.msk.bf16.gmra.mxu3 %vm941_vm0, %v3134_v11  ;;  %v1588_v21 = vadd.s32 144, %v7327_v24  ;;  %v8549_v13 = vpop.f32.mrf.mxu3  ;;  %v10810_v11 = vpack.c.bf16 %v8077_v60, %v8059_v61  ;;  %v1259_v60 = vadd.f32 %v8036_v10, %v8031_v52 }
 0x2c6   : > { %v2318_v33 = vrot.slane %v1552_v9, 7  ;;  %v8526_v25 = vpack.c.bf16 %v1552_v9, %v1551_v39  ;;  %6301 = vmatmul.msk.f32.gmra.mxu1 %vm1158_vm11, %v1327_v42  ;;  %v1732_v3 = vand.u32 15, %v1588_v21  ;;  %v3031_v51 = vrot.slane %v1552_v9, 1 }
 0x2c7   : > { %vm2886_vm11 = vcmp.lt.s32.totalorder %v8544_v19, 16  ;;  %v8758_v19 = vld [vmem:[%s10448_s4] ss:$0 sm:$0xff] }
 0x2c8   : > { %10808 = vst [vmem:[#allocation129_spill] sm:$0xff] %v8526_v25  ;;  %6325 = vmatmul.msk.bf16.gmra.mxu0 %vm941_vm0, %v8526_v25  ;;  %v8534_v6 = vsel %vm2285_vm1, %v2316_v5, %v2318_v33  ;;  %v8547_v5 = vpop.f32.mrf.mxu0  ;;  %v8558_v36 = vadd.s32 4294967295, %v1732_v3  ;;  %v1589_v3 = vadd.s32 152, %v7327_v24 }
 0x2c9   : > { %v2419_v39 = vpack.c.bf16 %v8534_v6, %v2395_v14  ;;  %10809 = vst [vmem:[#allocation130_spill] sm:$0xff] %v8547_v5 }
 0x2ca   : > { %vm2112_vm4 = vcmp.ge.s32.totalorder %v8558_v36, 0  ;;  %v1739_v45 = vand.u32 15, %v1589_v3 }
 0x2cb   : > { %v1489_v55 = vpop.f32.mrf.mxu1  ;;  %6310 = vmatmul.msk.bf16.gmra.mxu2 %vm941_vm0, %v2419_v39 }
 0x2cc   : > { %v1553_v42 = vadd.f32 %v1489_v55, %v1257_v35  ;;  %v8561_v35 = vsel %vm2998_vm7, %v3029_v37, %v3031_v51 }
 0x2cd   : > { %10811 = vst [vmem:[#allocation131_spill] sm:$0xff] %v8561_v35 }
 0x2ce   : > { %v2320_v25 = vrot.slane %v1553_v42, 7  ;;  %v3033_v14 = vrot.slane %v1553_v42, 1  ;;  %6349 = vmatmul.msk.bf16.vlgmr.msrb.gmra.mxu1 %vm941_vm0, %v10810_v11 }
 0x2d0   : > { %v2321_v43 = vsel %vm2285_vm1, %v2318_v33, %v2320_v25  ;;  %v3034_v39 = vsel %vm2998_vm7, %v3031_v51, %v3033_v14 }
 0x2d1   : > { %v3112_v9 = vsel %vm2886_vm11, %v3034_v39, 0.0  ;;  %v8567_v21 = vsel %vm2110_vm2, %v2321_v43, 0.0  ;;  %v8571_v61 = vsel %vm2884_vm15, %v3034_v39, 0.0  ;;  %v8581_v55 = vsel %vm2108_vm13, %v2321_v43, 0.0 }
 0x2d2   : > { %10812 = vst [vmem:[#allocation132_spill] sm:$0xff] %v8567_v21  ;;  %v3135_v33 = vpack.c.bf16 %v3112_v9, %v8561_v35  ;;  %v8585_v51 = vsel %vm2882_vm12, %v3034_v39, 0.0 }
 0x2d3   : > { %10813 = vst [vmem:[#allocation133_spill] sm:$0xff] %v8571_v61  ;;  %v1492_v11 = vpop.f32.mrf.mxu1  ;;  %v8593_v61 = vpop.f32.mrf.mxu2 }
 0x2d4   : > { %10814 = vst [vmem:[#allocation134_spill] sm:$0xff] %v8581_v55  ;;  %v1554_v12 = vadd.f32 %v1492_v11, %v1259_v60  ;;  %6341 = vmatmul.msk.bf16.gmra.mxu3 %vm941_vm0, %v3135_v33  ;;  %v1590_v11 = vadd.s32 160, %v7327_v24  ;;  %v1591_v55 = vadd.s32 168, %v7327_v24 }
 0x2d5   : > { %10815 = vst [vmem:[#allocation135_spill] sm:$0xff] %v8585_v51  ;;  %v2698_v9 = vpop.f32.mrf.mxu0 }
 0x2d6   : > { %v2322_v40 = vrot.slane %v1554_v12, 7  ;;  %v8591_v37 = vpack.c.bf16 %v1554_v12, %v1553_v42  ;;  %v2397_v42 = vsel %vm2112_vm4, %v2321_v43, 0.0  ;;  %v1746_v51 = vand.u32 15, %v1590_v11  ;;  %v2003_v11 = vld [vmem:[%s10453_s9 + $0x88] sm:$0xff] }
 0x2d7   : > { %v3212_v39 = vpop.f32.mrf.mxu3  ;;  %v2039_v18 = vpack.c.bf16 %v2003_v11, %v2003_v11  ;;  %v1753_v5 = vand.u32 15, %v1591_v55  ;;  %v1592_v55 = vadd.s32 176, %v7327_v24 }
 0x2d8   : > { %10816 = vst [vmem:[#allocation136_spill] sm:$0xff] %v8591_v37  ;;  %v8598_v60 = vadd.f32 %v3212_v39, %v8440_v47  ;;  %6326 = vmatmul.msk.bf16.gmra.mxu0 %vm941_vm0, %v8591_v37  ;;  %v8603_v33 = vsel %vm2285_vm1, %v2320_v25, %v2322_v40  ;;  %v8613_v39 = vadd.s32 1, %v1739_v45  ;;  %v3035_v37 = vrot.slane %v1554_v12, 1 }
 0x2d9   : > { %10817 = vst [vmem:[#allocation137_spill] sm:$0xff] %v8603_v33  ;;  %v2420_v3 = vpack.c.bf16 %v8603_v33, %v2397_v42  ;;  %v2038_v47 = vpack.c.bf16 %v2002_v59, %v2002_v59  ;;  %v2043_v33 = vpack.c.bf16 %v2007_v46, %v2007_v46 }
 0x2da   : > { %vm2888_vm5 = vcmp.lt.s32.totalorder %v8613_v39, 16  ;;  %v1277_v39 = vadd.f32 %v8758_v19, %v8264_v54 }
 0x2db   : > { %v1495_v52 = vpop.f32.mrf.mxu1  ;;  %6311 = vmatmul.msk.bf16.gmra.mxu2 %vm941_vm0, %v2420_v3  ;;  %v3565_v63 = vunpack.c.l.b16 %v2038_v47 }
 0x2dc   : > { %v8616_v25 = vadd.f32 %v1495_v52, %v1262_v7  ;;  %v8632_v7 = vadd.s32 4294967295, %v1746_v51  ;;  %v1264_v51 = vadd.f32 %v8036_v10, %v8066_v8 }
 0x2dd   : > { %v2700_v43 = vpop.f32.mrf.mxu0 }
 0x2de   : > { %v2324_v35 = vrot.slane %v8616_v25, 7  ;;  %v10607_v42 = vrot.slane %v8616_v25, 1  ;;  %v2501_v16 = vpop.f32.mrf.mxu2  ;;  %6350 = vmatmul.msk.bf16.gmra.mxu1 %vm941_vm0, %v10818_v50  ;;  %vm2114_vm6 = vcmp.ge.s32.totalorder %v8632_v7, 0 }
 0x2df   : > { %v2578_v45 = vadd.f32 %v8422_v32, %v2501_v16  ;;  %v8626_v3 = vpop.f32.mrf.mxu3  ;;  %v8641_v16 = vsel %vm2998_vm7, %v3033_v14, %v3035_v37 }
 0x2e0   : > { %10819 = vst [vmem:[#allocation138_spill] sm:$0xff] %v8626_v3  ;;  %v2325_v52 = vsel %vm2285_vm1, %v2322_v40, %v2324_v35  ;;  %v3038_v12 = vsel %vm2998_vm7, %v3035_v37, %v10607_v42 }
 0x2e1   : > { %10820 = vst [vmem:[#allocation139_spill] sm:$0xff] %v8641_v16  ;;  %v3114_v40 = vsel %vm2888_vm5, %v3038_v12, 0.0  ;;  %v2775_v50 = vadd.f32 %v2698_v9, %v2578_v45  ;;  %v8651_v3 = vsel %vm2112_vm4, %v2325_v52, 0.0  ;;  %v8655_v14 = vsel %vm2886_vm11, %v3038_v12, 0.0  ;;  %v2006_v45 = vld [vmem:[%s10453_s9 + $0xa0] sm:$0xff] }
 0x2e2   : > { %v3136_v42 = vpack.c.bf16 %v3114_v40, %v8641_v16  ;;  %10821 = vst [vmem:[#allocation140_spill] sm:$0xff] %v8655_v14  ;;  %v8659_v37 = vsel %vm2110_vm2, %v2325_v52, 0.0  ;;  %v3566_v9 = vunpack.c.l.b16 %v2039_v18  ;;  %v8667_v59 = vsel %vm2884_vm15, %v3038_v12, 0.0 }
 0x2e3   : > { %v1498_v27 = vpop.f32.mrf.mxu1  ;;  %10822 = vst [vmem:[#allocation141_spill] sm:$0xff] %v8659_v37  ;;  %v1267_v18 = vadd.f32 %v8036_v10, %v8105_v1  ;;  %v2042_v21 = vpack.c.bf16 %v2006_v45, %v2006_v45  ;;  %v8694_v12 = vadd.s32 1, %v1753_v5 }
 0x2e4   : > { %v1556_v8 = vadd.f32 %v1498_v27, %v1264_v51  ;;  %6342 = vmatmul.msk.bf16.gmra.mxu3 %vm941_vm0, %v3136_v42  ;;  %10823 = vst [vmem:[#allocation142_spill] sm:$0xff] %v8667_v59  ;;  %v3569_v27 = vpack.c.b16 %v3566_v9, %v3565_v63  ;;  %v2399_v63 = vsel %vm2114_vm6, %v2325_v52, 0.0  ;;  %v3755_v59 = vunpack.c.l.b16 %v2043_v33 }
 0x2e5   : > { %v2703_v47 = vpop.f32.mrf.mxu0  ;;  %v3754_v52 = vunpack.c.l.b16 %v2042_v21  ;;  %vm2890_vm8 = vcmp.lt.s32.totalorder %v8694_v12, 16  ;;  %v1282_v12 = vadd.f32 %v8758_v19, %v8344_v48  ;;  %v1599_v48 = vadd.s32 232, %v7327_v24 }
 0x2e6   : > { %v2326_v11 = vrot.slane %v1556_v8, 7  ;;  %v8670_v40 = vpack.c.bf16 %v1556_v8, %v8616_v25  ;;  %v2503_v17 = vpop.f32.mrf.mxu2  ;;  %3583 = vmatpush.bf16.msrb.mxu2 %v3569_v27  ;;  %v3039_v27 = vrot.slane %v1556_v8, 1  ;;  %v1269_v8 = vadd.f32 %v8036_v10, %v8157_v23 }
 0x2e7   : > { %v2579_v42 = vadd.f32 %v8422_v32, %v2503_v17  ;;  %v3217_v51 = vpop.f32.mrf.mxu3  ;;  %v3758_v45 = vpack.c.b16 %v3755_v59, %v3754_v52  ;;  %v1593_v23 = vadd.s32 184, %v7327_v24 }
 0x2e8   : > { %10824 = vst [vmem:[#allocation143_spill] sm:$0xff] %v8670_v40  ;;  %v8683_v14 = vadd.f32 %v3217_v51, %v2775_v50  ;;  %6327 = vmatmul.msk.bf16.gmra.mxu0 %vm941_vm0, %v8670_v40  ;;  %v8688_v1 = vsel %vm2285_vm1, %v2324_v35, %v2326_v11  ;;  %v10825_v50 = vpack.c.bf16 %v8209_v38, %v8186_v34  ;;  %v10826_v34 = vrot.slane %v8616_v25, 1 }
 0x2e9   : > { %v2421_v9 = vpack.c.bf16 %v8688_v1, %v2399_v63  ;;  %v2776_v17 = vadd.f32 %v2700_v43, %v2579_v42  ;;  %v1760_v43 = vand.u32 15, %v1592_v55  ;;  %3817 = vmatpush.bf16.msrb.mxu0 %v3758_v45 }
 0x2eb   : > { %v1501_v51 = vpop.f32.mrf.mxu1  ;;  %6312 = vmatmul.msk.bf16.gmra.mxu2 %vm941_vm0, %v2421_v9  ;;  %v8722_v9 = vsel %vm2998_vm7, %v10826_v34, %v3039_v27  ;;  %v8726_v52 = vadd.s32 4294967295, %v1760_v43 }
 0x2ec   : > { %v8701_v40 = vadd.f32 %v1501_v51, %v1267_v18  ;;  %10827 = vst [vmem:[#allocation144_spill] sm:$0xff] %v8722_v9 }
 0x2ed   : > { %v2705_v63 = vpop.f32.mrf.mxu0  ;;  %vm2116_vm9 = vcmp.ge.s32.totalorder %v8726_v52, 0 }
 0x2ee   : > { %v2328_v5 = vrot.slane %v8701_v40, 7  ;;  %v10619_v42 = vrot.slane %v8701_v40, 1  ;;  %v2506_v46 = vpop.f32.mrf.mxu2  ;;  %6351 = vmatmul.msk.bf16.gmra.mxu1 %vm941_vm0, %v10825_v50 }
 0x2ef   : > { %v2580_v21 = vadd.f32 %v8422_v32, %v2506_v46  ;;  %v3219_v33 = vpop.f32.mrf.mxu3 }
 0x2f0   : > { %v2329_v59 = vsel %vm2285_vm1, %v2326_v11, %v2328_v5  ;;  %v3042_v18 = vsel %vm2998_vm7, %v3039_v27, %v10619_v42  ;;  %v8717_v55 = vadd.f32 %v3219_v33, %v2776_v17  ;;  %v1594_v27 = vadd.s32 192, %v7327_v24 }
 0x2f1   : > { %v3116_v50 = vsel %vm2890_vm8, %v3042_v18, 0.0  ;;  %v2777_v51 = vadd.f32 %v2703_v47, %v2580_v21  ;;  %v8732_v11 = vsel %vm2114_vm6, %v2329_v59, 0.0  ;;  %v8736_v25 = vsel %vm2888_vm5, %v3042_v18, 0.0 }
 0x2f2   : > { %v3137_v10 = vpack.c.bf16 %v3116_v50, %v8722_v9  ;;  %10828 = vst [vmem:[#allocation145_spill] sm:$0xff] %v8736_v25  ;;  %v8742_v47 = vsel %vm2112_vm4, %v2329_v59, 0.0  ;;  %v8746_v43 = vsel %vm2886_vm11, %v3042_v18, 0.0  ;;  %v1767_v50 = vand.u32 15, %v1593_v23 }
 0x2f3   : > { %v1504_v17 = vpop.f32.mrf.mxu1  ;;  %10829 = vst [vmem:[#allocation146_spill] sm:$0xff] %v8742_v47  ;;  %v2401_v23 = vsel %vm2116_vm9, %v2329_v59, 0.0 }
 0x2f4   : > { %10830 = vst [vmem:[#allocation147_spill] sm:$0xff] %v8746_v43  ;;  %v1558_v45 = vadd.f32 %v1504_v17, %v1269_v8  ;;  %6343 = vmatmul.msk.bf16.gmra.mxu3 %vm941_vm0, %v3137_v10  ;;  %v1272_v8 = vadd.f32 %v8758_v19, %v8182_v49 }
 0x2f5   : > { %v2708_v21 = vpop.f32.mrf.mxu0 }
 0x2f6   : > { %v2330_v33 = vrot.slane %v1558_v45, 7  ;;  %v8753_v34 = vpack.c.bf16 %v1558_v45, %v8701_v40  ;;  %v2508_v36 = vpop.f32.mrf.mxu2  ;;  %v3043_v43 = vrot.slane %v1558_v45, 1  ;;  %v1274_v45 = vadd.f32 %v8758_v19, %v8225_v20 }
 0x2f7   : > { %v2581_v18 = vadd.f32 %v8422_v32, %v2508_v36  ;;  %v3222_v10 = vpop.f32.mrf.mxu3  ;;  %v8778_v36 = vadd.s32 1, %v1767_v50  ;;  %v1595_v20 = vadd.s32 200, %v7327_v24 }
 0x2f8   : > { %10831 = vst [vmem:[#allocation148_spill] sm:$0xff] %v8753_v34  ;;  %v8763_v17 = vadd.f32 %v3222_v10, %v2777_v51  ;;  %6328 = vmatmul.msk.bf16.gmra.mxu0 %vm941_vm0, %v8753_v34  ;;  %v8768_v46 = vsel %vm2285_vm1, %v2328_v5, %v2330_v33  ;;  %v1774_v34 = vand.u32 15, %v1594_v27  ;;  %v10833_v51 = vrot.slane %v8701_v40, 1 }
 0x2f9   : > { %v2422_v35 = vpack.c.bf16 %v8768_v46, %v2401_v23  ;;  %v2778_v42 = vadd.f32 %v2705_v63, %v2581_v18  ;;  %v10832_v23 = vpack.c.bf16 %v8271_v56, %v8241_v29  ;;  %vm2892_vm12 = vcmp.lt.s32.totalorder %v8778_v36, 16 }
 0x2fa   : > { %v8800_v29 = vsel %vm2998_vm7, %v10833_v51, %v3043_v43 }
 0x2fb   : > { %v1507_v10 = vpop.f32.mrf.mxu1  ;;  %6313 = vmatmul.msk.bf16.gmra.mxu2 %vm941_vm0, %v2422_v35  ;;  %10834 = vst [vmem:[#allocation149_spill] sm:$0xff] %v8800_v29 }
 0x2fc   : > { %v8781_v5 = vadd.f32 %v1507_v10, %v1272_v8 }
 0x2fd   : > { %v2710_v59 = vpop.f32.mrf.mxu0 }
 0x2fe   : > { %v2332_v9 = vrot.slane %v8781_v5, 7  ;;  %v3045_v63 = vrot.slane %v8781_v5, 1  ;;  %v2511_v18 = vpop.f32.mrf.mxu2  ;;  %6352 = vmatmul.msk.bf16.gmra.mxu1 %vm941_vm0, %v10832_v23 }
 0x2ff   : > { %v2582_v50 = vadd.f32 %v8422_v32, %v2511_v18  ;;  %v3224_v35 = vpop.f32.mrf.mxu3  ;;  %v8804_v18 = vadd.s32 4294967295, %v1774_v34 }
 0x300   : > { %v2333_v27 = vsel %vm2285_vm1, %v2330_v33, %v2332_v9  ;;  %v3046_v8 = vsel %vm2998_vm7, %v3043_v43, %v3045_v63  ;;  %v8795_v10 = vadd.f32 %v3224_v35, %v2778_v42 }
 0x301   : > { %v3118_v23 = vsel %vm2892_vm12, %v3046_v8, 0.0  ;;  %v2779_v49 = vadd.f32 %v2708_v21, %v2582_v50  ;;  %v8810_v33 = vsel %vm2116_vm9, %v2333_v27, 0.0  ;;  %v8814_v40 = vsel %vm2890_vm8, %v3046_v8, 0.0 }
 0x302   : > { %v3138_v47 = vpack.c.bf16 %v3118_v23, %v8800_v29  ;;  %10835 = vst [vmem:[#allocation150_spill] sm:$0xff] %v8814_v40  ;;  %v8820_v21 = vsel %vm2114_vm6, %v2333_v27, 0.0  ;;  %v8824_v34 = vsel %vm2888_vm5, %v3046_v8, 0.0  ;;  %vm2118_vm13 = vcmp.ge.s32.totalorder %v8804_v18, 0 }
 0x303   : > { %v1510_v42 = vpop.f32.mrf.mxu1  ;;  %10836 = vst [vmem:[#allocation151_spill] sm:$0xff] %v8820_v21  ;;  %v1781_v40 = vand.u32 15, %v1595_v20  ;;  %v1596_v50 = vadd.s32 208, %v7327_v24 }
 0x304   : > { %10837 = vst [vmem:[#allocation152_spill] sm:$0xff] %v8824_v34  ;;  %v1560_v51 = vadd.f32 %v1510_v42, %v1274_v45  ;;  %6344 = vmatmul.msk.bf16.gmra.mxu3 %vm941_vm0, %v3138_v47 }
 0x305   : > { %v2713_v35 = vpop.f32.mrf.mxu0  ;;  %v1788_v29 = vand.u32 15, %v1596_v50 }
 0x306   : > { %v2334_v23 = vrot.slane %v1560_v51, 7  ;;  %v8831_v43 = vpack.c.bf16 %v1560_v51, %v8781_v5  ;;  %v2513_v7 = vpop.f32.mrf.mxu2  ;;  %v2403_v5 = vsel %vm2118_vm13, %v2333_v27, 0.0 }
 0x307   : > { %v2583_v8 = vadd.f32 %v8422_v32, %v2513_v7  ;;  %v3227_v45 = vpop.f32.mrf.mxu3  ;;  %v8851_v7 = vadd.s32 1, %v1781_v40 }
 0x308   : > { %10838 = vst [vmem:[#allocation153_spill] sm:$0xff] %v8831_v43  ;;  %v8836_v42 = vadd.f32 %v3227_v45, %v2779_v49  ;;  %6329 = vmatmul.msk.bf16.gmra.mxu0 %vm941_vm0, %v8831_v43  ;;  %v8841_v47 = vsel %vm2285_vm1, %v2332_v9, %v2334_v23  ;;  %v3047_v43 = vrot.slane %v1560_v51, 1  ;;  %v1279_v51 = vadd.f32 %v8758_v19, %v8297_v41 }
 0x309   : > { %v2423_v20 = vpack.c.bf16 %v8841_v47, %v2403_v5  ;;  %v2780_v34 = vadd.f32 %v2710_v59, %v2583_v8  ;;  %v10839_v5 = vpack.c.bf16 %v8331_v28, %v8303_v53  ;;  %vm2894_vm15 = vcmp.lt.s32.totalorder %v8851_v7, 16 }
 0x30a   : > { %v8873_v53 = vsel %vm2998_vm7, %v3045_v63, %v3047_v43  ;;  %v1597_v41 = vadd.s32 216, %v7327_v24 }
 0x30b   : > { %v1513_v45 = vpop.f32.mrf.mxu1  ;;  %6314 = vmatmul.msk.bf16.gmra.mxu2 %vm941_vm0, %v2423_v20  ;;  %10840 = vst [vmem:[#allocation154_spill] sm:$0xff] %v8873_v53 }
 0x30c   : > { %v8854_v9 = vadd.f32 %v1513_v45, %v1277_v39 }
 0x30d   : > { %v2715_v27 = vpop.f32.mrf.mxu0 }
 0x30e   : > { %v2336_v25 = vrot.slane %v8854_v9, 7  ;;  %v10633_v59 = vrot.slane %v8854_v9, 1  ;;  %v2516_v8 = vpop.f32.mrf.mxu2  ;;  %6353 = vmatmul.msk.bf16.gmra.mxu1 %vm941_vm0, %v10839_v5 }
 0x30f   : > { %v2584_v40 = vadd.f32 %v8422_v32, %v2516_v8  ;;  %v3229_v20 = vpop.f32.mrf.mxu3  ;;  %v8877_v8 = vadd.s32 4294967295, %v1788_v29 }
 0x310   : > { %v2337_v50 = vsel %vm2285_vm1, %v2334_v23, %v2336_v25  ;;  %v3050_v39 = vsel %vm2998_vm7, %v3047_v43, %v10633_v59  ;;  %v8870_v45 = vadd.f32 %v3229_v20, %v2780_v34 }
 0x311   : > { %v3120_v5 = vsel %vm2894_vm15, %v3050_v39, 0.0  ;;  %v2781_v49 = vadd.f32 %v2713_v35, %v2584_v40  ;;  %v8883_v23 = vsel %vm2118_vm13, %v2337_v50, 0.0  ;;  %v8887_v34 = vsel %vm2892_vm12, %v3050_v39, 0.0 }
 0x312   : > { %v3139_v54 = vpack.c.bf16 %v3120_v5, %v8873_v53  ;;  %10841 = vst [vmem:[#allocation155_spill] sm:$0xff] %v8887_v34  ;;  %v8893_v29 = vsel %vm2116_vm9, %v2337_v50, 0.0  ;;  %v8897_v35 = vsel %vm2890_vm8, %v3050_v39, 0.0  ;;  %vm2120_vm2 = vcmp.ge.s32.totalorder %v8877_v8, 0 }
 0x313   : > { %v1516_v63 = vpop.f32.mrf.mxu1  ;;  %10842 = vst [vmem:[#allocation156_spill] sm:$0xff] %v8893_v29  ;;  %v1795_v34 = vand.u32 15, %v1597_v41  ;;  %v2405_v20 = vsel %vm2120_vm2, %v2337_v50, 0.0 }
 0x314   : > { %10843 = vst [vmem:[#allocation157_spill] sm:$0xff] %v8897_v35  ;;  %v1562_v40 = vadd.f32 %v1516_v63, %v1279_v51  ;;  %6345 = vmatmul.msk.bf16.gmra.mxu3 %vm941_vm0, %v3139_v54  ;;  %v1598_v35 = vadd.s32 224, %v7327_v24 }
 0x315   : > { %v2718_v5 = vpop.f32.mrf.mxu0 }
 0x316   : > { %v2338_v59 = vrot.slane %v1562_v40, 7  ;;  %v8904_v43 = vpack.c.bf16 %v1562_v40, %v8854_v9  ;;  %v2518_v52 = vpop.f32.mrf.mxu2  ;;  %v3051_v50 = vrot.slane %v1562_v40, 1 }
 0x317   : > { %v2585_v39 = vadd.f32 %v8422_v32, %v2518_v52  ;;  %v3232_v51 = vpop.f32.mrf.mxu3  ;;  %v8924_v52 = vadd.s32 1, %v1795_v34  ;;  %v1284_v34 = vadd.f32 %v8758_v19, %v8387_v0  ;;  %v2013_v0 = vld [vmem:[%s10453_s9 + $0xd8] sm:$0xff] }
 0x318   : > { %10844 = vst [vmem:[#allocation158_spill] sm:$0xff] %v8904_v43  ;;  %v8909_v63 = vadd.f32 %v3232_v51, %v2781_v49  ;;  %6330 = vmatmul.msk.bf16.gmra.mxu0 %vm941_vm0, %v8904_v43  ;;  %v8914_v54 = vsel %vm2285_vm1, %v2336_v25, %v2338_v59  ;;  %v1802_v43 = vand.u32 15, %v1598_v35 }
 0x319   : > { %v2424_v41 = vpack.c.bf16 %v8914_v54, %v2405_v20  ;;  %v2782_v53 = vadd.f32 %v2715_v27, %v2585_v39  ;;  %v10845_v39 = vpack.c.bf16 %v8404_v57, %v8367_v31  ;;  %vm2896_vm11 = vcmp.lt.s32.totalorder %v8924_v52, 16  ;;  %v2012_v31 = vld [vmem:[%s10453_s9 + $0xd0] sm:$0xff] }
 0x31a   : > { %v8945_v49 = vadd.s32 4294967295, %v1802_v43 }
 0x31b   : > { %v1519_v51 = vpop.f32.mrf.mxu1  ;;  %6315 = vmatmul.msk.bf16.gmra.mxu2 %vm941_vm0, %v2424_v41 }
 0x31c   : > { %v8927_v25 = vadd.f32 %v1519_v51, %v1282_v12  ;;  %vm2122_vm4 = vcmp.ge.s32.totalorder %v8945_v49, 0 }
 0x31d   : > { %v2720_v21 = vpop.f32.mrf.mxu0 }
 0x31e   : > { %v2340_v37 = vrot.slane %v8927_v25, 7  ;;  %v10642_v27 = vrot.slane %v8927_v25, 1  ;;  %v2521_v20 = vpop.f32.mrf.mxu2  ;;  %6354 = vmatmul.msk.bf16.gmra.mxu1 %vm941_vm0, %v10845_v39 }
 0x31f   : > { %v2586_v12 = vadd.f32 %v8422_v32, %v2521_v20  ;;  %v3234_v35 = vpop.f32.mrf.mxu3  ;;  %v10847_v20 = vrot.slane %v8854_v9, 1 }
 0x320   : > { %v2341_v40 = vsel %vm2285_vm1, %v2338_v59, %v2340_v37  ;;  %v3054_v41 = vsel %vm2998_vm7, %v3051_v50, %v10642_v27  ;;  %v8943_v51 = vadd.f32 %v3234_v35, %v2782_v53  ;;  %v2048_v35 = vpack.c.bf16 %v2012_v31, %v2012_v31 }
 0x321   : > { %v8956_v59 = vsel %vm2998_vm7, %v10847_v20, %v3051_v50  ;;  %v3122_v39 = vsel %vm2896_vm11, %v3054_v41, 0.0  ;;  %v2783_v53 = vadd.f32 %v2718_v5, %v2586_v12  ;;  %v2049_v27 = vpack.c.bf16 %v2013_v0, %v2013_v0 }
 0x322   : > { %10846 = vst [vmem:[#allocation159_spill] sm:$0xff] %v8943_v51  ;;  %v3140_v43 = vpack.c.bf16 %v3122_v39, %v8956_v59  ;;  %v8964_v29 = vsel %vm2120_vm2, %v2341_v40, 0.0  ;;  %v3987_v57 = vunpack.c.l.b16 %v2048_v35  ;;  %v8968_v9 = vsel %vm2894_vm15, %v3054_v41, 0.0 }
 0x323   : > { %10848 = vst [vmem:[#allocation160_spill] sm:$0xff] %v8956_v59  ;;  %v1522_v16 = vpop.f32.mrf.mxu1  ;;  %v8972_v50 = vsel %vm2118_vm13, %v2341_v40, 0.0  ;;  %v8976_v5 = vsel %vm2892_vm12, %v3054_v41, 0.0  ;;  %v3988_v31 = vunpack.c.l.b16 %v2049_v27  ;;  %v1809_v41 = vand.u32 15, %v1599_v48 }
 0x324   : > { %10849 = vst [vmem:[#allocation161_spill] sm:$0xff] %v8968_v9  ;;  %v1564_v12 = vadd.f32 %v1522_v16, %v1284_v34  ;;  %6346 = vmatmul.msk.bf16.gmra.mxu3 %vm941_vm0, %v3140_v43  ;;  %v1600_v27 = vadd.s32 240, %v7327_v24  ;;  %v1287_v43 = vadd.f32 %v8758_v19, %v8424_v15  ;;  %v2407_v48 = vsel %vm2122_vm4, %v2341_v40, 0.0  ;;  %v2010_v40 = vld [vmem:[%s10453_s9 + $0xc0] sm:$0xff] }
 0x325   : > { %10850 = vst [vmem:[#allocation162_spill] sm:$0xff] %v8972_v50  ;;  %v2723_v39 = vpop.f32.mrf.mxu0  ;;  %v3990_v51 = vpack.c.b16 %v3988_v31, %v3987_v57  ;;  %v1601_v9 = vadd.s32 248, %v7327_v24 }
 0x326   : > { %10851 = vst [vmem:[#allocation163_spill] sm:$0xff] %v8976_v5  ;;  %v2342_v18 = vrot.slane %v1564_v12, 7  ;;  %v8985_v35 = vpack.c.bf16 %v1564_v12, %v8927_v25  ;;  %v2523_v36 = vpop.f32.mrf.mxu2 }
 0x327   : > { %v2587_v16 = vadd.f32 %v8422_v32, %v2523_v36  ;;  %v3237_v34 = vpop.f32.mrf.mxu3  ;;  %4047 = vmatpush.bf16.msrb.mxu3 %v3990_v51  ;;  %v3055_v51 = vrot.slane %v1564_v12, 1 }
 0x328   : > { %10852 = vst [vmem:[#allocation164_spill] sm:$0xff] %v8985_v35  ;;  %v8991_v0 = vadd.f32 %v3237_v34, %v2783_v53  ;;  %6331 = vmatmul.msk.bf16.gmra.mxu0 %vm941_vm0, %v8985_v35  ;;  %v8996_v20 = vsel %vm2285_vm1, %v2340_v37, %v2342_v18  ;;  %v9005_v53 = vadd.s32 1, %v1809_v41  ;;  %v1816_v37 = vand.u32 15, %v1600_v27 }
 0x329   : > { %v2425_v57 = vpack.c.bf16 %v8996_v20, %v2407_v48  ;;  %v2784_v31 = vadd.f32 %v2720_v21, %v2587_v16  ;;  %v2011_v21 = vld [vmem:[%s10453_s9 + $0xc8] sm:$0xff]  ;;  %v2046_v48 = vpack.c.bf16 %v2010_v40, %v2010_v40  ;;  %v1289_v41 = vadd.f32 %v8758_v19, %v8478_v4 }
 0x32a   : > { %v2047_v15 = vpack.c.bf16 %v2011_v21, %v2011_v21  ;;  %vm2898_vm5 = vcmp.lt.s32.totalorder %v9005_v53, 16  ;;  %v9026_v40 = vadd.s32 4294967295, %v1816_v37 }
 0x32b   : > { %v1525_v34 = vpop.f32.mrf.mxu1  ;;  %6316 = vmatmul.msk.bf16.gmra.mxu2 %vm941_vm0, %v2425_v57  ;;  %v3985_v21 = vunpack.c.l.b16 %v2046_v48 }
 0x32c   : > { %v9008_v5 = vadd.f32 %v1525_v34, %v1287_v43  ;;  %v10853_v34 = vpack.c.bf16 %v8472_v44, %v8444_v62  ;;  %v3986_v35 = vunpack.c.l.b16 %v2047_v15  ;;  %v10854_v62 = vrot.slane %v8927_v25, 1 }
 0x32d   : > { %v2725_v16 = vpop.f32.mrf.mxu0  ;;  %vm2124_vm6 = vcmp.ge.s32.totalorder %v9026_v40, 0  ;;  %v10893_v40 = vpack.c.bf16 %v8768_v46, %v8732_v11 }
 0x32e   : > { %v2344_v57 = vrot.slane %v9008_v5, 7  ;;  %v3057_v27 = vrot.slane %v9008_v5, 1  ;;  %v2526_v43 = vpop.f32.mrf.mxu2  ;;  %6355 = vmatmul.msk.bf16.gmra.mxu1 %vm941_vm0, %v10853_v34  ;;  %v9036_v34 = vsel %vm2998_vm7, %v10854_v62, %v3055_v51  ;;  %v3989_v44 = vpack.c.b16 %v3986_v35, %v3985_v21 }
 0x32f   : > { %v2588_v12 = vadd.f32 %v8422_v32, %v2526_v43  ;;  %v3239_v36 = vpop.f32.mrf.mxu3  ;;  %v1823_v21 = vand.u32 15, %v1601_v9 }
 0x330   : > { %v2345_v4 = vsel %vm2285_vm1, %v2342_v18, %v2344_v57  ;;  %v3058_v50 = vsel %vm2998_vm7, %v3055_v51, %v3057_v27  ;;  %v9030_v59 = vadd.f32 %v3239_v36, %v2784_v31  ;;  %4048 = vmatpush.bf16.msrb.mxu3 %v3989_v44 }
 0x331   : > { %v3124_v43 = vsel %vm2898_vm5, %v3058_v50, 0.0  ;;  %v2785_v37 = vadd.f32 %v2723_v39, %v2588_v12  ;;  %v9043_v18 = vsel %vm2122_vm4, %v2345_v4, 0.0  ;;  %v9047_v31 = vsel %vm2896_vm11, %v3058_v50, 0.0 }
 0x332   : > { %v3141_v15 = vpack.c.bf16 %v3124_v43, %v9036_v34  ;;  %v9051_v24 = vsel %vm2120_vm2, %v2345_v4, 0.0  ;;  %v9057_v35 = vsel %vm2894_vm15, %v3058_v50, 0.0  ;;  %v1292_v50 = vadd.f32 %v8758_v19, %v8512_v22 }
 0x333   : > { %10855 = vst [vmem:[#allocation165_spill] sm:$0xff] %v9051_v24  ;;  %v1528_v25 = vpop.f32.mrf.mxu1 }
 0x334   : > { %10856 = vst [vmem:[#allocation166_spill] sm:$0xff] %v9057_v35  ;;  %v1566_v36 = vadd.f32 %v1528_v25, %v1289_v41  ;;  %6347 = vmatmul.msk.bf16.gmra.mxu3 %vm941_vm0, %v3141_v15 }
 0x335   : > { %v2728_v48 = vpop.f32.mrf.mxu0 }
 0x336   : > { %v2346_v8 = vrot.slane %v1566_v36, 7  ;;  %v9064_v12 = vpack.c.bf16 %v1566_v36, %v9008_v5  ;;  %v2528_v44 = vpop.f32.mrf.mxu2  ;;  %v2409_v5 = vsel %vm2124_vm6, %v2345_v4, 0.0 }
 0x337   : > { %v2589_v62 = vadd.f32 %v8422_v32, %v2528_v44  ;;  %v3242_v7 = vpop.f32.mrf.mxu3 }
 0x338   : > { %10857 = vst [vmem:[#allocation167_spill] sm:$0xff] %v9064_v12  ;;  %v9069_v41 = vadd.f32 %v3242_v7, %v2785_v37  ;;  %6332 = vmatmul.msk.bf16.gmra.mxu0 %vm941_vm0, %v9064_v12  ;;  %v9074_v43 = vsel %vm2285_vm1, %v2344_v57, %v2346_v8  ;;  %v9083_v37 = vadd.s32 1, %v1823_v21  ;;  %v3059_v7 = vrot.slane %v1566_v36, 1 }
 0x339   : > { %v2426_v15 = vpack.c.bf16 %v9074_v43, %v2409_v5  ;;  %v2786_v9 = vadd.f32 %v2725_v16, %v2589_v62  ;;  %v10859_v62 = vpack.c.bf16 %v8534_v6, %v8500_v58  ;;  %v1294_v21 = vadd.f32 %v8758_v19, %v8549_v13 }
 0x33a   : > { %10858 = vst [vmem:[#allocation168_spill] sm:$0xff] %v9083_v37  ;;  %vm2900_vm8 = vcmp.lt.s32.totalorder %v9083_v37, 16  ;;  %v9104_v22 = vsel %vm2998_vm7, %v3057_v27, %v3059_v7 }
 0x33b   : > { %v1531_v44 = vpop.f32.mrf.mxu1  ;;  %6317 = vmatmul.msk.bf16.gmra.mxu2 %vm941_vm0, %v2426_v15  ;;  %10860 = vst [vmem:[#allocation169_spill] sm:$0xff] %v9104_v22 }
 0x33c   : > { %v9086_v57 = vadd.f32 %v1531_v44, %v1292_v50 }
 0x33d   : > { %v2730_v51 = vpop.f32.mrf.mxu0 }
 0x33e   : > { %v10656_v4 = vrot.slane %v9086_v57, 1  ;;  %v3325_v5 = vrot.slane %v9086_v57, 7  ;;  %v2531_v16 = vpop.f32.mrf.mxu2  ;;  %6356 = vmatmul.msk.bf16.gmra.mxu1 %vm941_vm0, %v10859_v62 }
 0x33f   : > { %v2590_v36 = vadd.f32 %v8422_v32, %v2531_v16  ;;  %v3244_v50 = vpop.f32.mrf.mxu3  ;;  %v10865_v16 = vpack.c.bf16 %v8115_v2, %v8082_v26  ;;  %v2577_v26 = vadd.f32 %v8422_v32, %v8593_v61 }
 0x340   : > { %v3062_v15 = vsel %vm2998_vm7, %v3059_v7, %v10656_v4  ;;  %v9101_v44 = vadd.f32 %v3244_v50, %v2786_v9  ;;  %v3326_v58 = vsel %vm2285_vm1, %v2346_v8, %v3325_v5 }
 0x341   : > { %v3126_v62 = vsel %vm2900_vm8, %v3062_v15, 0.0  ;;  %v2787_v39 = vadd.f32 %v2728_v48, %v2590_v36  ;;  %v9111_v13 = vsel %vm2124_vm6, %v3326_v58, 0.0  ;;  %v9115_v19 = vsel %vm2898_vm5, %v3062_v15, 0.0 }
 0x342   : > { %10861 = vst [vmem:[#allocation170_spill] sm:$0xff] %v9115_v19  ;;  %v3142_v9 = vpack.c.bf16 %v3126_v62, %v9104_v22  ;;  %v9122_v8 = vsel %vm2122_vm4, %v3326_v58, 0.0  ;;  %v9126_v48 = vsel %vm2896_vm11, %v3062_v15, 0.0 }
 0x343   : > { %10862 = vst [vmem:[#allocation171_spill] sm:$0xff] %v9122_v8  ;;  %v1534_v7 = vpop.f32.mrf.mxu1 }
 0x344   : > { %10863 = vst [vmem:[#allocation172_spill] sm:$0xff] %v9126_v48  ;;  %v9130_v36 = vadd.f32 %v1534_v7, %v1294_v21  ;;  %6348 = vmatmul.msk.bf16.gmra.mxu3 %vm941_vm0, %v3142_v9  ;;  %v10869_v7 = vld [vmem:[#allocation130_spill] sm:$0xff] }
 0x345   : > { %v2733_v50 = vpop.f32.mrf.mxu0  ;;  %v10870_v48 = vld [vmem:[#allocation138_spill] sm:$0xff] }
 0x346   : > { %v10655_v62 = vrot.slane %v9130_v36, 7  ;;  %v9136_v49 = vpack.c.bf16 %v9130_v36, %v9086_v57  ;;  %v2533_v58 = vpop.f32.mrf.mxu2 }
 0x347   : > { %v2591_v52 = vadd.f32 %v8422_v32, %v2533_v58  ;;  %v3247_v15 = vpop.f32.mrf.mxu3 }
 0x348   : > { %10864 = vst [vmem:[#allocation173_spill] sm:$0xff] %v9136_v49  ;;  %v9139_v27 = vadd.f32 %v3247_v15, %v2787_v39  ;;  %6381 = vmatmul.msk.bf16.vlgmr.msrb.gmra.mxu0 %vm941_vm0, %v10865_v16  ;;  %v9148_v21 = vsel %vm2285_vm1, %v3325_v5, %v10655_v62  ;;  %v10866_v16 = vld [vmem:[#allocation137_spill] sm:$0xff]  ;;  %v2774_v62 = vadd.f32 %v10869_v7, %v2577_v26  ;;  %v10872_v49 = vld [vmem:[#allocation95_spill] sm:$0xff] }
 0x349   : > { %v2788_v9 = vadd.f32 %v2730_v51, %v2591_v52  ;;  %v10867_v51 = vld [vmem:[#allocation132_spill] sm:$0xff] }
 0x34a   : > { %v10868_v52 = vpack.c.bf16 %v10866_v16, %v10867_v51  ;;  %v3293_v61 = vadd.f32 %v10870_v48, %v2774_v62  ;;  %v10874_v48 = vld [vmem:[#allocation100_spill] sm:$0xff] }
 0x34b   : > { %v3448_v25 = vpop.f32.mrf.mxu1  ;;  %6365 = vmatmul.msk.bf16.vlgmr.msrb.gmra.mxu2 %vm941_vm0, %v8069_v30 }
 0x34c   : > { %v9159_v2 = vadd.f32 %v3448_v25, %v8598_v60  ;;  %v10871_v25 = vld [vmem:[#allocation97_spill] sm:$0xff] }
 0x34d   : > { %v2735_v39 = vpop.f32.mrf.mxu0  ;;  %v10873_v8 = vpack.c.bf16 %v10871_v25, %v10872_v49  ;;  %v2017_v49 = vld [vmem:[%s10453_s9 + $0xf8] sm:$0xff] }
 0x34e   : > { %v2536_v5 = vpop.f32.mrf.mxu2  ;;  %6357 = vmatmul.msk.bf16.gmra.mxu1 %vm941_vm0, %v10868_v52 }
 0x34f   : > { %v2592_v15 = vadd.f32 %v8422_v32, %v2536_v5  ;;  %v3249_v58 = vpop.f32.mrf.mxu3  ;;  %v9179_v32 = vld [vmem:[%s10454_s10] ss:$0 sm:$0xff]  ;;  %v2053_v5 = vpack.c.bf16 %v2017_v49, %v2017_v49 }
 0x350   : > { %v9167_v4 = vadd.f32 %v3249_v58, %v2788_v9 }
 0x351   : > { %v2789_v30 = vadd.f32 %v2733_v50, %v2592_v15  ;;  %v4169_v25 = vunpack.c.l.b16 %v2053_v5 }
 0x353   : > { %v3450_v35 = vpop.f32.mrf.mxu1 }
 0x354   : > { %v9170_v60 = vadd.f32 %v3450_v35, %v3293_v61  ;;  %6397 = vmatmul.msk.bf16.vlgmr.msrb.gmra.mxu3 %vm941_vm0, %v10873_v8  ;;  %v10875_v35 = vld [vmem:[#allocation98_spill] sm:$0xff]  ;;  %v2016_v8 = vld [vmem:[%s10453_s9 + $0xf0] sm:$0xff]  ;;  %v10877_v61 = vld [vmem:[#allocation96_spill] sm:$0xff] }
 0x355   : > { %v2738_v51 = vpop.f32.mrf.mxu0  ;;  %v10876_v62 = vpack.c.bf16 %v10874_v48, %v10875_v35  ;;  %v2052_v26 = vpack.c.bf16 %v2016_v8, %v2016_v8  ;;  %v2021_v48 = vld [vmem:[%s10453_s9 + $0x118] sm:$0xff] }
 0x356   : > { %v2538_v52 = vpop.f32.mrf.mxu2  ;;  %v2057_v8 = vpack.c.bf16 %v2021_v48, %v2021_v48 }
 0x357   : > { %v2593_v9 = vadd.f32 %v9179_v32, %v2538_v52  ;;  %v3252_v50 = vpop.f32.mrf.mxu3 }
 0x358   : > { %v9182_v7 = vadd.f32 %v3252_v50, %v2789_v30  ;;  %6382 = vmatmul.msk.bf16.gmra.mxu0 %vm941_vm0, %v10876_v62  ;;  %v4168_v30 = vunpack.c.l.b16 %v2052_v26  ;;  %v2020_v50 = vld [vmem:[%s10453_s9 + $0x110] sm:$0xff]  ;;  %v10878_v26 = vpack.c.bf16 %v8688_v1, %v8651_v3  ;;  %v4350_v35 = vunpack.c.l.b16 %v2057_v8  ;;  %v10879_v3 = vld [vmem:[#allocation101_spill] sm:$0xff] }
 0x359   : > { %v2790_v58 = vadd.f32 %v2735_v39, %v2593_v9  ;;  %v2056_v62 = vpack.c.bf16 %v2020_v50, %v2020_v50  ;;  %v10880_v50 = vpack.c.bf16 %v8209_v38, %v10879_v3 }
 0x35a   : > { %v4171_v9 = vpack.c.b16 %v4169_v25, %v4168_v30  ;;  %v3697_v30 = vrot.slane %v9130_v36, 1 }
 0x35b   : > { %v3453_v15 = vpop.f32.mrf.mxu1  ;;  %6366 = vmatmul.msk.bf16.gmra.mxu2 %vm941_vm0, %v10877_v61 }
 0x35c   : > { %v9197_v52 = vadd.f32 %v3453_v15, %v8683_v14  ;;  %4180 = vmatpush.bf16.msra.mxu1 %v4171_v9  ;;  %v4349_v15 = vunpack.c.l.b16 %v2056_v62 }
 0x35d   : > { %v2740_v39 = vpop.f32.mrf.mxu0 }
 0x35e   : > { %v2541_v49 = vpop.f32.mrf.mxu2  ;;  %6358 = vmatmul.msk.bf16.gmra.mxu1 %vm941_vm0, %v10878_v26  ;;  %v4352_v19 = vpack.c.b16 %v4350_v35, %v4349_v15  ;;  %v10882_v35 = vld [vmem:[#allocation103_spill] sm:$0xff]  ;;  %v10885_v15 = vrot.slane %v9086_v57, 1 }
 0x35f   : > { %v2594_v14 = vadd.f32 %v9179_v32, %v2541_v49  ;;  %v3254_v5 = vpop.f32.mrf.mxu3  ;;  %v10884_v26 = vld [vmem:[#allocation23_spill] sm:$0xff] }
 0x360   : > { %v9210_v12 = vadd.f32 %v3254_v5, %v2790_v58  ;;  %4409 = vmatpush.bf16.msra.mxu2 %v4352_v19  ;;  %v4655_v19 = vld [vmem:[%s10455_s11 + $0x18] sm:$0xff]  ;;  %v9238_v3 = vsel %vm2998_vm7, %v10885_v15, %v3697_v30 }
 0x361   : > { %v2791_v22 = vadd.f32 %v2738_v51, %v2594_v14  ;;  %v4654_v51 = vld [vmem:[%s10455_s11 + $0x10] sm:$0xff]  ;;  %v4691_v49 = vpack.c.bf16 %v4655_v19, %v4655_v19  ;;  %v3699_v14 = vsel %vm2998_vm7, %v3697_v30, %v10884_v26  ;;  %10886 = vst [vmem:[#allocation137_spill] sm:$0xff] %v9238_v3  ;;  %v10891_v30 = vld [vmem:[#allocation102_spill] sm:$0xff] }
 0x362   : > { %v4690_v8 = vpack.c.bf16 %v4654_v51, %v4654_v51 }
 0x363   : > { %v3455_v24 = vpop.f32.mrf.mxu1  ;;  %v4823_v19 = vunpack.c.l.b16 %v4691_v49 }
 0x364   : > { %v9214_v25 = vadd.f32 %v3455_v24, %v8717_v55  ;;  %6398 = vmatmul.msk.bf16.gmra.mxu3 %vm941_vm0, %v10880_v50  ;;  %v10881_v24 = vld [vmem:[#allocation104_spill] sm:$0xff]  ;;  %v10888_v50 = vld [vmem:[#allocation21_spill] sm:$0xff]  ;;  %v4822_v51 = vunpack.c.l.b16 %v4690_v8 }
 0x365   : > { %v2743_v48 = vpop.f32.mrf.mxu0  ;;  %v10883_v38 = vpack.c.bf16 %v10881_v24, %v10882_v35 }
 0x366   : > { %v2543_v9 = vpop.f32.mrf.mxu2 }
 0x367   : > { %v2595_v62 = vadd.f32 %v9179_v32, %v2543_v9  ;;  %v3257_v58 = vpop.f32.mrf.mxu3  ;;  %v10889_v9 = vrot.slane %v9130_v36, 7  ;;  %v9261_v36 = vsel %vm2898_vm5, %v3699_v14, 0.0 }
 0x368   : > { %v9227_v55 = vadd.f32 %v3257_v58, %v2791_v22  ;;  %6383 = vmatmul.msk.bf16.gmra.mxu0 %vm941_vm0, %v10883_v38  ;;  %v9242_v22 = vsel %vm2900_vm8, %v3699_v14, 0.0  ;;  %v4825_v38 = vpack.c.b16 %v4823_v19, %v4822_v51  ;;  %10892 = vst [vmem:[#allocation138_spill] sm:$0xff] %v9261_v36  ;;  %v10894_v19 = vld [vmem:[#allocation105_spill] sm:$0xff]  ;;  %v10909_v36 = vld [vmem:[#allocation118_spill] sm:$0xff] }
 0x369   : > { %v2792_v5 = vadd.f32 %v2740_v39, %v2595_v62  ;;  %10887 = vst [vmem:[#allocation132_spill] sm:$0xff] %v9242_v22  ;;  %v3931_v58 = vsel %vm2285_vm1, %v10889_v9, %v10888_v50  ;;  %v10924_v22 = vld [vmem:[#allocation123_spill] sm:$0xff] }
 0x36a   : > { %v9252_v57 = vsel %vm2124_vm6, %v3931_v58, 0.0  ;;  %4846 = vmatpush.bf16.msra.mxu0 %v4825_v38 }
 0x36b   : > { %10890 = vst [vmem:[#allocation130_spill] sm:$0xff] %v9252_v57  ;;  %v3458_v39 = vpop.f32.mrf.mxu1  ;;  %6367 = vmatmul.msk.bf16.gmra.mxu2 %vm941_vm0, %v10891_v30 }
 0x36c   : > { %v9257_v62 = vadd.f32 %v3458_v39, %v8763_v17  ;;  %v10895_v39 = vpack.c.bf16 %v8271_v56, %v10894_v19 }
 0x36d   : > { %v2745_v8 = vpop.f32.mrf.mxu0 }
 0x36e   : > { %v2546_v15 = vpop.f32.mrf.mxu2  ;;  %6359 = vmatmul.msk.bf16.gmra.mxu1 %vm941_vm0, %v10893_v40 }
 0x36f   : > { %v2596_v9 = vadd.f32 %v9179_v32, %v2546_v15  ;;  %v3259_v17 = vpop.f32.mrf.mxu3  ;;  %v10896_v15 = vld [vmem:[#allocation109_spill] sm:$0xff] }
 0x370   : > { %v9270_v58 = vadd.f32 %v3259_v17, %v2792_v5  ;;  %v10897_v5 = vld [vmem:[#allocation108_spill] sm:$0xff] }
 0x371   : > { %v2793_v51 = vadd.f32 %v2743_v48, %v2596_v9  ;;  %v10898_v17 = vpack.c.bf16 %v10896_v15, %v10897_v5  ;;  %v10899_v9 = vld [vmem:[#allocation107_spill] sm:$0xff] }
 0x373   : > { %v3460_v53 = vpop.f32.mrf.mxu1 }
 0x374   : > { %v9273_v14 = vadd.f32 %v3460_v53, %v8795_v10  ;;  %6399 = vmatmul.msk.bf16.gmra.mxu3 %vm941_vm0, %v10895_v39  ;;  %v10900_v39 = vpack.c.bf16 %v8841_v47, %v8810_v33 }
 0x375   : > { %v2748_v49 = vpop.f32.mrf.mxu0 }
 0x376   : > { %v2548_v11 = vpop.f32.mrf.mxu2 }
 0x377   : > { %v2597_v40 = vadd.f32 %v9179_v32, %v2548_v11  ;;  %v3262_v38 = vpop.f32.mrf.mxu3 }
 0x378   : > { %v9280_v24 = vadd.f32 %v3262_v38, %v2793_v51  ;;  %6384 = vmatmul.msk.bf16.gmra.mxu0 %vm941_vm0, %v10898_v17 }
 0x379   : > { %v2794_v48 = vadd.f32 %v2745_v8, %v2597_v40 }
 0x37b   : > { %v3463_v10 = vpop.f32.mrf.mxu1  ;;  %6368 = vmatmul.msk.bf16.gmra.mxu2 %vm941_vm0, %v10899_v9 }
 0x37c   : > { %v9289_v56 = vadd.f32 %v3463_v10, %v8836_v42  ;;  %v10901_v42 = vld [vmem:[#allocation110_spill] sm:$0xff] }
 0x37d   : > { %v2750_v53 = vpop.f32.mrf.mxu0  ;;  %v10902_v17 = vpack.c.bf16 %v8331_v28, %v10901_v42 }
 0x37e   : > { %v2551_v19 = vpop.f32.mrf.mxu2  ;;  %6360 = vmatmul.msk.bf16.gmra.mxu1 %vm941_vm0, %v10900_v39 }
 0x37f   : > { %v2598_v51 = vadd.f32 %v9179_v32, %v2551_v19  ;;  %v3264_v11 = vpop.f32.mrf.mxu3  ;;  %v10903_v19 = vld [vmem:[#allocation114_spill] sm:$0xff] }
 0x380   : > { %v9296_v38 = vadd.f32 %v3264_v11, %v2794_v48  ;;  %v10904_v48 = vld [vmem:[#allocation113_spill] sm:$0xff] }
 0x381   : > { %v2795_v8 = vadd.f32 %v2748_v49, %v2598_v51  ;;  %v10905_v11 = vpack.c.bf16 %v10903_v19, %v10904_v48  ;;  %v10906_v51 = vld [vmem:[#allocation112_spill] sm:$0xff]  ;;  %v10908_v19 = vld [vmem:[#allocation159_spill] sm:$0xff] }
 0x383   : > { %v3465_v40 = vpop.f32.mrf.mxu1 }
 0x384   : > { %v9299_v15 = vadd.f32 %v3465_v40, %v8870_v45  ;;  %6400 = vmatmul.msk.bf16.gmra.mxu3 %vm941_vm0, %v10902_v17 }
 0x385   : > { %v2753_v10 = vpop.f32.mrf.mxu0 }
 0x386   : > { %v2553_v37 = vpop.f32.mrf.mxu2 }
 0x387   : > { %v2599_v33 = vadd.f32 %v9179_v32, %v2553_v37  ;;  %v3267_v39 = vpop.f32.mrf.mxu3  ;;  %v10907_v37 = vpack.c.bf16 %v8914_v54, %v8883_v23 }
 0x388   : > { %v9306_v26 = vadd.f32 %v3267_v39, %v2795_v8  ;;  %6385 = vmatmul.msk.bf16.gmra.mxu0 %vm941_vm0, %v10905_v11 }
 0x389   : > { %v2796_v49 = vadd.f32 %v2750_v53, %v2599_v33 }
 0x38b   : > { %v3468_v45 = vpop.f32.mrf.mxu1  ;;  %6369 = vmatmul.msk.bf16.gmra.mxu2 %vm941_vm0, %v10906_v51 }
 0x38c   : > { %v9315_v28 = vadd.f32 %v3468_v45, %v8909_v63  ;;  %v10910_v63 = vld [vmem:[#allocation115_spill] sm:$0xff] }
 0x38d   : > { %v2755_v40 = vpop.f32.mrf.mxu0  ;;  %v10911_v45 = vpack.c.bf16 %v10909_v36, %v10910_v63 }
 0x38e   : > { %v2556_v42 = vpop.f32.mrf.mxu2  ;;  %6361 = vmatmul.msk.bf16.gmra.mxu1 %vm941_vm0, %v10907_v37 }
 0x38f   : > { %v2600_v8 = vadd.f32 %v9179_v32, %v2556_v42  ;;  %v3269_v17 = vpop.f32.mrf.mxu3  ;;  %v10912_v42 = vld [vmem:[#allocation120_spill] sm:$0xff] }
 0x390   : > { %v9322_v39 = vadd.f32 %v3269_v17, %v2796_v49  ;;  %v10913_v49 = vld [vmem:[#allocation119_spill] sm:$0xff] }
 0x391   : > { %v2797_v53 = vadd.f32 %v2753_v10, %v2600_v8  ;;  %v10914_v17 = vpack.c.bf16 %v10912_v42, %v10913_v49 }
 0x393   : > { %v3470_v33 = vpop.f32.mrf.mxu1 }
 0x394   : > { %v9325_v11 = vadd.f32 %v3470_v33, %v10908_v19  ;;  %6401 = vmatmul.msk.bf16.gmra.mxu3 %vm941_vm0, %v10911_v45  ;;  %v10915_v33 = vld [vmem:[#allocation117_spill] sm:$0xff] }
 0x395   : > { %v2758_v48 = vpop.f32.mrf.mxu0 }
 0x396   : > { %v2558_v5 = vpop.f32.mrf.mxu2 }
 0x397   : > { %v2601_v23 = vadd.f32 %v9179_v32, %v2558_v5  ;;  %v3272_v37 = vpop.f32.mrf.mxu3  ;;  %v10916_v5 = vpack.c.bf16 %v8996_v20, %v8964_v29  ;;  %v2014_v29 = vld [vmem:[%s10453_s9 + $0xe0] sm:$0xff] }
 0x398   : > { %v9332_v35 = vadd.f32 %v3272_v37, %v2797_v53  ;;  %6386 = vmatmul.msk.bf16.gmra.mxu0 %vm941_vm0, %v10914_v17  ;;  %v10918_v17 = vld [vmem:[#allocation124_spill] sm:$0xff] }
 0x399   : > { %v2798_v10 = vadd.f32 %v2755_v40, %v2601_v23 }
 0x39b   : > { %v3473_v8 = vpop.f32.mrf.mxu1  ;;  %6370 = vmatmul.msk.bf16.gmra.mxu2 %vm941_vm0, %v10915_v33 }
 0x39c   : > { %v9341_v36 = vadd.f32 %v3473_v8, %v8991_v0  ;;  %v10919_v0 = vld [vmem:[#allocation121_spill] sm:$0xff] }
 0x39d   : > { %v2760_v19 = vpop.f32.mrf.mxu0  ;;  %v10920_v8 = vpack.c.bf16 %v10918_v17, %v10919_v0 }
 0x39e   : > { %v2561_v63 = vpop.f32.mrf.mxu2  ;;  %6362 = vmatmul.msk.bf16.gmra.mxu1 %vm941_vm0, %v10916_v5 }
 0x39f   : > { %v2602_v53 = vadd.f32 %v9179_v32, %v2561_v63  ;;  %v3274_v45 = vpop.f32.mrf.mxu3 }
 0x3a0   : > { %v9348_v37 = vadd.f32 %v3274_v45, %v2798_v10  ;;  %v2015_v10 = vld [vmem:[%s10453_s9 + $0xe8] sm:$0xff] }
 0x3a1   : > { %v2799_v40 = vadd.f32 %v2758_v48, %v2602_v53  ;;  %v2051_v5 = vpack.c.bf16 %v2015_v10, %v2015_v10  ;;  %v10921_v45 = vld [vmem:[#allocation126_spill] sm:$0xff]  ;;  %v10925_v10 = vpack.c.bf16 %v9074_v43, %v9043_v18 }
 0x3a3   : > { %v3475_v23 = vpop.f32.mrf.mxu1  ;;  %v4167_v50 = vunpack.c.l.b16 %v2051_v5 }
 0x3a4   : > { %v9351_v42 = vadd.f32 %v3475_v23, %v9030_v59  ;;  %6402 = vmatmul.msk.bf16.gmra.mxu3 %vm941_vm0, %v10920_v8  ;;  %v2050_v59 = vpack.c.bf16 %v2014_v29, %v2014_v29  ;;  %v10922_v23 = vld [vmem:[#allocation125_spill] sm:$0xff] }
 0x3a5   : > { %v2763_v49 = vpop.f32.mrf.mxu0  ;;  %v10923_v17 = vpack.c.bf16 %v10921_v45, %v10922_v23 }
 0x3a6   : > { %10917 = vst [vmem:[#allocation97_spill] sm:$0xff] %v9351_v42  ;;  %v2563_v57 = vpop.f32.mrf.mxu2  ;;  %v4166_v8 = vunpack.c.l.b16 %v2050_v59 }
 0x3a7   : > { %v2603_v48 = vadd.f32 %v9179_v32, %v2563_v57  ;;  %v3277_v63 = vpop.f32.mrf.mxu3 }
 0x3a8   : > { %v9364_v53 = vadd.f32 %v3277_v63, %v2799_v40  ;;  %6387 = vmatmul.msk.bf16.gmra.mxu0 %vm941_vm0, %v10923_v17  ;;  %v4170_v42 = vpack.c.b16 %v4167_v50, %v4166_v8 }
 0x3a9   : > { %v2800_v0 = vadd.f32 %v2760_v19, %v2603_v48 }
 0x3aa   : > { %4181 = vmatpush.bf16.msra.mxu1 %v4170_v42 }
 0x3ab   : > { %v3478_v3 = vpop.f32.mrf.mxu1  ;;  %6371 = vmatmul.msk.bf16.gmra.mxu2 %vm941_vm0, %v10924_v22 }
 0x3ac   : > { %v9373_v57 = vadd.f32 %v3478_v3, %v9069_v41  ;;  %v10926_v41 = vld [vmem:[#allocation127_spill] sm:$0xff] }
 0x3ad   : > { %v2765_v29 = vpop.f32.mrf.mxu0  ;;  %v10927_v3 = vpack.c.bf16 %v8534_v6, %v10926_v41  ;;  %v10932_v41 = vpack.c.bf16 %v9148_v21, %v9111_v13 }
 0x3ae   : > { %v2566_v40 = vpop.f32.mrf.mxu2  ;;  %6363 = vmatmul.msk.bf16.gmra.mxu1 %vm941_vm0, %v10925_v10 }
 0x3af   : > { %v2604_v19 = vadd.f32 %v9179_v32, %v2566_v40  ;;  %v3279_v48 = vpop.f32.mrf.mxu3  ;;  %v10928_v40 = vld [vmem:[#allocation133_spill] sm:$0xff] }
 0x3b0   : > { %v9380_v63 = vadd.f32 %v3279_v48, %v2800_v0  ;;  %v10929_v0 = vld [vmem:[#allocation131_spill] sm:$0xff] }
 0x3b1   : > { %v2801_v59 = vadd.f32 %v2763_v49, %v2604_v19  ;;  %v10930_v10 = vpack.c.bf16 %v10928_v40, %v10929_v0  ;;  %v10931_v19 = vld [vmem:[#allocation129_spill] sm:$0xff] }
 0x3b3   : > { %v3480_v5 = vpop.f32.mrf.mxu1 }
 0x3b4   : > { %v9383_v50 = vadd.f32 %v3480_v5, %v9101_v44  ;;  %6403 = vmatmul.msk.bf16.gmra.mxu3 %vm941_vm0, %v10927_v3 }
 0x3b5   : > { %v2768_v42 = vpop.f32.mrf.mxu0 }
 0x3b6   : > { %v2568_v45 = vpop.f32.mrf.mxu2 }
 0x3b7   : > { %v2605_v18 = vadd.f32 %v9179_v32, %v2568_v45  ;;  %v3282_v17 = vpop.f32.mrf.mxu3 }
 0x3b8   : > { %v9390_v8 = vadd.f32 %v3282_v17, %v2801_v59  ;;  %6388 = vmatmul.msk.bf16.gmra.mxu0 %vm941_vm0, %v10930_v10 }
 0x3b9   : > { %v2802_v49 = vadd.f32 %v2765_v29, %v2605_v18 }
 0x3bb   : > { %v3483_v44 = vpop.f32.mrf.mxu1  ;;  %6372 = vmatmul.msk.bf16.gmra.mxu2 %vm941_vm0, %v10931_v19 }
 0x3bc   : > { %v9399_v6 = vadd.f32 %v3483_v44, %v9139_v27  ;;  %v10933_v27 = vld [vmem:[#allocation134_spill] sm:$0xff] }
 0x3bd   : > { %v2770_v48 = vpop.f32.mrf.mxu0  ;;  %v10934_v40 = vpack.c.bf16 %v10866_v16, %v10933_v27 }
 0x3be   : > { %v2571_v5 = vpop.f32.mrf.mxu2  ;;  %6364 = vmatmul.msk.bf16.gmra.mxu1 %vm941_vm0, %v10932_v41 }
 0x3bf   : > { %v2606_v59 = vadd.f32 %v9179_v32, %v2571_v5  ;;  %v3284_v3 = vpop.f32.mrf.mxu3  ;;  %v10935_v5 = vld [vmem:[#allocation140_spill] sm:$0xff] }
 0x3c0   : > { %v9406_v45 = vadd.f32 %v3284_v3, %v2802_v49  ;;  %v10936_v49 = vld [vmem:[#allocation139_spill] sm:$0xff] }
 0x3c1   : > { %v2803_v29 = vadd.f32 %v2768_v42, %v2606_v59  ;;  %v10937_v3 = vpack.c.bf16 %v10935_v5, %v10936_v49  ;;  %v10938_v59 = vld [vmem:[#allocation136_spill] sm:$0xff] }
 0x3c3   : > { %v3485_v18 = vpop.f32.mrf.mxu1 }
 0x3c4   : > { %v9409_v17 = vadd.f32 %v3485_v18, %v9167_v4  ;;  %6404 = vmatmul.msk.bf16.gmra.mxu3 %vm941_vm0, %v10934_v40 }
 0x3c5   : > { %v3819_v10 = vpop.f32.mrf.mxu0 }
 0x3c6   : > { %v2573_v44 = vpop.f32.mrf.mxu2 }
 0x3c7   : > { %v2607_v13 = vadd.f32 %v9179_v32, %v2573_v44  ;;  %v3287_v41 = vpop.f32.mrf.mxu3 }
 0x3c8   : > { %v9416_v0 = vadd.f32 %v3287_v41, %v2803_v29  ;;  %6389 = vmatmul.msk.bf16.gmra.mxu0 %vm941_vm0, %v10937_v3 }
 0x3c9   : > { %v2804_v42 = vadd.f32 %v2770_v48, %v2607_v13  ;;  %v10939_v13 = vld [vmem:[#allocation141_spill] sm:$0xff] }
 0x3ca   : > { %v10940_v5 = vpack.c.bf16 %v8688_v1, %v10939_v13 }
 0x3cb   : > { %v3488_v4 = vpop.f32.mrf.mxu1  ;;  %6373 = vmatmul.msk.bf16.gmra.mxu2 %vm941_vm0, %v10938_v59 }
 0x3cc   : > { %v9425_v16 = vadd.f32 %v3488_v4, %v9182_v7 }
 0x3cd   : > { %v3821_v18 = vpop.f32.mrf.mxu0 }
 0x3ce   : > { %v3585_v27 = vpop.f32.mrf.mxu2  ;;  %6413 = vmatmul.msk.bf16.vlgmr.msra.gmra.mxu1 %vm941_vm0, %v10877_v61 }
 0x3cf   : > { %v3665_v32 = vadd.f32 %v3585_v27, %v9159_v2  ;;  %v3289_v29 = vpop.f32.mrf.mxu3  ;;  %v10941_v2 = vld [vmem:[#allocation145_spill] sm:$0xff] }
 0x3d0   : > { %v9430_v40 = vadd.f32 %v3289_v29, %v2804_v42  ;;  %v10942_v42 = vld [vmem:[#allocation144_spill] sm:$0xff]  ;;  %v2019_v29 = vld [vmem:[%s10453_s9 + $0x108] sm:$0xff] }
 0x3d1   : > { %v3899_v44 = vadd.f32 %v3819_v10, %v3665_v32  ;;  %v10943_v27 = vpack.c.bf16 %v10941_v2, %v10942_v42  ;;  %v10944_v32 = vld [vmem:[#allocation143_spill] sm:$0xff]  ;;  %v2055_v13 = vpack.c.bf16 %v2019_v29, %v2019_v29 }
 0x3d3   : > { %v3490_v41 = vpop.f32.mrf.mxu1 }
 0x3d4   : > { %v9433_v48 = vadd.f32 %v3490_v41, %v9210_v12  ;;  %6405 = vmatmul.msk.bf16.gmra.mxu3 %vm941_vm0, %v10940_v5 }
 0x3d5   : > { %v3824_v7 = vpop.f32.mrf.mxu0 }
 0x3d6   : > { %v3587_v3 = vpop.f32.mrf.mxu2 }
 0x3d7   : > { %v3666_v4 = vadd.f32 %v3587_v3, %v9170_v60  ;;  %v4050_v61 = vpop.f32.mrf.mxu3  ;;  %v2018_v60 = vld [vmem:[%s10453_s9 + $0x100] sm:$0xff] }
 0x3d8   : > { %v9440_v49 = vadd.f32 %v4050_v61, %v3899_v44  ;;  %6390 = vmatmul.msk.bf16.gmra.mxu0 %vm941_vm0, %v10943_v27  ;;  %v2054_v41 = vpack.c.bf16 %v2018_v60, %v2018_v60  ;;  %v10945_v60 = vld [vmem:[#allocation146_spill] sm:$0xff] }
 0x3d9   : > { %v3900_v10 = vadd.f32 %v3821_v18, %v3666_v4  ;;  %v4348_v4 = vunpack.c.l.b16 %v2055_v13  ;;  %v10946_v29 = vpack.c.bf16 %v8768_v46, %v10945_v60  ;;  %v10947_v13 = vld [vmem:[#allocation150_spill] sm:$0xff] }
 0x3db   : > { %v3493_v12 = vpop.f32.mrf.mxu1  ;;  %6374 = vmatmul.msk.bf16.gmra.mxu2 %vm941_vm0, %v10944_v32 }
 0x3dc   : > { %v9449_v1 = vadd.f32 %v3493_v12, %v9227_v55  ;;  %v4347_v55 = vunpack.c.l.b16 %v2054_v41 }
 0x3dd   : > { %v3826_v44 = vpop.f32.mrf.mxu0 }
 0x3de   : > { %v3590_v5 = vpop.f32.mrf.mxu2  ;;  %6414 = vmatmul.msk.bf16.gmra.mxu1 %vm941_vm0, %v10891_v30  ;;  %v4351_v27 = vpack.c.b16 %v4348_v4, %v4347_v55 }
 0x3df   : > { %v3667_v18 = vadd.f32 %v3590_v5, %v9197_v52  ;;  %v4052_v3 = vpop.f32.mrf.mxu3  ;;  %v10948_v5 = vld [vmem:[#allocation149_spill] sm:$0xff] }
 0x3e0   : > { %v9460_v61 = vadd.f32 %v4052_v3, %v3900_v10  ;;  %4410 = vmatpush.bf16.msra.mxu2 %v4351_v27  ;;  %v4653_v10 = vld [vmem:[%s10455_s11 + $0x8] sm:$0xff]  ;;  %v10949_v46 = vpack.c.bf16 %v10947_v13, %v10948_v5  ;;  %v10950_v27 = vld [vmem:[#allocation148_spill] sm:$0xff] }
 0x3e1   : > { %v3901_v2 = vadd.f32 %v3824_v7, %v3667_v18  ;;  %v4652_v7 = vld [vmem:[%s10455_s11] sm:$0xff]  ;;  %v4689_v3 = vpack.c.bf16 %v4653_v10, %v4653_v10 }
 0x3e2   : > { %v4688_v18 = vpack.c.bf16 %v4652_v7, %v4652_v7 }
 0x3e3   : > { %v3495_v12 = vpop.f32.mrf.mxu1 }
 0x3e4   : > { %v9463_v42 = vadd.f32 %v3495_v12, %v9270_v58  ;;  %6406 = vmatmul.msk.bf16.gmra.mxu3 %vm941_vm0, %v10946_v29 }
 0x3e5   : > { %v3829_v30 = vpop.f32.mrf.mxu0 }
 0x3e6   : > { %v3592_v23 = vpop.f32.mrf.mxu2 }
 0x3e7   : > { %v3668_v52 = vadd.f32 %v3592_v23, %v9214_v25  ;;  %v4055_v41 = vpop.f32.mrf.mxu3  ;;  %v4820_v25 = vunpack.c.l.b16 %v4688_v18  ;;  %v4821_v23 = vunpack.c.l.b16 %v4689_v3 }
 0x3e8   : > { %v9476_v58 = vadd.f32 %v4055_v41, %v3901_v2  ;;  %6391 = vmatmul.msk.bf16.gmra.mxu0 %vm941_vm0, %v10949_v46 }
 0x3e9   : > { %v3902_v55 = vadd.f32 %v3826_v44, %v3668_v52  ;;  %v4824_v60 = vpack.c.b16 %v4821_v23, %v4820_v25 }
 0x3eb   : > { %v3498_v4 = vpop.f32.mrf.mxu1  ;;  %6375 = vmatmul.msk.bf16.gmra.mxu2 %vm941_vm0, %v10950_v27  ;;  %4847 = vmatpush.bf16.msra.mxu0 %v4824_v60  ;;  %v10956_v60 = vld [vmem:[#allocation153_spill] sm:$0xff] }
 0x3ec   : > { %v9485_v12 = vadd.f32 %v3498_v4, %v9280_v24  ;;  %v10951_v24 = vld [vmem:[#allocation151_spill] sm:$0xff] }
 0x3ed   : > { %v3831_v2 = vpop.f32.mrf.mxu0  ;;  %v10952_v46 = vpack.c.bf16 %v8841_v47, %v10951_v24 }
 0x3ee   : > { %v3595_v29 = vpop.f32.mrf.mxu2  ;;  %6415 = vmatmul.msk.bf16.gmra.mxu1 %vm941_vm0, %v10899_v9 }
 0x3ef   : > { %v3669_v41 = vadd.f32 %v3595_v29, %v9257_v62  ;;  %v4057_v7 = vpop.f32.mrf.mxu3  ;;  %v10953_v62 = vld [vmem:[#allocation155_spill] sm:$0xff] }
 0x3f0   : > { %v9490_v44 = vadd.f32 %v4057_v7, %v3902_v55  ;;  %v10954_v55 = vld [vmem:[#allocation154_spill] sm:$0xff] }
 0x3f1   : > { %v3903_v52 = vadd.f32 %v3829_v30, %v3669_v41  ;;  %v10955_v4 = vpack.c.bf16 %v10953_v62, %v10954_v55 }
 0x3f3   : > { %v3500_v10 = vpop.f32.mrf.mxu1 }
 0x3f4   : > { %v9493_v13 = vadd.f32 %v3500_v10, %v9296_v38  ;;  %6407 = vmatmul.msk.bf16.gmra.mxu3 %vm941_vm0, %v10952_v46  ;;  %v10957_v46 = vld [vmem:[#allocation156_spill] sm:$0xff] }
 0x3f5   : > { %v3834_v18 = vpop.f32.mrf.mxu0 }
 0x3f6   : > { %v3597_v3 = vpop.f32.mrf.mxu2 }
 0x3f7   : > { %v3670_v9 = vadd.f32 %v3597_v3, %v9273_v14  ;;  %v4060_v25 = vpop.f32.mrf.mxu3  ;;  %v10958_v3 = vpack.c.bf16 %v8914_v54, %v10957_v46 }
 0x3f8   : > { %v9500_v23 = vadd.f32 %v4060_v25, %v3903_v52  ;;  %6392 = vmatmul.msk.bf16.gmra.mxu0 %vm941_vm0, %v10955_v4  ;;  %v10960_v4 = vld [vmem:[#allocation160_spill] sm:$0xff] }
 0x3f9   : > { %v3904_v30 = vadd.f32 %v3831_v2, %v3670_v9 }
 0x3fb   : > { %v3503_v38 = vpop.f32.mrf.mxu1  ;;  %6376 = vmatmul.msk.bf16.gmra.mxu2 %vm941_vm0, %v10956_v60 }
 0x3fc   : > { %v9509_v47 = vadd.f32 %v3503_v38, %v9306_v26  ;;  %v10962_v38 = vld [vmem:[#allocation158_spill] sm:$0xff] }
 0x3fd   : > { %v3836_v29 = vpop.f32.mrf.mxu0 }
 0x3fe   : > { %v3600_v41 = vpop.f32.mrf.mxu2  ;;  %6416 = vmatmul.msk.bf16.gmra.mxu1 %vm941_vm0, %v10906_v51 }
 0x3ff   : > { %v3671_v14 = vadd.f32 %v3600_v41, %v9289_v56  ;;  %v4062_v7 = vpop.f32.mrf.mxu3  ;;  %v10959_v56 = vld [vmem:[#allocation161_spill] sm:$0xff] }
 0x400   : > { %v9514_v52 = vadd.f32 %v4062_v7, %v3904_v30  ;;  %v10961_v30 = vpack.c.bf16 %v10959_v56, %v10960_v4 }
 0x401   : > { %v3905_v10 = vadd.f32 %v3834_v18, %v3671_v14 }
 0x403   : > { %v3505_v24 = vpop.f32.mrf.mxu1 }
 0x404   : > { %v9517_v2 = vadd.f32 %v3505_v24, %v9322_v39  ;;  %6408 = vmatmul.msk.bf16.gmra.mxu3 %vm941_vm0, %v10958_v3  ;;  %v10963_v3 = vld [vmem:[#allocation162_spill] sm:$0xff] }
 0x405   : > { %v3839_v26 = vpop.f32.mrf.mxu0 }
 0x406   : > { %v3602_v9 = vpop.f32.mrf.mxu2 }
 0x407   : > { %v3672_v25 = vadd.f32 %v3602_v9, %v9299_v15  ;;  %v4065_v51 = vpop.f32.mrf.mxu3  ;;  %v10964_v9 = vpack.c.bf16 %v8996_v20, %v10963_v3 }
 0x408   : > { %v9524_v62 = vadd.f32 %v4065_v51, %v3905_v10  ;;  %6393 = vmatmul.msk.bf16.gmra.mxu0 %vm941_vm0, %v10961_v30  ;;  %v10966_v30 = vld [vmem:[#allocation164_spill] sm:$0xff] }
 0x409   : > { %v3906_v18 = vadd.f32 %v3836_v29, %v3672_v25 }
 0x40b   : > { %v3508_v39 = vpop.f32.mrf.mxu1  ;;  %6377 = vmatmul.msk.bf16.gmra.mxu2 %vm941_vm0, %v10962_v38 }
 0x40c   : > { %v9533_v54 = vadd.f32 %v3508_v39, %v9332_v35 }
 0x40d   : > { %v3841_v41 = vpop.f32.mrf.mxu0 }
 0x40e   : > { %v3605_v14 = vpop.f32.mrf.mxu2  ;;  %6417 = vmatmul.msk.bf16.gmra.mxu1 %vm941_vm0, %v10915_v33 }
 0x40f   : > { %v3673_v15 = vadd.f32 %v3605_v14, %v9315_v28  ;;  %v4067_v7 = vpop.f32.mrf.mxu3  ;;  %v10965_v28 = vpack.c.bf16 %v9047_v31, %v9036_v34  ;;  %v4666_v31 = vld [vmem:[%s10455_s11 + $0x70] sm:$0xff] }
 0x410   : > { %v9538_v10 = vadd.f32 %v4067_v7, %v3906_v18 }
 0x411   : > { %v3907_v24 = vadd.f32 %v3839_v26, %v3673_v15 }
 0x413   : > { %v3510_v46 = vpop.f32.mrf.mxu1 }
 0x414   : > { %v9541_v29 = vadd.f32 %v3510_v46, %v9348_v37  ;;  %6409 = vmatmul.msk.bf16.gmra.mxu3 %vm941_vm0, %v10964_v9 }
 0x415   : > { %v3844_v35 = vpop.f32.mrf.mxu0 }
 0x416   : > { %v3607_v25 = vpop.f32.mrf.mxu2 }
 0x417   : > { %v3674_v51 = vadd.f32 %v3607_v25, %v9325_v11  ;;  %v4070_v33 = vpop.f32.mrf.mxu3 }
 0x418   : > { %v9548_v56 = vadd.f32 %v4070_v33, %v3907_v24  ;;  %6394 = vmatmul.msk.bf16.gmra.mxu0 %vm941_vm0, %v10965_v28 }
 0x419   : > { %v3908_v26 = vadd.f32 %v3841_v41, %v3674_v51  ;;  %v4667_v41 = vld [vmem:[%s10455_s11 + $0x78] sm:$0xff] }
 0x41a   : > { %v4703_v7 = vpack.c.bf16 %v4667_v41, %v4667_v41 }
 0x41b   : > { %v3513_v37 = vpop.f32.mrf.mxu1  ;;  %6378 = vmatmul.msk.bf16.gmra.mxu2 %vm941_vm0, %v10966_v30 }
 0x41c   : > { %v9557_v20 = vadd.f32 %v3513_v37, %v9364_v53  ;;  %v4702_v53 = vpack.c.bf16 %v4666_v31, %v4666_v31  ;;  %v5110_v3 = vunpack.c.l.b16 %v4703_v7  ;;  %v4664_v7 = vld [vmem:[%s10455_s11 + $0x60] sm:$0xff] }
 0x41d   : > { %v3846_v18 = vpop.f32.mrf.mxu0 }
 0x41e   : > { %v3610_v39 = vpop.f32.mrf.mxu2  ;;  %6418 = vmatmul.msk.bf16.gmra.mxu1 %vm941_vm0, %v10924_v22  ;;  %v5109_v46 = vunpack.c.l.b16 %v4702_v53  ;;  %v10973_v53 = vld [vmem:[#allocation167_spill] sm:$0xff] }
 0x41f   : > { %v3675_v11 = vadd.f32 %v3610_v39, %v9341_v36  ;;  %v4072_v14 = vpop.f32.mrf.mxu3  ;;  %v10967_v36 = vld [vmem:[#allocation165_spill] sm:$0xff] }
 0x420   : > { %v9568_v15 = vadd.f32 %v4072_v14, %v3908_v26  ;;  %v10968_v25 = vpack.c.bf16 %v9074_v43, %v10967_v36  ;;  %v5112_v51 = vpack.c.b16 %v5110_v3, %v5109_v46  ;;  %v10969_v26 = vld [vmem:[#allocation97_spill] sm:$0xff]  ;;  %v4700_v3 = vpack.c.bf16 %v4664_v7, %v4664_v7 }
 0x421   : > { %v3909_v24 = vadd.f32 %v3844_v35, %v3675_v11  ;;  %v10970_v35 = vld [vmem:[#allocation170_spill] sm:$0xff]  ;;  %v10971_v11 = vld [vmem:[#allocation169_spill] sm:$0xff] }
 0x422   : > { %5133 = vmatpush.bf16.msra.mxu3 %v5112_v51  ;;  %v10972_v31 = vpack.c.bf16 %v10970_v35, %v10971_v11 }
 0x423   : > { %v3515_v9 = vpop.f32.mrf.mxu1 }
 0x424   : > { %v9571_v22 = vadd.f32 %v3515_v9, %v9380_v63  ;;  %6410 = vmatmul.msk.bf16.gmra.mxu3 %vm941_vm0, %v10968_v25 }
 0x425   : > { %v3849_v33 = vpop.f32.mrf.mxu0 }
 0x426   : > { %v3612_v28 = vpop.f32.mrf.mxu2 }
 0x427   : > { %v3676_v37 = vadd.f32 %v3612_v28, %v10969_v26  ;;  %v4075_v39 = vpop.f32.mrf.mxu3 }
 0x428   : > { %v9578_v14 = vadd.f32 %v4075_v39, %v3909_v24  ;;  %6395 = vmatmul.msk.bf16.gmra.mxu0 %vm941_vm0, %v10972_v31  ;;  %v4665_v24 = vld [vmem:[%s10455_s11 + $0x68] sm:$0xff]  ;;  %v10974_v31 = vld [vmem:[#allocation171_spill] sm:$0xff] }
 0x429   : > { %v3910_v63 = vadd.f32 %v3846_v18, %v3676_v37  ;;  %v4701_v9 = vpack.c.bf16 %v4665_v24, %v4665_v24 }
 0x42b   : > { %v3518_v41 = vpop.f32.mrf.mxu1  ;;  %6379 = vmatmul.msk.bf16.gmra.mxu2 %vm941_vm0, %v10973_v53  ;;  %v5108_v51 = vunpack.c.l.b16 %v4701_v9 }
 0x42c   : > { %v9587_v43 = vadd.f32 %v3518_v41, %v9390_v8  ;;  %v5107_v8 = vunpack.c.l.b16 %v4700_v3  ;;  %v10975_v41 = vpack.c.bf16 %v9148_v21, %v10974_v31 }
 0x42d   : > { %v3851_v46 = vpop.f32.mrf.mxu0 }
 0x42e   : > { %v3615_v36 = vpop.f32.mrf.mxu2  ;;  %6419 = vmatmul.msk.bf16.gmra.mxu1 %vm941_vm0, %v10931_v19  ;;  %v5111_v37 = vpack.c.b16 %v5108_v51, %v5107_v8 }
 0x42f   : > { %v3677_v18 = vadd.f32 %v3615_v36, %v9373_v57  ;;  %v4077_v25 = vpop.f32.mrf.mxu3 }
 0x430   : > { %v9598_v28 = vadd.f32 %v4077_v25, %v3910_v63  ;;  %5134 = vmatpush.bf16.msra.mxu3 %v5111_v37  ;;  %v10976_v63 = vld [vmem:[#allocation132_spill] sm:$0xff] }
 0x431   : > { %v3911_v26 = vadd.f32 %v3849_v33, %v3677_v18  ;;  %v10977_v33 = vld [vmem:[#allocation137_spill] sm:$0xff] }
 0x432   : > { %v10978_v9 = vpack.c.bf16 %v10976_v63, %v10977_v33  ;;  %v10979_v18 = vld [vmem:[#allocation173_spill] sm:$0xff]  ;;  %v10987_v33 = vld [vmem:[#allocation98_spill] sm:$0xff] }
 0x433   : > { %v3520_v39 = vpop.f32.mrf.mxu1 }
 0x434   : > { %v9601_v35 = vadd.f32 %v3520_v39, %v9406_v45  ;;  %6411 = vmatmul.msk.bf16.gmra.mxu3 %vm941_vm0, %v10975_v41  ;;  %v10982_v39 = vld [vmem:[#allocation21_spill] sm:$0xff] }
 0x435   : > { %v3854_v19 = vpop.f32.mrf.mxu0  ;;  %v4804_v63 = vsel %vm4736_vm14, %v10982_v39, 0.0 }
 0x436   : > { %v3617_v7 = vpop.f32.mrf.mxu2 }
 0x437   : > { %v3678_v57 = vadd.f32 %v3617_v7, %v9383_v50  ;;  %v4080_v24 = vpop.f32.mrf.mxu3  ;;  %v10983_v7 = vld [vmem:[#allocation130_spill] sm:$0xff] }
 0x438   : > { %v9608_v3 = vadd.f32 %v4080_v24, %v3911_v26  ;;  %6396 = vmatmul.msk.bf16.gmra.mxu0 %vm941_vm0, %v10978_v9  ;;  %v10980_v26 = vld [vmem:[#allocation37_spill] sm:$0xff] }
 0x439   : > { %v3912_v36 = vadd.f32 %v3851_v46, %v3678_v57  ;;  %v10981_v37 = vrot.slane %v10980_v26, 7 }
 0x43b   : > { %v3523_v45 = vpop.f32.mrf.mxu1  ;;  %6380 = vmatmul.msk.bf16.gmra.mxu2 %vm941_vm0, %v10979_v18  ;;  %v4784_v46 = vsel %vm2285_vm1, %v10982_v39, %v10981_v37 }
 0x43c   : > { %v9617_v21 = vadd.f32 %v3523_v45, %v9416_v0  ;;  %v3980_v0 = vpack.c.bf16 %v10982_v39, %v10983_v7  ;;  %v10986_v7 = vld [vmem:[#allocation99_spill] sm:$0xff] }
 0x43d   : > { %v3856_v25 = vpop.f32.mrf.mxu0  ;;  %v10988_v11 = vpack.c.bf16 %v10986_v7, %v10987_v33 }
 0x43e   : > { %v3620_v8 = vpop.f32.mrf.mxu2  ;;  %6420 = vmatmul.msk.bf16.gmra.mxu1 %vm941_vm0, %v10938_v59 }
 0x43f   : > { %v3679_v50 = vadd.f32 %v3620_v8, %v9399_v6  ;;  %v4082_v51 = vpop.f32.mrf.mxu3  ;;  %v4805_v6 = vsel %vm4737_vm3, %v4784_v46, 0.0 }
 0x440   : > { %v9626_v31 = vadd.f32 %v4082_v51, %v3912_v36  ;;  %v4812_v8 = vpack.c.bf16 %v4805_v6, %v4804_v63  ;;  %v10989_v63 = vld [vmem:[#allocation40_spill] sm:$0xff] }
 0x441   : > { %v3913_v41 = vadd.f32 %v3854_v19, %v3679_v50 }
 0x443   : > { %v3525_v57 = vpop.f32.mrf.mxu1 }
 0x444   : > { %v9636_v9 = vadd.f32 %v3525_v57, %v9430_v40  ;;  %6412 = vmatmul.msk.bf16.gmra.mxu3 %vm941_vm0, %v3980_v0 }
 0x445   : > { %v3859_v45 = vpop.f32.mrf.mxu0 }
 0x446   : > { %v3622_v36 = vpop.f32.mrf.mxu2 }
 0x447   : > { %v3680_v19 = vadd.f32 %v3622_v36, %v9409_v17  ;;  %v4085_v50 = vpop.f32.mrf.mxu3 }
 0x448   : > { %v9640_v51 = vadd.f32 %v4085_v50, %v3913_v41  ;;  %6444 = vmatmul.msk.bf16.vlgmr.msra.gmra.mxu0 %vm941_vm0, %v4812_v8 }
 0x449   : > { %v3914_v37 = vadd.f32 %v3856_v25, %v3680_v19  ;;  %v5092_v25 = vsel %vm4737_vm3, %v10989_v63, 0.0 }
 0x44b   : > { %v4183_v39 = vpop.f32.mrf.mxu1  ;;  %6428 = vmatmul.msk.bf16.vlgmr.msra.gmra.mxu2 %vm941_vm0, %v10988_v11  ;;  %v5091_v11 = vsel %vm4736_vm14, %v4784_v46, 0.0  ;;  %v4674_v46 = vld [vmem:[%s10455_s11 + $0xb0] sm:$0xff] }
 0x44c   : > { %v9648_v40 = vadd.f32 %v4183_v39, %v9440_v49  ;;  %v5099_v49 = vpack.c.bf16 %v5092_v25, %v5091_v11  ;;  %v10991_v39 = vld [vmem:[#allocation48_spill] sm:$0xff] }
 0x44d   : > { %v3861_v0 = vpop.f32.mrf.mxu0 }
 0x44e   : > { %v3625_v57 = vpop.f32.mrf.mxu2  ;;  %6421 = vmatmul.msk.bf16.gmra.mxu1 %vm941_vm0, %v10944_v32 }
 0x44f   : > { %v3681_v17 = vadd.f32 %v3625_v57, %v9425_v16  ;;  %v4087_v41 = vpop.f32.mrf.mxu3 }
 0x450   : > { %v9656_v6 = vadd.f32 %v4087_v41, %v3914_v37  ;;  %v10990_v37 = vld [vmem:[#allocation49_spill] sm:$0xff]  ;;  %v10994_v41 = vld [vmem:[#allocation103_spill] sm:$0xff] }
 0x451   : > { %v3915_v33 = vadd.f32 %v3859_v45, %v3681_v17  ;;  %v10992_v7 = vpack.c.bf16 %v10990_v37, %v10991_v39  ;;  %v4710_v45 = vpack.c.bf16 %v4674_v46, %v4674_v46  ;;  %v10993_v17 = vld [vmem:[#allocation106_spill] sm:$0xff] }
 0x452   : > { %v10995_v63 = vpack.c.bf16 %v10993_v17, %v10994_v41 }
 0x453   : > { %v4185_v36 = vpop.f32.mrf.mxu1  ;;  %v5249_v25 = vunpack.c.l.b16 %v4710_v45 }
 0x454   : > { %v9661_v8 = vadd.f32 %v4185_v36, %v9460_v61  ;;  %6456 = vmatmul.msk.bf16.vlgmr.msra.gmra.mxu3 %vm941_vm0, %v5099_v49  ;;  %v4675_v61 = vld [vmem:[%s10455_s11 + $0xb8] sm:$0xff]  ;;  %v4678_v49 = vld [vmem:[%s10455_s11 + $0xd0] sm:$0xff] }
 0x455   : > { %v3864_v32 = vpop.f32.mrf.mxu0  ;;  %v4711_v57 = vpack.c.bf16 %v4675_v61, %v4675_v61  ;;  %v4658_v36 = vld [vmem:[%s10455_s11 + $0x30] sm:$0xff] }
 0x456   : > { %v3627_v16 = vpop.f32.mrf.mxu2  ;;  %v4694_v39 = vpack.c.bf16 %v4658_v36, %v4658_v36 }
 0x457   : > { %v3682_v19 = vadd.f32 %v3627_v16, %v9433_v48  ;;  %v4090_v50 = vpop.f32.mrf.mxu3  ;;  %v5250_v11 = vunpack.c.l.b16 %v4711_v57 }
 0x458   : > { %v9665_v59 = vadd.f32 %v4090_v50, %v3915_v33  ;;  %6445 = vmatmul.msk.bf16.gmra.mxu0 %vm941_vm0, %v10992_v7  ;;  %v4714_v50 = vpack.c.bf16 %v4678_v49, %v4678_v49  ;;  %v4887_v17 = vunpack.c.l.b16 %v4694_v39  ;;  %v10997_v39 = vld [vmem:[#allocation55_spill] sm:$0xff] }
 0x459   : > { %v3916_v24 = vadd.f32 %v3861_v0, %v3682_v19  ;;  %v4679_v0 = vld [vmem:[%s10455_s11 + $0xd8] sm:$0xff]  ;;  %v5252_v19 = vpack.c.b16 %v5250_v11, %v5249_v25  ;;  %v4656_v25 = vld [vmem:[%s10455_s11 + $0x20] sm:$0xff]  ;;  %v4657_v11 = vld [vmem:[%s10455_s11 + $0x28] sm:$0xff] }
 0x45a   : > { %v4715_v37 = vpack.c.bf16 %v4679_v0, %v4679_v0  ;;  %v5324_v57 = vunpack.c.l.b16 %v4714_v50  ;;  %v4692_v0 = vpack.c.bf16 %v4656_v25, %v4656_v25 }
 0x45b   : > { %v4188_v48 = vpop.f32.mrf.mxu1  ;;  %6429 = vmatmul.msk.bf16.gmra.mxu2 %vm941_vm0, %v10995_v63  ;;  %5273 = vmatpush.bf16.msrb.mxu1 %v5252_v19 }
 0x45c   : > { %v9682_v33 = vadd.f32 %v4188_v48, %v9476_v58  ;;  %v4659_v58 = vld [vmem:[%s10455_s11 + $0x38] sm:$0xff]  ;;  %v5325_v48 = vunpack.c.l.b16 %v4715_v37  ;;  %v4885_v50 = vunpack.c.l.b16 %v4692_v0 }
 0x45d   : > { %v3866_v16 = vpop.f32.mrf.mxu0  ;;  %v4695_v46 = vpack.c.bf16 %v4659_v58, %v4659_v58  ;;  %v10996_v58 = vld [vmem:[#allocation56_spill] sm:$0xff] }
 0x45e   : > { %v3630_v7 = vpop.f32.mrf.mxu2  ;;  %6422 = vmatmul.msk.bf16.gmra.mxu1 %vm941_vm0, %v10950_v27  ;;  %v5327_v49 = vpack.c.b16 %v5325_v48, %v5324_v57 }
 0x45f   : > { %v3683_v61 = vadd.f32 %v3630_v7, %v9449_v1  ;;  %v4092_v45 = vpop.f32.mrf.mxu3  ;;  %v4888_v63 = vunpack.c.l.b16 %v4695_v46  ;;  %v4693_v1 = vpack.c.bf16 %v4657_v11, %v4657_v11  ;;  %v10998_v7 = vpack.c.bf16 %v10996_v58, %v10997_v39  ;;  %v4682_v11 = vld [vmem:[%s10455_s11 + $0xf0] sm:$0xff]  ;;  %v4680_v39 = vld [vmem:[%s10455_s11 + $0xe0] sm:$0xff] }
 0x460   : > { %v9699_v41 = vadd.f32 %v4092_v45, %v3916_v24  ;;  %5348 = vmatpush.bf16.msrb.mxu2 %v5327_v49  ;;  %v4683_v49 = vld [vmem:[%s10455_s11 + $0xf8] sm:$0xff]  ;;  %v4718_v0 = vpack.c.bf16 %v4682_v11, %v4682_v11 }
 0x461   : > { %v3917_v27 = vadd.f32 %v3864_v32, %v3683_v61  ;;  %v4890_v36 = vpack.c.b16 %v4888_v63, %v4887_v17  ;;  %v4886_v37 = vunpack.c.l.b16 %v4693_v1  ;;  %v10999_v17 = vld [vmem:[#allocation64_spill] sm:$0xff]  ;;  %v11000_v63 = vld [vmem:[#allocation63_spill] sm:$0xff] }
 0x462   : > { %v11001_v25 = vpack.c.bf16 %v10999_v17, %v11000_v63 }
 0x463   : > { %v4190_v19 = vpop.f32.mrf.mxu1  ;;  %4911 = vmatpush.bf16.msrb.mxu0 %v4890_v36  ;;  %v4889_v45 = vpack.c.b16 %v4886_v37, %v4885_v50  ;;  %v11003_v36 = vld [vmem:[#allocation108_spill] sm:$0xff] }
 0x464   : > { %v9708_v24 = vadd.f32 %v4190_v19, %v9490_v44  ;;  %6457 = vmatmul.msk.bf16.gmra.mxu3 %vm941_vm0, %v10998_v7  ;;  %v4681_v7 = vld [vmem:[%s10455_s11 + $0xe8] sm:$0xff] }
 0x465   : > { %v3869_v46 = vpop.f32.mrf.mxu0 }
 0x466   : > { %v3632_v32 = vpop.f32.mrf.mxu2 }
 0x467   : > { %v3684_v61 = vadd.f32 %v3632_v32, %v9463_v42  ;;  %v4095_v57 = vpop.f32.mrf.mxu3  ;;  %4912 = vmatpush.bf16.msrb.mxu0 %v4889_v45  ;;  %v4719_v42 = vpack.c.bf16 %v4683_v49, %v4683_v49 }
 0x468   : > { %v9715_v48 = vadd.f32 %v4095_v57, %v3917_v27  ;;  %6446 = vmatmul.msk.bf16.gmra.mxu0 %vm941_vm0, %v11001_v25  ;;  %v11002_v27 = vld [vmem:[#allocation111_spill] sm:$0xff]  ;;  %v4717_v57 = vpack.c.bf16 %v4681_v7, %v4681_v7 }
 0x469   : > { %v3918_v44 = vadd.f32 %v3866_v16, %v3684_v61  ;;  %v11004_v19 = vpack.c.bf16 %v11002_v27, %v11003_v36  ;;  %v5386_v16 = vunpack.c.l.b16 %v4718_v0  ;;  %v5387_v37 = vunpack.c.l.b16 %v4719_v42  ;;  %v11005_v27 = vld [vmem:[#allocation71_spill] sm:$0xff]  ;;  %v11006_v36 = vld [vmem:[#allocation70_spill] sm:$0xff] }
 0x46a   : > { %v4716_v61 = vpack.c.bf16 %v4680_v39, %v4680_v39  ;;  %v5385_v11 = vunpack.c.l.b16 %v4717_v57  ;;  %v11008_v39 = vld [vmem:[#allocation79_spill] sm:$0xff] }
 0x46b   : > { %v4193_v1 = vpop.f32.mrf.mxu1  ;;  %6430 = vmatmul.msk.bf16.gmra.mxu2 %vm941_vm0, %v11004_v19  ;;  %v5389_v32 = vpack.c.b16 %v5387_v37, %v5386_v16 }
 0x46c   : > { %v9732_v50 = vadd.f32 %v4193_v1, %v9500_v23  ;;  %v5384_v25 = vunpack.c.l.b16 %v4716_v61  ;;  %v11012_v61 = vld [vmem:[#allocation113_spill] sm:$0xff] }
 0x46d   : > { %v3871_v58 = vpop.f32.mrf.mxu0  ;;  %5401 = vmatpush.bf16.msrb.mxu3 %v5389_v32  ;;  %v11011_v32 = vld [vmem:[#allocation116_spill] sm:$0xff] }
 0x46e   : > { %v3635_v45 = vpop.f32.mrf.mxu2  ;;  %6423 = vmatmul.msk.bf16.gmra.mxu1 %vm941_vm0, %v10956_v60  ;;  %v5388_v0 = vpack.c.b16 %v5385_v11, %v5384_v25  ;;  %v11007_v60 = vpack.c.bf16 %v11005_v27, %v11006_v36  ;;  %v11013_v57 = vpack.c.bf16 %v11011_v32, %v11012_v61  ;;  %v11014_v27 = vld [vmem:[#allocation87_spill] sm:$0xff]  ;;  %v11015_v36 = vld [vmem:[#allocation85_spill] sm:$0xff] }
 0x46f   : > { %v3685_v23 = vadd.f32 %v3635_v45, %v9485_v12  ;;  %v4097_v17 = vpop.f32.mrf.mxu3 }
 0x470   : > { %v9743_v63 = vadd.f32 %v4097_v17, %v3918_v44 }
 0x471   : > { %v3919_v49 = vadd.f32 %v3869_v46, %v3685_v23  ;;  %5402 = vmatpush.bf16.msrb.mxu3 %v5388_v0  ;;  %v11009_v46 = vld [vmem:[#allocation78_spill] sm:$0xff] }
 0x472   : > { %v11010_v7 = vpack.c.bf16 %v11008_v39, %v11009_v46  ;;  %v11018_v46 = vld [vmem:[#allocation122_spill] sm:$0xff] }
 0x473   : > { %v4195_v42 = vpop.f32.mrf.mxu1 }
 0x474   : > { %v9746_v1 = vadd.f32 %v4195_v42, %v9514_v52  ;;  %6458 = vmatmul.msk.bf16.gmra.mxu3 %vm941_vm0, %v11007_v60  ;;  %v11016_v60 = vpack.c.bf16 %v11014_v27, %v11015_v36 }
 0x475   : > { %v3874_v19 = vpop.f32.mrf.mxu0 }
 0x476   : > { %v3637_v12 = vpop.f32.mrf.mxu2 }
 0x477   : > { %v3686_v44 = vadd.f32 %v3637_v12, %v9493_v13  ;;  %v4100_v16 = vpop.f32.mrf.mxu3  ;;  %v11017_v12 = vmov 0.0  }
 0x478   : > { %v9753_v37 = vadd.f32 %v4100_v16, %v3919_v49  ;;  %6447 = vmatmul.msk.bf16.gmra.mxu0 %vm941_vm0, %v11010_v7  ;;  %v11019_v7 = vld [vmem:[#allocation119_spill] sm:$0xff] }
 0x479   : > { %v3920_v52 = vadd.f32 %v3871_v58, %v3686_v44  ;;  %v4877_v44 = vpack.c.bf16 %v10980_v26, %v11017_v12  ;;  %v11023_v12 = vld [vmem:[#allocation125_spill] sm:$0xff] }
 0x47b   : > { %v4198_v45 = vpop.f32.mrf.mxu1  ;;  %6431 = vmatmul.msk.bf16.gmra.mxu2 %vm941_vm0, %v11013_v57 }
 0x47c   : > { %v9764_v23 = vadd.f32 %v4198_v45, %v9524_v62 }
 0x47d   : > { %v3876_v17 = vpop.f32.mrf.mxu0 }
 0x47e   : > { %v3640_v13 = vpop.f32.mrf.mxu2  ;;  %6424 = vmatmul.msk.bf16.gmra.mxu1 %vm941_vm0, %v10962_v38 }
 0x47f   : > { %v3687_v25 = vadd.f32 %v3640_v13, %v9509_v47  ;;  %v4102_v11 = vpop.f32.mrf.mxu3 }
 0x480   : > { %v9769_v49 = vadd.f32 %v4102_v11, %v3920_v52  ;;  %v11020_v52 = vpack.c.bf16 %v11018_v46, %v11019_v7 }
 0x481   : > { %v3921_v58 = vadd.f32 %v3874_v19, %v3687_v25 }
 0x483   : > { %v4200_v0 = vpop.f32.mrf.mxu1 }
 0x484   : > { %v9772_v42 = vadd.f32 %v4200_v0, %v9538_v10  ;;  %6459 = vmatmul.msk.bf16.gmra.mxu3 %vm941_vm0, %v11016_v60 }
 0x485   : > { %v3879_v62 = vpop.f32.mrf.mxu0 }
 0x486   : > { %v3642_v38 = vpop.f32.mrf.mxu2 }
 0x487   : > { %v3688_v47 = vadd.f32 %v3642_v38, %v9517_v2  ;;  %v4105_v16 = vpop.f32.mrf.mxu3 }
 0x488   : > { %v9781_v39 = vadd.f32 %v4105_v16, %v3921_v58  ;;  %6448 = vmatmul.msk.bf16.vlgmr.msrb.gmra.mxu0 %vm941_vm0, %v4877_v44  ;;  %v11021_v58 = vld [vmem:[#allocation47_spill] sm:$0xff] }
 0x489   : > { %v3922_v19 = vadd.f32 %v3876_v17, %v3688_v47 }
 0x48b   : > { %v4203_v10 = vpop.f32.mrf.mxu1  ;;  %6432 = vmatmul.msk.bf16.gmra.mxu2 %vm941_vm0, %v11020_v52 }
 0x48c   : > { %v9789_v45 = vadd.f32 %v4203_v10, %v9548_v56  ;;  %v4663_v10 = vld [vmem:[%s10455_s11 + $0x58] sm:$0xff] }
 0x48d   : > { %v3881_v32 = vpop.f32.mrf.mxu0  ;;  %v4699_v7 = vpack.c.bf16 %v4663_v10, %v4663_v10  ;;  %v11026_v10 = vld [vmem:[#allocation135_spill] sm:$0xff] }
 0x48e   : > { %v3645_v61 = vpop.f32.mrf.mxu2  ;;  %6425 = vmatmul.msk.bf16.gmra.mxu1 %vm941_vm0, %v10966_v30 }
 0x48f   : > { %v3689_v2 = vadd.f32 %v3645_v61, %v9533_v54  ;;  %v4107_v57 = vpop.f32.mrf.mxu3  ;;  %v5034_v61 = vunpack.c.l.b16 %v4699_v7 }
 0x490   : > { %v9794_v13 = vadd.f32 %v4107_v57, %v3922_v19  ;;  %v4662_v19 = vld [vmem:[%s10455_s11 + $0x50] sm:$0xff] }
 0x491   : > { %v3923_v17 = vadd.f32 %v3879_v62, %v3689_v2  ;;  %v11022_v62 = vld [vmem:[#allocation128_spill] sm:$0xff] }
 0x492   : > { %v11024_v44 = vpack.c.bf16 %v11022_v62, %v11023_v12 }
 0x493   : > { %v4205_v25 = vpop.f32.mrf.mxu1 }
 0x494   : > { %v9797_v11 = vadd.f32 %v4205_v25, %v9568_v15  ;;  %6472 = vmatmul.msk.bf16.vlgmr.msrb.gmra.mxu3 %vm941_vm0, %v11021_v58 }
 0x495   : > { %v3884_v56 = vpop.f32.mrf.mxu0 }
 0x496   : > { %v3647_v0 = vpop.f32.mrf.mxu2 }
 0x497   : > { %v3690_v27 = vadd.f32 %v3647_v0, %v9541_v29  ;;  %v4110_v36 = vpop.f32.mrf.mxu3 }
 0x498   : > { %v9802_v60 = vadd.f32 %v4110_v36, %v3923_v17  ;;  %6449 = vmatmul.msk.bf16.gmra.mxu0 %vm941_vm0, %v11021_v58  ;;  %v11025_v17 = vld [vmem:[#allocation62_spill] sm:$0xff] }
 0x499   : > { %v3924_v54 = vadd.f32 %v3881_v32, %v3690_v27 }
 0x49b   : > { %v4208_v30 = vpop.f32.mrf.mxu1  ;;  %6433 = vmatmul.msk.bf16.gmra.mxu2 %vm941_vm0, %v11024_v44 }
 0x49c   : > { %v9811_v15 = vadd.f32 %v4208_v30, %v9578_v14  ;;  %v4698_v14 = vpack.c.bf16 %v4662_v19, %v4662_v19 }
 0x49d   : > { %v3886_v38 = vpop.f32.mrf.mxu0 }
 0x49e   : > { %v3650_v47 = vpop.f32.mrf.mxu2  ;;  %6426 = vmatmul.msk.bf16.gmra.mxu1 %vm941_vm0, %v10973_v53  ;;  %v5033_v32 = vunpack.c.l.b16 %v4698_v14  ;;  %v4661_v53 = vld [vmem:[%s10455_s11 + $0x48] sm:$0xff]  ;;  %v11027_v14 = vld [vmem:[#allocation131_spill] sm:$0xff] }
 0x49f   : > { %v3691_v29 = vadd.f32 %v3650_v47, %v9557_v20  ;;  %v4112_v16 = vpop.f32.mrf.mxu3  ;;  %v4660_v20 = vld [vmem:[%s10455_s11 + $0x40] sm:$0xff]  ;;  %v11028_v7 = vpack.c.bf16 %v11026_v10, %v11027_v14 }
 0x4a0   : > { %v9822_v46 = vadd.f32 %v4112_v16, %v3924_v54  ;;  %v5036_v25 = vpack.c.b16 %v5034_v61, %v5033_v32  ;;  %v4696_v58 = vpack.c.bf16 %v4660_v20, %v4660_v20  ;;  %v4672_v47 = vld [vmem:[%s10455_s11 + $0xa0] sm:$0xff]  ;;  %v5548_v32 = vld [vmem:[#allocation5 + $0x58] sm:$0xff] }
 0x4a1   : > { %v3925_v52 = vadd.f32 %v3884_v56, %v3691_v29  ;;  %v4697_v56 = vpack.c.bf16 %v4661_v53, %v4661_v53  ;;  %v4673_v29 = vld [vmem:[%s10455_s11 + $0xa8] sm:$0xff]  ;;  %v4708_v16 = vpack.c.bf16 %v4672_v47, %v4672_v47 }
 0x4a2   : > { %5057 = vmatpush.bf16.msra.mxu0 %v5036_v25  ;;  %v5031_v36 = vunpack.c.l.b16 %v4696_v58  ;;  %v4709_v19 = vpack.c.bf16 %v4673_v29, %v4673_v29 }
 0x4a3   : > { %v4210_v2 = vpop.f32.mrf.mxu1  ;;  %v5032_v54 = vunpack.c.l.b16 %v4697_v56  ;;  %v5247_v61 = vunpack.c.l.b16 %v4708_v16 }
 0x4a4   : > { %v9831_v57 = vadd.f32 %v4210_v2, %v9598_v28  ;;  %6473 = vmatmul.msk.bf16.gmra.mxu3 %vm941_vm0, %v11025_v17  ;;  %v5248_v2 = vunpack.c.l.b16 %v4709_v19 }
 0x4a5   : > { %v3889_v0 = vpop.f32.mrf.mxu0  ;;  %v5035_v28 = vpack.c.b16 %v5032_v54, %v5031_v36 }
 0x4a6   : > { %v3652_v27 = vpop.f32.mrf.mxu2  ;;  %v5251_v58 = vpack.c.b16 %v5248_v2, %v5247_v61  ;;  %v11030_v61 = vld [vmem:[#allocation142_spill] sm:$0xff]  ;;  %v11031_v2 = vld [vmem:[#allocation139_spill] sm:$0xff] }
 0x4a7   : > { %v3692_v30 = vadd.f32 %v3652_v27, %v9571_v22  ;;  %v4115_v62 = vpop.f32.mrf.mxu3  ;;  %5058 = vmatpush.bf16.msra.mxu0 %v5035_v28 }
 0x4a8   : > { %v9836_v12 = vadd.f32 %v4115_v62, %v3925_v52  ;;  %6450 = vmatmul.msk.bf16.gmra.mxu0 %vm941_vm0, %v11025_v17  ;;  %v5547_v52 = vld [vmem:[#allocation5 + $0x50] sm:$0xff]  ;;  %v5584_v17 = vpack.c.bf16 %v5548_v32, %v5548_v32  ;;  %v5546_v62 = vld [vmem:[#allocation5 + $0x48] sm:$0xff]  ;;  %5274 = vmatpush.bf16.msrb.mxu1 %v5251_v58 }
 0x4a9   : > { %v3926_v44 = vadd.f32 %v3886_v38, %v3692_v30  ;;  %v5583_v20 = vpack.c.bf16 %v5547_v52, %v5547_v52  ;;  %v5545_v30 = vld [vmem:[#allocation5 + $0x40] sm:$0xff]  ;;  %v5582_v47 = vpack.c.bf16 %v5546_v62, %v5546_v62 }
 0x4aa   : > { %v5738_v54 = vunpack.c.l.b16 %v5584_v17  ;;  %v5564_v17 = vld [vmem:[#allocation5 + $0xd8] sm:$0xff]  ;;  %v5561_v62 = vld [vmem:[#allocation5 + $0xc0] sm:$0xff] }
 0x4ab   : > { %v4213_v22 = vpop.f32.mrf.mxu1  ;;  %6434 = vmatmul.msk.bf16.gmra.mxu2 %vm941_vm0, %v11028_v7  ;;  %v5737_v56 = vunpack.c.l.b16 %v5583_v20  ;;  %v11032_v20 = vpack.c.bf16 %v11030_v61, %v11031_v2  ;;  %v11035_v2 = vld [vmem:[#allocation43_spill] sm:$0xff] }
 0x4ac   : > { %v9851_v38 = vadd.f32 %v4213_v22, %v9608_v3  ;;  %v5581_v3 = vpack.c.bf16 %v5545_v30, %v5545_v30  ;;  %v5736_v22 = vunpack.c.l.b16 %v5582_v47 }
 0x4ad   : > { %v3891_v53 = vpop.f32.mrf.mxu0  ;;  %v5740_v16 = vpack.c.b16 %v5738_v54, %v5737_v56  ;;  %v5600_v56 = vpack.c.bf16 %v5564_v17, %v5564_v17 }
 0x4ae   : > { %v3655_v25 = vpop.f32.mrf.mxu2  ;;  %6427 = vmatmul.msk.bf16.gmra.mxu1 %vm941_vm0, %v10979_v18  ;;  %v5735_v19 = vunpack.c.l.b16 %v5581_v3  ;;  %v5562_v3 = vld [vmem:[#allocation5 + $0xc8] sm:$0xff] }
 0x4af   : > { %v3693_v27 = vadd.f32 %v3655_v25, %v9587_v43  ;;  %v4117_v36 = vpop.f32.mrf.mxu3  ;;  %5752 = vmatpush.bf16.msra.mxu3 %v5740_v16  ;;  %v11029_v43 = vld [vmem:[#allocation77_spill] sm:$0xff]  ;;  %v5597_v16 = vpack.c.bf16 %v5561_v62, %v5561_v62 }
 0x4b0   : > { %v9856_v28 = vadd.f32 %v4117_v36, %v3926_v44  ;;  %v5739_v14 = vpack.c.b16 %v5736_v22, %v5735_v19  ;;  %v11033_v36 = vmov 0.0|0.0   ;;  %v5598_v19 = vpack.c.bf16 %v5562_v3, %v5562_v3  ;;  %v11042_v62 = vld [vmem:[#allocation45_spill] sm:$0xff] }
 0x4b1   : > { %v9858_v29 = vadd.f32 %v3889_v0, %v3693_v27 }
 0x4b3   : > { %v4215_v10 = vpop.f32.mrf.mxu1  ;;  %5753 = vmatpush.bf16.msra.mxu3 %v5739_v14  ;;  %v5884_v14 = vunpack.c.l.b16 %v5598_v19  ;;  %v11045_v19 = vld [vmem:[#allocation24_spill] sm:$0xff] }
 0x4b4   : > { %v9861_v18 = vadd.f32 %v4215_v10, %v9626_v31  ;;  %6474 = vmatmul.msk.bf16.gmra.mxu3 %vm941_vm0, %v11029_v43  ;;  %v5563_v31 = vld [vmem:[#allocation5 + $0xd0] sm:$0xff]  ;;  %v11034_v10 = vld [vmem:[#allocation84_spill] sm:$0xff] }
 0x4b5   : > { %v3894_v7 = vpop.f32.mrf.mxu0  ;;  %v5599_v58 = vpack.c.bf16 %v5563_v31, %v5563_v31 }
 0x4b6   : > { %v3657_v44 = vpop.f32.mrf.mxu2 }
 0x4b7   : > { %v3694_v52 = vadd.f32 %v3657_v44, %v9601_v35  ;;  %v5885_v54 = vunpack.c.l.b16 %v5599_v58 }
 0x4b8   : > { %6451 = vmatmul.msk.bf16.gmra.mxu0 %vm941_vm0, %v11029_v43  ;;  %v5883_v43 = vunpack.c.l.b16 %v5597_v16  ;;  %v11044_v16 = vld [vmem:[#allocation27_spill] sm:$0xff] }
 0x4b9   : > { %v9868_v0 = vadd.f32 %v3891_v53, %v3694_v52  ;;  %v5886_v53 = vunpack.c.l.b16 %v5600_v56  ;;  %v11038_v56 = vld [vmem:[#allocation147_spill] sm:$0xff] }
 0x4bb   : > { %v4218_v32 = vpop.f32.mrf.mxu1  ;;  %6435 = vmatmul.msk.bf16.gmra.mxu2 %vm941_vm0, %v11032_v20  ;;  %v5888_v47 = vpack.c.b16 %v5886_v53, %v5885_v54  ;;  %v11036_v20 = vld [vmem:[#allocation42_spill] sm:$0xff] }
 0x4bc   : > { %v9875_v25 = vadd.f32 %v4218_v32, %v9640_v51  ;;  %v5379_v51 = vpack.c.bf16 0.0, %v11034_v10  ;;  %v11037_v31 = vpack.c.bf16 %v11035_v2, %v11036_v20 }
 0x4bd   : > { %v3896_v35 = vpop.f32.mrf.mxu0  ;;  %5900 = vmatpush.bf16.msrb.mxu3 %v5888_v47 }
 0x4be   : > { %v3660_v27 = vpop.f32.mrf.mxu2  ;;  %4257 = vmatmul.bf16.gmra.mxu1 %v11033_v36 }
 0x4bf   : > { %v3695_v30 = vadd.f32 %v3660_v27, %v9617_v21  ;;  %v5887_v21 = vpack.c.b16 %v5884_v14, %v5883_v43 }
 0x4c1   : > { %v9879_v22 = vadd.f32 %v3894_v7, %v3695_v30  ;;  %5901 = vmatpush.bf16.msrb.mxu3 %v5887_v21  ;;  %v11041_v30 = vld [vmem:[#allocation51_spill] sm:$0xff]  ;;  %v11048_v21 = vld [vmem:[#allocation52_spill] sm:$0xff] }
 0x4c2   : > { %v11043_v3 = vpack.c.bf16 %v11041_v30, %v11042_v62 }
 0x4c3   : > { %v4220_v44 = vpop.f32.mrf.mxu1 }
 0x4c4   : > { %v9883_v52 = vadd.f32 %v4220_v44, %v9656_v6  ;;  %6475 = vmatmul.msk.bf16.gmra.mxu3 %vm941_vm0, %v5379_v51  ;;  %v11039_v6 = vld [vmem:[#allocation144_spill] sm:$0xff]  ;;  %v11046_v51 = vpack.c.bf16 %v11044_v16, %v11045_v19  ;;  %v11047_v44 = vld [vmem:[#allocation57_spill] sm:$0xff] }
 0x4c5   : > { %v9886_v32 = vpop.f32.mrf.mxu0  ;;  %v11040_v27 = vpack.c.bf16 %v11038_v56, %v11039_v6 }
 0x4c6   : > { %v3662_v61 = vpop.f32.mrf.mxu2 }
 0x4c7   : > { %v3696_v7 = vadd.f32 %v3662_v61, %v9636_v9  ;;  %v11049_v61 = vpack.c.bf16 %v11047_v44, %v11048_v21  ;;  %v4669_v21 = vld [vmem:[%s10455_s11 + $0x88] sm:$0xff] }
 0x4c8   : > { %6452 = vmatmul.msk.bf16.vlgmr.msra.gmra.mxu0 %vm941_vm0, %v11037_v31  ;;  %v4677_v31 = vld [vmem:[%s10455_s11 + $0xc8] sm:$0xff] }
 0x4c9   : > { %v9893_v17 = vadd.f32 %v3896_v35, %v3696_v7  ;;  %v4713_v6 = vpack.c.bf16 %v4677_v31, %v4677_v31 }
 0x4cb   : > { %v4223_v58 = vpop.f32.mrf.mxu1  ;;  %6436 = vmatmul.msk.bf16.gmra.mxu2 %vm941_vm0, %v11040_v27 }
 0x4cc   : > { %v9901_v54 = vadd.f32 %v4223_v58, %v9665_v59 }
 0x4cd   : > { %v9903_v53 = vpop.f32.mrf.mxu0 }
 0x4ce   : > { %v4412_v9 = vpop.f32.mrf.mxu2  ;;  %6464 = vmatmul.msk.bf16.vlgmr.msrb.gmra.mxu1 %vm941_vm0, %v11043_v3  ;;  %v5323_v3 = vunpack.c.l.b16 %v4713_v6 }
 0x4cf   : > { %v4492_v35 = vadd.f32 %v4412_v9, %v9648_v40  ;;  %v11053_v9 = vld [vmem:[#allocation59_spill] sm:$0xff] }
 0x4d1   : > { %4524 = vst.msk [vmem:[%s9910_s19] sm:$0xff] %vm941_vm0, %v4492_v35  ;;  %v4670_v35 = vld [vmem:[%s10455_s11 + $0x90] sm:$0xff] }
 0x4d2   : > { %v4706_v16 = vpack.c.bf16 %v4670_v35, %v4670_v35  ;;  %v11058_v35 = vld [vmem:[#allocation72_spill] sm:$0xff] }
 0x4d3   : > { %v4225_v47 = vpop.f32.mrf.mxu1 }
 0x4d4   : > { %v9915_v59 = vadd.f32 %v4225_v47, %v9699_v41  ;;  %6482 = vmatmul.msk.bf16.vlgmr.msra.gmra.mxu3 %vm941_vm0, %v11046_v51  ;;  %v11050_v41 = vld [vmem:[#allocation152_spill] sm:$0xff] }
 0x4d5   : > { %v9921_v43 = vpop.f32.mrf.mxu0  ;;  %v11051_v2 = vpack.c.bf16 %v11050_v41, %v10948_v5  ;;  %v11052_v5 = vld [vmem:[#allocation65_spill] sm:$0xff]  ;;  %v4671_v47 = vld [vmem:[%s10455_s11 + $0x98] sm:$0xff] }
 0x4d6   : > { %v4414_v14 = vpop.f32.mrf.mxu2  ;;  %v11054_v30 = vpack.c.bf16 %v11052_v5, %v11053_v9  ;;  %v4707_v19 = vpack.c.bf16 %v4671_v47, %v4671_v47  ;;  %v11056_v41 = vld [vmem:[#allocation28_spill] sm:$0xff]  ;;  %v11059_v47 = vld [vmem:[#allocation66_spill] sm:$0xff] }
 0x4d7   : > { %v4493_v40 = vadd.f32 %v4414_v14, %v9661_v8  ;;  %v4676_v8 = vld [vmem:[%s10455_s11 + $0xc0] sm:$0xff]  ;;  %v5174_v14 = vunpack.c.l.b16 %v4706_v16  ;;  %v5540_v5 = vld [vmem:[#allocation5 + $0x18] sm:$0xff]  ;;  %v11060_v16 = vpack.c.bf16 %v11058_v35, %v11059_v47  ;;  %v5555_v35 = vld [vmem:[#allocation5 + $0x90] sm:$0xff] }
 0x4d8   : > { %6453 = vmatmul.msk.bf16.gmra.mxu0 %vm941_vm0, %v11049_v61  ;;  %v4712_v56 = vpack.c.bf16 %v4676_v8, %v4676_v8  ;;  %v5556_v47 = vld [vmem:[#allocation5 + $0x98] sm:$0xff] }
 0x4d9   : > { %4525 = vst.msk [vmem:[%s9910_s19 + $0x8] sm:$0xff] %vm941_vm0, %v4493_v40  ;;  %v5175_v40 = vunpack.c.l.b16 %v4707_v19 }
 0x4da   : > { %v5322_v62 = vunpack.c.l.b16 %v4712_v56  ;;  %v4705_v56 = vpack.c.bf16 %v4669_v21, %v4669_v21 }
 0x4db   : > { %v4228_v7 = vpop.f32.mrf.mxu1  ;;  %6437 = vmatmul.msk.bf16.gmra.mxu2 %vm941_vm0, %v11051_v2  ;;  %v5177_v8 = vpack.c.b16 %v5175_v40, %v5174_v14  ;;  %v5537_v40 = vld [vmem:[#allocation5] sm:$0xff] }
 0x4dc   : > { %v9935_v20 = vadd.f32 %v4228_v7, %v9715_v48  ;;  %v5326_v51 = vpack.c.b16 %v5323_v3, %v5322_v62  ;;  %v11055_v7 = vld [vmem:[#allocation29_spill] sm:$0xff]  ;;  %v5576_v3 = vpack.c.bf16 %v5540_v5, %v5540_v5 }
 0x4dd   : > { %v9943_v58 = vpop.f32.mrf.mxu0  ;;  %v11057_v2 = vpack.c.bf16 %v11055_v7, %v11056_v41  ;;  %5198 = vmatpush.bf16.msrb.mxu0 %v5177_v8  ;;  %v11061_v41 = vld [vmem:[#allocation157_spill] sm:$0xff] }
 0x4de   : > { %v4417_v27 = vpop.f32.mrf.mxu2  ;;  %6465 = vmatmul.msk.bf16.gmra.mxu1 %vm941_vm0, %v11054_v30  ;;  %5349 = vmatpush.bf16.msrb.mxu2 %v5326_v51  ;;  %v5645_v14 = vunpack.c.l.b16 %v5576_v3 }
 0x4df   : > { %v4494_v48 = vadd.f32 %v4417_v27, %v9682_v33  ;;  %v4668_v33 = vld [vmem:[%s10455_s11 + $0x80] sm:$0xff]  ;;  %v5539_v27 = vld [vmem:[#allocation5 + $0x10] sm:$0xff] }
 0x4e0   : > { %v4704_v31 = vpack.c.bf16 %v4668_v33, %v4668_v33  ;;  %v5575_v62 = vpack.c.bf16 %v5539_v27, %v5539_v27  ;;  %v5573_v33 = vpack.c.bf16 %v5537_v40, %v5537_v40  ;;  %v11066_v40 = vld [vmem:[#allocation88_spill] sm:$0xff] }
 0x4e1   : > { %4526 = vst.msk [vmem:[%s9910_s19 + $0x10] sm:$0xff] %vm941_vm0, %v4494_v48  ;;  %v5173_v48 = vunpack.c.l.b16 %v4705_v56 }
 0x4e2   : > { %v5172_v30 = vunpack.c.l.b16 %v4704_v31  ;;  %v5644_v51 = vunpack.c.l.b16 %v5575_v62  ;;  %v5642_v31 = vunpack.c.l.b16 %v5573_v33 }
 0x4e3   : > { %v4230_v44 = vpop.f32.mrf.mxu1 }
 0x4e4   : > { %v9965_v61 = vadd.f32 %v4230_v44, %v9743_v63  ;;  %6486 = vmatmul.msk.bf16.vlgmr.msrb.gmra.mxu3 %vm941_vm0, %v11057_v2  ;;  %v5176_v19 = vpack.c.b16 %v5173_v48, %v5172_v30  ;;  %v5538_v44 = vld [vmem:[#allocation5 + $0x8] sm:$0xff]  ;;  %v5647_v2 = vpack.c.b16 %v5645_v14, %v5644_v51  ;;  %v11064_v30 = vld [vmem:[#allocation73_spill] sm:$0xff]  ;;  %v5592_v51 = vpack.c.bf16 %v5556_v47, %v5556_v47 }
 0x4e5   : > { %v9971_v6 = vpop.f32.mrf.mxu0  ;;  %v5574_v21 = vpack.c.bf16 %v5538_v44, %v5538_v44  ;;  %v11067_v44 = vld [vmem:[#allocation81_spill] sm:$0xff] }
 0x4e6   : > { %v4419_v9 = vpop.f32.mrf.mxu2  ;;  %5199 = vmatpush.bf16.msrb.mxu0 %v5176_v19  ;;  %5659 = vmatpush.bf16.msra.mxu1 %v5647_v2  ;;  %v5591_v19 = vpack.c.bf16 %v5555_v35, %v5555_v35  ;;  %v11068_v33 = vpack.c.bf16 %v11066_v40, %v11067_v44 }
 0x4e7   : > { %v4495_v63 = vadd.f32 %v4419_v9, %v9708_v24  ;;  %v11062_v24 = vpack.c.bf16 %v11061_v41, %v10954_v55  ;;  %v5643_v56 = vunpack.c.l.b16 %v5574_v21  ;;  %v11063_v9 = vld [vmem:[#allocation80_spill] sm:$0xff]  ;;  %v5810_v21 = vunpack.c.l.b16 %v5592_v51 }
 0x4e8   : > { %6454 = vmatmul.msk.bf16.gmra.mxu0 %vm941_vm0, %v11060_v16  ;;  %v11065_v48 = vpack.c.bf16 %v11063_v9, %v11064_v30  ;;  %v5572_v51 = vld [vmem:[#allocation5 + $0x118] sm:$0xff] }
 0x4e9   : > { %4527 = vst.msk [vmem:[%s9910_s19 + $0x18] sm:$0xff] %vm941_vm0, %v4495_v63  ;;  %v5646_v62 = vpack.c.b16 %v5643_v56, %v5642_v31  ;;  %v11069_v31 = vld [vmem:[#allocation163_spill] sm:$0xff] }
 0x4ea   : > { %v11070_v56 = vpack.c.bf16 %v11069_v31, %v10960_v4  ;;  %v10022_v4 = vld [vmem:[%s10456_s12] ss:$0 sm:$0xff]  ;;  %v11075_v31 = vld [vmem:[#allocation166_spill] sm:$0xff] }
 0x4eb   : > { %v4233_v7 = vpop.f32.mrf.mxu1  ;;  %6438 = vmatmul.msk.bf16.gmra.mxu2 %vm941_vm0, %v11062_v24  ;;  %5660 = vmatpush.bf16.msra.mxu1 %v5646_v62  ;;  %v11072_v62 = vld [vmem:[#allocation89_spill] sm:$0xff]  ;;  %v4869_v47 = vadd.f32 %v10022_v4, %v9886_v32 }
 0x4ec   : > { %v9985_v8 = vadd.f32 %v4233_v7, %v9753_v37  ;;  %v5554_v7 = vld [vmem:[#allocation5 + $0x88] sm:$0xff]  ;;  %v5569_v32 = vld [vmem:[#allocation5 + $0x100] sm:$0xff] }
 0x4ed   : > { %v9987_v27 = vpop.f32.mrf.mxu0  ;;  %v5590_v2 = vpack.c.bf16 %v5554_v7, %v5554_v7 }
 0x4ee   : > { %v4422_v5 = vpop.f32.mrf.mxu2  ;;  %6466 = vmatmul.msk.bf16.gmra.mxu1 %vm941_vm0, %v11065_v48  ;;  %v11071_v48 = vld [vmem:[#allocation90_spill] sm:$0xff] }
 0x4ef   : > { %v4496_v55 = vadd.f32 %v4422_v5, %v9732_v50  ;;  %v5809_v50 = vunpack.c.l.b16 %v5591_v19  ;;  %v5808_v5 = vunpack.c.l.b16 %v5590_v2  ;;  %v5571_v19 = vld [vmem:[#allocation5 + $0x110] sm:$0xff] }
 0x4f1   : > { %4528 = vst.msk [vmem:[%s9910_s19 + $0x20] sm:$0xff] %vm941_vm0, %v4496_v55  ;;  %v5812_v41 = vpack.c.b16 %v5810_v21, %v5809_v50  ;;  %v11073_v55 = vpack.c.bf16 %v11071_v48, %v11072_v62  ;;  %v5608_v50 = vpack.c.bf16 %v5572_v51, %v5572_v51 }
 0x4f3   : > { %v4235_v37 = vpop.f32.mrf.mxu1  ;;  %5824 = vmatpush.bf16.msrb.mxu1 %v5812_v41  ;;  %v5958_v7 = vunpack.c.l.b16 %v5608_v50  ;;  %v5570_v41 = vld [vmem:[#allocation5 + $0x108] sm:$0xff]  ;;  %v11084_v50 = vld [vmem:[#allocation169_spill] sm:$0xff] }
 0x4f4   : > { %v9997_v63 = vadd.f32 %v4235_v37, %v9769_v49  ;;  %v5553_v49 = vld [vmem:[#allocation5 + $0x80] sm:$0xff]  ;;  %v5606_v2 = vpack.c.bf16 %v5570_v41, %v5570_v41 }
 0x4f5   : > { %v9999_v3 = vpop.f32.mrf.mxu0  ;;  %v5589_v24 = vpack.c.bf16 %v5553_v49, %v5553_v49 }
 0x4f6   : > { %v4424_v16 = vpop.f32.mrf.mxu2 }
 0x4f7   : > { %v4497_v14 = vadd.f32 %v4424_v16, %v9746_v1  ;;  %v5807_v1 = vunpack.c.l.b16 %v5589_v24  ;;  %v5605_v24 = vpack.c.bf16 %v5569_v32, %v5569_v32 }
 0x4f8   : > { %6455 = vmatmul.msk.bf16.gmra.mxu0 %vm941_vm0, %v11068_v33  ;;  %v5607_v33 = vpack.c.bf16 %v5571_v19, %v5571_v19 }
 0x4f9   : > { %4529 = vst.msk [vmem:[%s9910_s19 + $0x28] sm:$0xff] %vm941_vm0, %v4497_v14  ;;  %v5811_v37 = vpack.c.b16 %v5808_v5, %v5807_v1  ;;  %v11074_v14 = vld [vmem:[#allocation38_spill] sm:$0xff]  ;;  %v5955_v1 = vunpack.c.l.b16 %v5605_v24  ;;  %v5956_v5 = vunpack.c.l.b16 %v5606_v2  ;;  %v4686_v24 = vld [vmem:[%s10455_s11 + $0x110] sm:$0xff]  ;;  %v4687_v2 = vld [vmem:[%s10455_s11 + $0x118] sm:$0xff] }
 0x4fa   : > { %v5164_v40 = vpack.c.bf16 %v11074_v14, %v10980_v26  ;;  %v5957_v49 = vunpack.c.l.b16 %v5607_v33  ;;  %v11076_v26 = vpack.c.bf16 %v11075_v31, %v9036_v34  ;;  %v4722_v31 = vpack.c.bf16 %v4686_v24, %v4686_v24 }
 0x4fb   : > { %6439 = vmatmul.msk.bf16.gmra.mxu2 %vm941_vm0, %v11070_v56  ;;  %5825 = vmatpush.bf16.msrb.mxu1 %v5811_v37  ;;  %v11078_v37 = vld [vmem:[#allocation26_spill] sm:$0xff]  ;;  %v4875_v24 = vadd.f32 %v10022_v4, %v9999_v3 }
 0x4fc   : > { %v5960_v56 = vpack.c.b16 %v5958_v7, %v5957_v49 }
 0x4fd   : > { %v10012_v9 = vpop.f32.mrf.mxu0 }
 0x4fe   : > { %v4427_v30 = vpop.f32.mrf.mxu2  ;;  %6467 = vmatmul.msk.bf16.gmra.mxu1 %vm941_vm0, %v11073_v55  ;;  %v11077_v55 = vld [vmem:[#allocation30_spill] sm:$0xff]  ;;  %v4876_v3 = vadd.f32 %v10022_v4, %v10012_v9 }
 0x4ff   : > { %v4498_v35 = vadd.f32 %v4427_v30, %v9764_v23 }
 0x501   : > { %4530 = vst.msk [vmem:[%s9910_s19 + $0x30] sm:$0xff] %vm941_vm0, %v4498_v35  ;;  %v11079_v35 = vpack.c.bf16 %v11077_v55, %v11078_v37 }
 0x505   : > { %v4914_v16 = vpop.f32.mrf.mxu0 }
 0x506   : > { %v10030_v44 = vadd.f32 %v4914_v16, %v4869_v47  ;;  %v4429_v23 = vpop.f32.mrf.mxu2  ;;  %v5959_v47 = vpack.c.b16 %v5956_v5, %v5955_v1  ;;  %v4873_v1 = vadd.f32 %v10022_v4, %v9971_v6  ;;  %v11090_v6 = vld [vmem:[#allocation138_spill] sm:$0xff] }
 0x507   : > { %v4499_v21 = vadd.f32 %v4429_v23, %v9772_v42  ;;  %v4870_v42 = vadd.f32 %v10022_v4, %v9903_v53  ;;  %v4871_v53 = vadd.f32 %v10022_v4, %v9921_v43  ;;  %v11081_v23 = vld [vmem:[#allocation46_spill] sm:$0xff]  ;;  %v4872_v43 = vadd.f32 %v10022_v4, %v9943_v58 }
 0x508   : > { %6460 = vmatmul.msk.bf16.vlgmr.msrb.gmra.mxu0 %vm941_vm0, %v5164_v40  ;;  %v11080_v40 = vld [vmem:[#allocation54_spill] sm:$0xff]  ;;  %v5450_v58 = vunpack.c.l.b16 %v4722_v31 }
 0x509   : > { %4531 = vst.msk [vmem:[%s9910_s19 + $0x38] sm:$0xff] %vm941_vm0, %v4499_v21  ;;  %v11082_v33 = vpack.c.bf16 %v11080_v40, %v11081_v23  ;;  %v11091_v23 = vld [vmem:[#allocation137_spill] sm:$0xff] }
 0x50b   : > { %6440 = vmatmul.msk.bf16.gmra.mxu2 %vm941_vm0, %v11076_v26  ;;  %v4723_v26 = vpack.c.bf16 %v4687_v2, %v4687_v2  ;;  %v11096_v2 = vld [vmem:[#allocation23_spill] sm:$0xff] }
 0x50d   : > { %v4916_v30 = vpop.f32.mrf.mxu0 }
 0x50e   : > { %v10042_v48 = vadd.f32 %v4916_v30, %v4870_v42  ;;  %v4432_v62 = vpop.f32.mrf.mxu2  ;;  %6480 = vmatmul.msk.bf16.vlgmr.msra.gmra.mxu1 %vm941_vm0, %v11079_v35  ;;  %v4684_v42 = vld [vmem:[%s10455_s11 + $0x100] sm:$0xff] }
 0x50f   : > { %v4500_v34 = vadd.f32 %v4432_v62, %v9789_v45  ;;  %5972 = vmatpush.bf16.msra.mxu1 %v5960_v56  ;;  %v11083_v45 = vld [vmem:[#allocation172_spill] sm:$0xff]  ;;  %v5451_v56 = vunpack.c.l.b16 %v4723_v26  ;;  %v4720_v30 = vpack.c.bf16 %v4684_v42, %v4684_v42 }
 0x510   : > { %v11085_v21 = vpack.c.bf16 %v11083_v45, %v11084_v50  ;;  %v4874_v45 = vadd.f32 %v10022_v4, %v9987_v27  ;;  %v4326_v27 = vsel %vm2900_vm8, %v11096_v2, 0.0  ;;  %v11100_v4 = vld [vmem:[#allocation58_spill] sm:$0xff] }
 0x511   : > { %4532 = vst.msk [vmem:[%s9910_s19 + $0x40] sm:$0xff] %vm941_vm0, %v4500_v34  ;;  %v5453_v5 = vpack.c.b16 %v5451_v56, %v5450_v58  ;;  %v5448_v34 = vunpack.c.l.b16 %v4720_v30 }
 0x513   : > { %5973 = vmatpush.bf16.msra.mxu1 %v5959_v47  ;;  %5474 = vmatpush.bf16.msra.mxu0 %v5453_v5 }
 0x515   : > { %v4919_v16 = vpop.f32.mrf.mxu0 }
 0x516   : > { %v10053_v19 = vadd.f32 %v4919_v16, %v4871_v53  ;;  %v4434_v51 = vpop.f32.mrf.mxu2  ;;  %v11087_v16 = vld [vmem:[#allocation69_spill] sm:$0xff] }
 0x517   : > { %v4501_v14 = vadd.f32 %v4434_v51, %v9797_v11  ;;  %v11086_v11 = vld [vmem:[#allocation25_spill] sm:$0xff] }
 0x518   : > { %6461 = vmatmul.msk.bf16.gmra.mxu0 %vm941_vm0, %v11082_v33  ;;  %v11088_v51 = vld [vmem:[#allocation61_spill] sm:$0xff]  ;;  %v11092_v33 = vpack.c.bf16 %v11090_v6, %v11091_v23 }
 0x519   : > { %4533 = vst.msk [vmem:[%s9910_s19 + $0x48] sm:$0xff] %vm941_vm0, %v4501_v14  ;;  %v11089_v14 = vpack.c.bf16 %v11087_v16, %v11088_v51  ;;  %v11104_v51 = vld [vmem:[#allocation41_spill] sm:$0xff] }
 0x51b   : > { %6441 = vmatmul.msk.bf16.gmra.mxu2 %vm941_vm0, %v11085_v21 }
 0x51d   : > { %v4921_v49 = vpop.f32.mrf.mxu0 }
 0x51e   : > { %v10068_v7 = vadd.f32 %v4921_v49, %v4872_v43  ;;  %v4437_v32 = vpop.f32.mrf.mxu2  ;;  %6484 = vmatmul.msk.bf16.vlgmr.msrb.gmra.mxu1 %vm941_vm0, %v11086_v11  ;;  %v11093_v43 = vld [vmem:[#allocation32_spill] sm:$0xff]  ;;  %v11094_v49 = vld [vmem:[#allocation31_spill] sm:$0xff] }
 0x51f   : > { %v4502_v41 = vadd.f32 %v4437_v32, %v9811_v15  ;;  %v4685_v15 = vld [vmem:[%s10455_s11 + $0x108] sm:$0xff]  ;;  %v11095_v32 = vpack.c.bf16 %v11093_v43, %v11094_v49 }
 0x520   : > { %v4721_v62 = vpack.c.bf16 %v4685_v15, %v4685_v15  ;;  %v4342_v15 = vpack.c.bf16 %v4326_v27, %v11096_v2  ;;  %v11110_v2 = vld [vmem:[#allocation60_spill] sm:$0xff]  ;;  %v5543_v27 = vld [vmem:[#allocation5 + $0x30] sm:$0xff] }
 0x521   : > { %4534 = vst.msk [vmem:[%s9910_s19 + $0x50] sm:$0xff] %vm941_vm0, %v4502_v41 }
 0x522   : > { %v5449_v47 = vunpack.c.l.b16 %v4721_v62 }
 0x524   : > { %v5452_v40 = vpack.c.b16 %v5449_v47, %v5448_v34 }
 0x525   : > { %v4924_v55 = vpop.f32.mrf.mxu0 }
 0x526   : > { %v10089_v37 = vadd.f32 %v4924_v55, %v4873_v1  ;;  %v4439_v35 = vpop.f32.mrf.mxu2  ;;  %5475 = vmatpush.bf16.msra.mxu0 %v5452_v40 }
 0x527   : > { %v4503_v53 = vadd.f32 %v4439_v35, %v9831_v57  ;;  %v10138_v35 = vpop.f32.mrf.mxu1 }
 0x528   : > { %6462 = vmatmul.msk.bf16.gmra.mxu0 %vm941_vm0, %v11089_v14 }
 0x529   : > { %4535 = vst.msk [vmem:[%s9910_s19 + $0x58] sm:$0xff] %vm941_vm0, %v4503_v53  ;;  %v11101_v53 = vld [vmem:[#allocation53_spill] sm:$0xff] }
 0x52a   : > { %v11102_v16 = vpack.c.bf16 %v11100_v4, %v11101_v53 }
 0x52b   : > { %6442 = vmatmul.msk.bf16.gmra.mxu2 %vm941_vm0, %v11092_v33 }
 0x52d   : > { %v4926_v50 = vpop.f32.mrf.mxu0 }
 0x52e   : > { %v10104_v57 = vadd.f32 %v4926_v50, %v4874_v45  ;;  %v4442_v21 = vpop.f32.mrf.mxu2  ;;  %6488 = vmatmul.msk.bf16.vlgmr.msra.gmra.mxu1 %vm941_vm0, %v11095_v32  ;;  %v11106_v32 = vld [vmem:[#allocation74_spill] sm:$0xff] }
 0x52f   : > { %v4504_v41 = vadd.f32 %v4442_v21, %v9851_v38  ;;  %v11098_v38 = vld [vmem:[#allocation76_spill] sm:$0xff]  ;;  %v10160_v33 = vpop.f32.mrf.mxu1 }
 0x530   : > { %v11099_v1 = vpack.c.bf16 %v11034_v10, %v11098_v38  ;;  %v10136_v10 = vpop.f32.mrf.mxu3 }
 0x531   : > { %4536 = vst.msk [vmem:[%s9910_s19 + $0x60] sm:$0xff] %vm941_vm0, %v4504_v41  ;;  %v11107_v41 = vld [vmem:[#allocation67_spill] sm:$0xff] }
 0x535   : > { %v4929_v26 = vpop.f32.mrf.mxu0 }
 0x536   : > { %v10118_v58 = vadd.f32 %v4929_v26, %v4875_v24  ;;  %v4444_v56 = vpop.f32.mrf.mxu2  ;;  %v11109_v24 = vld [vmem:[#allocation68_spill] sm:$0xff]  ;;  %v5579_v26 = vpack.c.bf16 %v5543_v27, %v5543_v27 }
 0x537   : > { %v4505_v42 = vadd.f32 %v4444_v56, %v9861_v18  ;;  %v11111_v31 = vpack.c.bf16 %v11109_v24, %v11110_v2  ;;  %v11112_v2 = vld [vmem:[#allocation91_spill] sm:$0xff] }
 0x538   : > { %6463 = vmatmul.msk.bf16.gmra.mxu0 %vm941_vm0, %v11099_v1  ;;  %v10154_v40 = vpop.f32.mrf.mxu3  ;;  %v5683_v38 = vunpack.c.l.b16 %v5579_v26 }
 0x539   : > { %4537 = vst.msk [vmem:[%s9910_s19 + $0x68] sm:$0xff] %vm941_vm0, %v4505_v42 }
 0x53b   : > { %6443 = vmatmul.msk.bf16.gmra.mxu2 %vm941_vm0, %v4342_v15 }
 0x53d   : > { %v4931_v5 = vpop.f32.mrf.mxu0 }
 0x53e   : > { %v10131_v30 = vadd.f32 %v4931_v5, %v4876_v3  ;;  %v4447_v62 = vpop.f32.mrf.mxu2  ;;  %v5551_v5 = vld [vmem:[#allocation5 + $0x70] sm:$0xff] }
 0x53f   : > { %v4506_v18 = vadd.f32 %v4447_v62, %v9875_v25  ;;  %v11103_v25 = vld [vmem:[#allocation50_spill] sm:$0xff]  ;;  %v5552_v62 = vld [vmem:[#allocation5 + $0x78] sm:$0xff] }
 0x540   : > { %v11105_v14 = vpack.c.bf16 %v11103_v25, %v11104_v51  ;;  %v10164_v50 = vpop.f32.mrf.mxu3 }
 0x541   : > { %4538 = vst.msk [vmem:[%s9910_s19 + $0x70] sm:$0xff] %vm941_vm0, %v4506_v18 }
 0x545   : > { %v5060_v55 = vpop.f32.mrf.mxu0 }
 0x546   : > { %v10141_v34 = vadd.f32 %v5060_v55, %v10030_v44  ;;  %v4449_v47 = vpop.f32.mrf.mxu2 }
 0x547   : > { %v4507_v9 = vadd.f32 %v4449_v47, %v9883_v52  ;;  %v5587_v47 = vpack.c.bf16 %v5551_v5, %v5551_v5 }
 0x548   : > { %6476 = vmatmul.msk.bf16.vlgmr.msra.gmra.mxu0 %vm941_vm0, %v11102_v16  ;;  %v10186_v18 = vpop.f32.mrf.mxu3  ;;  %v5549_v16 = vld [vmem:[#allocation5 + $0x60] sm:$0xff] }
 0x549   : > { %4539 = vst.msk [vmem:[%s9910_s19 + $0x78] sm:$0xff] %vm941_vm0, %v4507_v9  ;;  %v5588_v9 = vpack.c.bf16 %v5552_v62, %v5552_v62  ;;  %v5777_v4 = vunpack.c.l.b16 %v5587_v47  ;;  %v5567_v47 = vld [vmem:[#allocation5 + $0xf0] sm:$0xff] }
 0x54b   : > { %6468 = vmatmul.msk.bf16.vlgmr.msrb.gmra.mxu2 %vm941_vm0, %v11105_v14  ;;  %v5778_v53 = vunpack.c.l.b16 %v5588_v9  ;;  %v5585_v14 = vpack.c.bf16 %v5549_v16, %v5549_v16  ;;  %v5568_v9 = vld [vmem:[#allocation5 + $0xf8] sm:$0xff] }
 0x54d   : > { %v5062_v44 = vpop.f32.mrf.mxu0  ;;  %v5780_v51 = vpack.c.b16 %v5778_v53, %v5777_v4  ;;  %v5603_v4 = vpack.c.bf16 %v5567_v47, %v5567_v47  ;;  %v5604_v53 = vpack.c.bf16 %v5568_v9, %v5568_v9 }
 0x54e   : > { %v10157_v6 = vadd.f32 %v5062_v44, %v10042_v48  ;;  %v4452_v52 = vpop.f32.mrf.mxu2  ;;  %v11108_v48 = vpack.c.bf16 %v11106_v32, %v11107_v41  ;;  %v5542_v32 = vld [vmem:[#allocation5 + $0x28] sm:$0xff] }
 0x54f   : > { %v4508_v23 = vadd.f32 %v4452_v52, %v9901_v54  ;;  %v10176_v54 = vpop.f32.mrf.mxu1  ;;  %5792 = vmatpush.bf16.msrb.mxu0 %v5780_v51  ;;  %v5578_v24 = vpack.c.bf16 %v5542_v32, %v5542_v32  ;;  %v5921_v16 = vunpack.c.l.b16 %v5603_v4  ;;  %v5559_v51 = vld [vmem:[#allocation5 + $0xb0] sm:$0xff]  ;;  %v11121_v4 = vld [vmem:[#allocation94_spill] sm:$0xff] }
 0x551   : > { %4540 = vst.msk [vmem:[%s9910_s19 + $0x80] sm:$0xff] %vm941_vm0, %v4508_v23  ;;  %v5682_v26 = vunpack.c.l.b16 %v5578_v24 }
 0x555   : > { %v5065_v45 = vpop.f32.mrf.mxu0 }
 0x556   : > { %v10167_v21 = vadd.f32 %v5065_v45, %v10053_v19  ;;  %v4454_v43 = vpop.f32.mrf.mxu2  ;;  %v5544_v19 = vld [vmem:[#allocation5 + $0x38] sm:$0xff]  ;;  %v5775_v45 = vunpack.c.l.b16 %v5585_v14 }
 0x557   : > { %v4509_v49 = vadd.f32 %v4454_v43, %v9915_v59  ;;  %v5580_v56 = vpack.c.bf16 %v5544_v19, %v5544_v19  ;;  %v10190_v25 = vpop.f32.mrf.mxu1  ;;  %v5560_v14 = vld [vmem:[#allocation5 + $0xb8] sm:$0xff] }
 0x558   : > { %6477 = vmatmul.msk.bf16.gmra.mxu0 %vm941_vm0, %v11108_v48 }
 0x559   : > { %4541 = vst.msk [vmem:[%s9910_s19 + $0x88] sm:$0xff] %vm941_vm0, %v4509_v49  ;;  %v5684_v1 = vunpack.c.l.b16 %v5580_v56  ;;  %v5541_v49 = vld [vmem:[#allocation5 + $0x20] sm:$0xff]  ;;  %v10202_v56 = vpop.f32.mrf.mxu3 }
 0x55a   : > { %v5577_v48 = vpack.c.bf16 %v5541_v49, %v5541_v49 }
 0x55b   : > { %6469 = vmatmul.msk.bf16.gmra.mxu2 %vm941_vm0, %v11111_v31  ;;  %v5686_v55 = vpack.c.b16 %v5684_v1, %v5683_v38  ;;  %v11113_v31 = vld [vmem:[#allocation82_spill] sm:$0xff] }
 0x55c   : > { %v11114_v27 = vpack.c.bf16 %v11112_v2, %v11113_v31 }
 0x55d   : > { %v5067_v59 = vpop.f32.mrf.mxu0  ;;  %5698 = vmatpush.bf16.msra.mxu2 %v5686_v55 }
 0x55e   : > { %v10183_v42 = vadd.f32 %v5067_v59, %v10068_v7  ;;  %v4457_v15 = vpop.f32.mrf.mxu2  ;;  %v5550_v7 = vld [vmem:[#allocation5 + $0x68] sm:$0xff]  ;;  %v11115_v59 = vld [vmem:[#allocation83_spill] sm:$0xff] }
 0x55f   : > { %v4510_v3 = vadd.f32 %v4457_v15, %v9935_v20  ;;  %v5586_v20 = vpack.c.bf16 %v5550_v7, %v5550_v7  ;;  %v11116_v15 = vld [vmem:[#allocation75_spill] sm:$0xff]  ;;  %v5922_v7 = vunpack.c.l.b16 %v5604_v53  ;;  %v11122_v53 = vld [vmem:[#allocation93_spill] sm:$0xff] }
 0x560   : > { %v11117_v38 = vpack.c.bf16 %v11115_v59, %v11116_v15 }
 0x561   : > { %4542 = vst.msk [vmem:[%s9910_s19 + $0x90] sm:$0xff] %vm941_vm0, %v4510_v3  ;;  %v5776_v43 = vunpack.c.l.b16 %v5586_v20  ;;  %v10208_v3 = vpop.f32.mrf.mxu1  ;;  %v5595_v20 = vpack.c.bf16 %v5559_v51, %v5559_v51 }
 0x563   : > { %v5779_v19 = vpack.c.b16 %v5776_v43, %v5775_v45  ;;  %v5566_v45 = vld [vmem:[#allocation5 + $0xe8] sm:$0xff]  ;;  %v10216_v43 = vpop.f32.mrf.mxu3 }
 0x564   : > { %v5602_v32 = vpack.c.bf16 %v5566_v45, %v5566_v45 }
 0x565   : > { %v5070_v44 = vpop.f32.mrf.mxu0  ;;  %5793 = vmatpush.bf16.msrb.mxu0 %v5779_v19  ;;  %v5557_v19 = vld [vmem:[#allocation5 + $0xa0] sm:$0xff] }
 0x566   : > { %v10193_v52 = vadd.f32 %v5070_v44, %v10089_v37  ;;  %v4459_v23 = vpop.f32.mrf.mxu2  ;;  %v5681_v37 = vunpack.c.l.b16 %v5577_v48  ;;  %v5596_v44 = vpack.c.bf16 %v5560_v14, %v5560_v14  ;;  %v5593_v15 = vpack.c.bf16 %v5557_v19, %v5557_v19 }
 0x567   : > { %v4511_v41 = vadd.f32 %v4459_v23, %v9965_v61  ;;  %v5565_v23 = vld [vmem:[#allocation5 + $0xe0] sm:$0xff] }
 0x568   : > { %6478 = vmatmul.msk.bf16.gmra.mxu0 %vm941_vm0, %v11114_v27  ;;  %v5685_v61 = vpack.c.b16 %v5682_v26, %v5681_v37  ;;  %v5601_v49 = vpack.c.bf16 %v5565_v23, %v5565_v23  ;;  %v5850_v48 = vunpack.c.l.b16 %v5596_v44  ;;  %v5920_v27 = vunpack.c.l.b16 %v5602_v32  ;;  %v5558_v37 = vld [vmem:[#allocation5 + $0xa8] sm:$0xff] }
 0x569   : > { %4543 = vst.msk [vmem:[%s9910_s19 + $0x98] sm:$0xff] %vm941_vm0, %v4511_v41  ;;  %v5849_v41 = vunpack.c.l.b16 %v5595_v20  ;;  %v5847_v47 = vunpack.c.l.b16 %v5593_v15 }
 0x56a   : > { %5699 = vmatpush.bf16.msra.mxu2 %v5685_v61  ;;  %v5919_v31 = vunpack.c.l.b16 %v5601_v49  ;;  %v4250_v61 = vpop.f32.mrf.mxu1 }
 0x56b   : > { %6470 = vmatmul.msk.bf16.gmra.mxu2 %vm941_vm0, %v11117_v38  ;;  %v5852_v59 = vpack.c.b16 %v5850_v48, %v5849_v41  ;;  %v5594_v38 = vpack.c.bf16 %v5558_v37, %v5558_v37  ;;  %v10234_v14 = vpop.f32.mrf.mxu3  ;;  %v11125_v41 = vld [vmem:[#allocation22_spill] sm:$0xff]  ;;  %v5913_v37 = vrot.slane %v11033_v36, 2  ;;  %v11129_v36 = vld [vmem:[#allocation35_spill] sm:$0xff] }
 0x56d   : > { %v5072_v1 = vpop.f32.mrf.mxu0  ;;  %v5848_v9 = vunpack.c.l.b16 %v5594_v38 }
 0x56e   : > { %v10211_v5 = vadd.f32 %v5072_v1, %v10104_v57  ;;  %v4462_v62 = vpop.f32.mrf.mxu2  ;;  %v5924_v57 = vpack.c.b16 %v5922_v7, %v5921_v16  ;;  %v11118_v1 = vld [vmem:[#allocation86_spill] sm:$0xff]  ;;  %5864 = vmatpush.bf16.msrb.mxu2 %v5852_v59  ;;  %v4285_v7 = vadd.f32 %v10138_v35, %v9781_v39  ;;  %v4288_v59 = vadd.f32 %v10190_v25, %v9822_v46 }
 0x56f   : > { %v4512_v55 = vadd.f32 %v4462_v62, %v9985_v8  ;;  %v11119_v62 = vld [vmem:[#allocation92_spill] sm:$0xff]  ;;  %v5851_v16 = vpack.c.b16 %v5848_v9, %v5847_v47  ;;  %v4289_v46 = vadd.f32 %v10208_v3, %v9836_v12  ;;  %v4158_v3 = vadd.f32 %v10136_v10, %v9858_v29 }
 0x570   : > { %5936 = vmatpush.bf16.msra.mxu0 %v5924_v57  ;;  %v4286_v57 = vadd.f32 %v10160_v33, %v9794_v13  ;;  %v4287_v13 = vadd.f32 %v10176_v54, %v9802_v60 }
 0x571   : > { %4544 = vst.msk [vmem:[%s9910_s19 + $0xa0] sm:$0xff] %vm941_vm0, %v4512_v55  ;;  %v11120_v55 = vpack.c.bf16 %v11118_v1, %v11119_v62  ;;  %v11128_v62 = vld [vmem:[#allocation36_spill] sm:$0xff] }
 0x572   : > { %5865 = vmatpush.bf16.msrb.mxu2 %v5851_v16  ;;  %v4253_v45 = vpop.f32.mrf.mxu1 }
 0x573   : > { %v10245_v35 = vpop.f32.mrf.mxu3 }
 0x575   : > { %v5075_v8 = vpop.f32.mrf.mxu0 }
 0x576   : > { %v10219_v24 = vadd.f32 %v5075_v8, %v10118_v58  ;;  %v4464_v2 = vpop.f32.mrf.mxu2  ;;  %v5923_v58 = vpack.c.b16 %v5920_v27, %v5919_v31  ;;  %v11124_v8 = vld [vmem:[#allocation33_spill] sm:$0xff] }
 0x577   : > { %v4513_v26 = vadd.f32 %v4464_v2, %v9997_v63  ;;  %v11123_v63 = vpack.c.bf16 %v11121_v4, %v11122_v53  ;;  %v11126_v48 = vpack.c.bf16 %v11124_v8, %v11125_v41  ;;  %v4290_v4 = vadd.f32 %v4250_v61, %v9856_v28 }
 0x578   : > { %6479 = vmatmul.msk.bf16.gmra.mxu0 %vm941_vm0, %v11120_v55  ;;  %v11130_v55 = vpack.c.bf16 %v11128_v62, %v11129_v36  ;;  %v4159_v61 = vadd.f32 %v10154_v40, %v9868_v0  ;;  %v4160_v41 = vadd.f32 %v10164_v50, %v9879_v22  ;;  %v4161_v40 = vadd.f32 %v10186_v18, %v9893_v17 }
 0x579   : > { %4545 = vst.msk [vmem:[%s9910_s19 + $0xa8] sm:$0xff] %vm941_vm0, %v4513_v26  ;;  %5937 = vmatpush.bf16.msra.mxu0 %v5923_v58  ;;  %v5912_v26 = vrot.slane %v11086_v11, 2 }
 0x57a   : > { %v4255_v2 = vpop.f32.mrf.mxu1 }
 0x57b   : > { %6471 = vmatmul.msk.bf16.gmra.mxu2 %vm941_vm0, %v11123_v63  ;;  %v10261_v19 = vpop.f32.mrf.mxu3  ;;  %v5914_v1 = vsel %vm5673_vm10, %v5912_v26, %v5913_v37  ;;  %v5156_v37 = vadd.f32 %v10202_v56, %v10141_v34 }
 0x57d   : > { %v5077_v51 = vpop.f32.mrf.mxu0 }
 0x57e   : > { %v10237_v20 = vadd.f32 %v5077_v51, %v10131_v30  ;;  %v4467_v44 = vpop.f32.mrf.mxu2  ;;  %v11127_v30 = vld [vmem:[#allocation34_spill] sm:$0xff]  ;;  %v4291_v51 = vadd.f32 %v4253_v45, %v4158_v3 }
 0x57f   : > { %v4514_v23 = vadd.f32 %v4467_v44, %v4285_v7 }
 0x581   : > { %4546 = vst.msk [vmem:[%s9910_s19 + $0xb0] sm:$0xff] %vm941_vm0, %v4514_v23 }
 0x582   : > { %v4258_v38 = vpop.f32.mrf.mxu1 }
 0x583   : > { %v10277_v11 = vpop.f32.mrf.mxu3 }
 0x585   : > { %v10243_v49 = vpop.f32.mrf.mxu0 }
 0x586   : > { %v4469_v32 = vpop.f32.mrf.mxu2 }
 0x587   : > { %v4515_v39 = vadd.f32 %v4469_v32, %v4286_v57 }
 0x588   : > { %6483 = vmatmul.msk.bf16.vlgmr.msrb.gmra.mxu0 %vm941_vm0, %v11126_v48  ;;  %v4293_v48 = vadd.f32 %v4258_v38, %v4160_v41  ;;  %v5221_v38 = vadd.f32 %v10243_v49, %v5156_v37 }
 0x589   : > { %4547 = vst.msk [vmem:[%s9910_s19 + $0xb8] sm:$0xff] %vm941_vm0, %v4515_v39  ;;  %v4292_v39 = vadd.f32 %v4255_v2, %v4159_v61 }
 0x58a   : > { %v4260_v9 = vpop.f32.mrf.mxu1 }
 0x58b   : > { %6481 = vmatmul.msk.bf16.vlgmr.msra.gmra.mxu2 %vm941_vm0, %v11127_v30  ;;  %v10288_v63 = vpop.f32.mrf.mxu3  ;;  %v4294_v22 = vadd.f32 %v4260_v9, %v4161_v40 }
 0x58d   : > { %v10257_v33 = vpop.f32.mrf.mxu0 }
 0x58e   : > { %v4472_v31 = vpop.f32.mrf.mxu2 }
 0x58f   : > { %v4516_v27 = vadd.f32 %v4472_v31, %v4287_v13 }
 0x591   : > { %4548 = vst.msk [vmem:[%s9910_s19 + $0xc0] sm:$0xff] %vm941_vm0, %v4516_v27 }
 0x592   : > { %v5276_v12 = vpop.f32.mrf.mxu1 }
 0x593   : > { %v10296_v28 = vpop.f32.mrf.mxu3 }
 0x595   : > { %v10267_v15 = vpop.f32.mrf.mxu0 }
 0x596   : > { %v4474_v60 = vpop.f32.mrf.mxu2 }
 0x597   : > { %v4517_v54 = vadd.f32 %v4474_v60, %v4288_v59 }
 0x598   : > { %6487 = vmatmul.msk.bf16.vlgmr.msra.gmra.mxu0 %vm941_vm0, %v5914_v1 }
 0x599   : > { %4549 = vst.msk [vmem:[%s9910_s19 + $0xc8] sm:$0xff] %vm941_vm0, %v4517_v54 }
 0x59a   : > { %v5278_v32 = vpop.f32.mrf.mxu1 }
 0x59b   : > { %6485 = vmatmul.msk.bf16.vlgmr.msrb.gmra.mxu2 %vm941_vm0, %v11130_v55  ;;  %v5404_v45 = vpop.f32.mrf.mxu3 }
 0x59d   : > { %v10281_v25 = vpop.f32.mrf.mxu0 }
 0x59e   : > { %v4477_v58 = vpop.f32.mrf.mxu2 }
 0x59f   : > { %v4518_v47 = vadd.f32 %v4477_v58, %v4289_v46 }
 0x5a1   : > { %4550 = vst.msk [vmem:[%s9910_s19 + $0xd0] sm:$0xff] %vm941_vm0, %v4518_v47 }
 0x5a2   : > { %v5281_v13 = vpop.f32.mrf.mxu1 }
 0x5a3   : > { %v5406_v2 = vpop.f32.mrf.mxu3 }
 0x5a5   : > { %v10286_v53 = vpop.f32.mrf.mxu0 }
 0x5a6   : > { %v4479_v16 = vpop.f32.mrf.mxu2 }
 0x5a7   : > { %v4519_v7 = vadd.f32 %v4479_v16, %v4290_v4 }
 0x5a9   : > { %4551 = vst.msk [vmem:[%s9910_s19 + $0xd8] sm:$0xff] %vm941_vm0, %v4519_v7 }
 0x5aa   : > { %v5283_v59 = vpop.f32.mrf.mxu1 }
 0x5ad   : > { %v10294_v44 = vpop.f32.mrf.mxu0 }
 0x5ae   : > { %v4482_v23 = vpop.f32.mrf.mxu2 }
 0x5af   : > { %v4520_v57 = vadd.f32 %v4482_v23, %v4291_v51 }
 0x5b1   : > { %4552 = vst.msk [vmem:[%s9910_s19 + $0xe0] sm:$0xff] %vm941_vm0, %v4520_v57 }
 0x5b5   : > { %v10302_v8 = vpop.f32.mrf.mxu0 }
 0x5b6   : > { %v4484_v29 = vpop.f32.mrf.mxu2 }
 0x5b7   : > { %v4521_v10 = vadd.f32 %v4484_v29, %v4292_v39 }
 0x5b9   : > { %4553 = vst.msk [vmem:[%s9910_s19 + $0xe8] sm:$0xff] %vm941_vm0, %v4521_v10 }
 0x5bd   : > { %v10308_v30 = vpop.f32.mrf.mxu0 }
 0x5be   : > { %v4487_v31 = vpop.f32.mrf.mxu2 }
 0x5bf   : > { %v4522_v0 = vadd.f32 %v4487_v31, %v4293_v48 }
 0x5c1   : > { %4554 = vst.msk [vmem:[%s9910_s19 + $0xf0] sm:$0xff] %vm941_vm0, %v4522_v0 }
 0x5c5   : > { %v5477_v50 = vpop.f32.mrf.mxu0 }
 0x5c6   : > { %v4489_v27 = vpop.f32.mrf.mxu2 }
 0x5c7   : > { %v4523_v26 = vadd.f32 %v4489_v27, %v4294_v22 }
 0x5c9   : > { %4555 = vst.msk [vmem:[%s9910_s19 + $0xf8] sm:$0xff] %vm941_vm0, %v4523_v26 }
 0x5ca   : > { %6716 = shalt.err (!%p6713_p12)
}
 0x5cb   : > { %s10672_s19 = smov 128   ;;  %s6830_s16 = smov 8   ;;  %v5296_v34 = vadd.f32 %v5276_v12, %v5221_v38  ;;  %v5409_v18 = vpop.f32.mrf.mxu3  ;;  %v5157_v49 = vadd.f32 %v10216_v43, %v10157_v6  ;;  %v5286_v62 = vpop.f32.mrf.mxu1  ;;  %v5158_v47 = vadd.f32 %v10234_v14, %v10167_v21  ;;  %v5159_v51 = vadd.f32 %v10245_v35, %v10183_v42 }
 0x5cc   : > { %6516 = dma.vmem_to_hbm [thread:$0]  (%p6999_p3), %s6008_s2, 4096, %s6010_s23, %s5985_s20, %s10672_s19, %s10672_s19, %s6830_s16   ;;  %v5160_v10 = vadd.f32 %v10261_v19, %v10193_v52  ;;  %v5161_v0 = vadd.f32 %v10277_v11, %v10211_v5  ;;  %v5162_v37 = vadd.f32 %v10288_v63, %v10219_v24 }
 0x5cd   : > { %v5479_v17 = vpop.f32.mrf.mxu0  ;;  %s6236_s14 = sshll.u32 %s7029_s13, 6  ;;  %v5222_v54 = vadd.f32 %v10257_v33, %v5157_v49  ;;  %v5223_v33 = vadd.f32 %v10267_v15, %v5158_v47  ;;  %v5224_v21 = vadd.f32 %v10281_v25, %v5159_v51  ;;  %s6504_s2 = sshll.u32 %s6952_s1, 6 }
 0x5ce   : > { %v5351_v56 = vpop.f32.mrf.mxu2  ;;  %s10342_s22 = scalar_lea.vmem [#allocation9], %s6236_s14  ;;  %v5225_v42 = vadd.f32 %v10286_v53, %v5160_v10  ;;  %v5226_v52 = vadd.f32 %v10294_v44, %v5161_v0  ;;  %v5227_v5 = vadd.f32 %v10302_v8, %v5162_v37  ;;  %s11131_s27 = sld [smem:[#allocation181_spill]] }
 0x5cf   : > { %v5371_v60 = vadd.f32 %v5351_v56, %v5296_v34  ;;  %v5297_v46 = vadd.f32 %v5278_v32, %v5222_v54  ;;  %v5298_v12 = vadd.f32 %v5281_v13, %v5223_v33  ;;  %v5299_v32 = vadd.f32 %v5283_v59, %v5224_v21  ;;  %s5989_s24 = sand.u32 1, %s6952_s1   ;;  %s6024_s3 = sshll.u32 %s10342_s22, 4  ;;  %s6025_s3 = int_to_ptr.vmem [resolvable:$true] %s6024_s3 }
 0x5d0   : > { %v5300_v25 = vadd.f32 %v5286_v62, %v5225_v42  ;;  %s11132_s14 = sld [smem:[#allocation179_spill]] }
 0x5d1   : > { %v5424_v1 = vadd.f32 %v5404_v45, %v5371_v60 }
 0x5d3   : > { %v5497_v36 = vadd.f32 %v5477_v50, %v5424_v1  ;;  %v5411_v43 = vpop.f32.mrf.mxu3  ;;  %v5288_v16 = vpop.f32.mrf.mxu1 }
 0x5d4   : > { %v5301_v53 = vadd.f32 %v5288_v16, %v5226_v52  ;;  %s6023_s25 = scalar_lea.hbm %s11131_s27, %s6504_s2  ;;  %s10387_s2 = scalar_lea.sflag [#allocation10], %s5989_s24 }
 0x5d5   : > { %5505 = vst.msk [vmem:[%s10342_s22] sm:$0xff] %vm941_vm0, %v5497_v36  ;;  %v5482_v55 = vpop.f32.mrf.mxu0  ;;  %s6026_s18 = sshll.u32 %s6023_s25, 4  ;;  %s6737_s0 = scalar_lea.hbm %s11131_s27, 128  ;;  %s6027_s18 = int_to_ptr.hbm [resolvable:$true] %s6026_s18 }
 0x5d6   : > { %v5353_v58 = vpop.f32.mrf.mxu2  ;;  %s6731_s23 = sshra.s32 %s6027_s18, 4  ;;  %s6732_s23 = int_to_ptr.hbm [resolvable:$true] %s6731_s23 }
 0x5d7   : > { %v5372_v6 = vadd.f32 %v5353_v58, %v5297_v46  ;;  %s6733_s20 = scalar_lea.hbm %s6732_s23, 64  ;;  %p6738_p7 = scmp.lt.s32.totalorder %s6732_s23, %s11131_s27 }
 0x5d8   : > { %p6734_p13 = scmp.ne.s32.totalorder %s6732_s23, %s6733_s20  ;;  %p6739_p1 = scmp.lt.s32.totalorder %s6737_s0, %s6733_s20 }
 0x5d9   : > { %v5425_v9 = vadd.f32 %v5406_v2, %v5372_v6 }
 0x5da   : > { %p6735_p0 = pnand %p6734_p13, %p6999_p3  ;;  %p6740_p4 = por %p6739_p1, %p6738_p7 }
 0x5db   : > { %v5498_v4 = vadd.f32 %v5479_v17, %v5425_v9  ;;  %v5414_v57 = vpop.f32.mrf.mxu3  ;;  %v5291_v39 = vpop.f32.mrf.mxu1 }
 0x5dc   : > { %v5302_v44 = vadd.f32 %v5291_v39, %v5227_v5  ;;  %p6736_p5 = pneg %p6735_p0 }
 0x5dd   : > { %5506 = vst.msk [vmem:[%s10342_s22 + $0x8] sm:$0xff] %vm941_vm0, %v5498_v4  ;;  %v5484_v7 = vpop.f32.mrf.mxu0 }
 0x5de   : > { %v5356_v3 = vpop.f32.mrf.mxu2  ;;  %p6741_p8 = pnand %p6740_p4, %p6736_p5 }
 0x5df   : > { %v5373_v23 = vadd.f32 %v5356_v3, %v5298_v12 }
 0x5e1   : > { %v5426_v14 = vadd.f32 %v5409_v18, %v5373_v23  ;;  %v5163_v18 = vadd.f32 %v10296_v28, %v10237_v20 }
 0x5e3   : > { %v5499_v61 = vadd.f32 %v5482_v55, %v5426_v14  ;;  %v5416_v48 = vpop.f32.mrf.mxu3  ;;  %v5293_v2 = vpop.f32.mrf.mxu1  ;;  %v5228_v63 = vadd.f32 %v10308_v30, %v5163_v18  ;;  %v6596_v30 = vld [vmem:[%s11132_s14] ss:$0 sm:$0xff] }
 0x5e5   : > { %5507 = vst.msk [vmem:[%s10342_s22 + $0x10] sm:$0xff] %vm941_vm0, %v5499_v61  ;;  %v5487_v15 = vpop.f32.mrf.mxu0  ;;  %v5303_v1 = vadd.f32 %v5293_v2, %v5228_v63 }
 0x5e6   : > { %v5358_v29 = vpop.f32.mrf.mxu2 }
 0x5e7   : > { %v5374_v45 = vadd.f32 %v5358_v29, %v5299_v32 }
 0x5e9   : > { %v5427_v35 = vadd.f32 %v5411_v43, %v5374_v45 }
 0x5eb   : > { %v5500_v41 = vadd.f32 %v5484_v7, %v5427_v35  ;;  %v5419_v50 = vpop.f32.mrf.mxu3  ;;  %v5662_v38 = vpop.f32.mrf.mxu1 }
 0x5ed   : > { %5508 = vst.msk [vmem:[%s10342_s22 + $0x18] sm:$0xff] %vm941_vm0, %v5500_v41  ;;  %v5489_v13 = vpop.f32.mrf.mxu0 }
 0x5ee   : > { %v5361_v31 = vpop.f32.mrf.mxu2 }
 0x5ef   : > { %v5375_v40 = vadd.f32 %v5361_v31, %v5300_v25 }
 0x5f1   : > { %v5428_v19 = vadd.f32 %v5414_v57, %v5375_v40 }
 0x5f3   : > { %v5501_v22 = vadd.f32 %v5487_v15, %v5428_v19  ;;  %v5421_v24 = vpop.f32.mrf.mxu3  ;;  %v5664_v54 = vpop.f32.mrf.mxu1 }
 0x5f5   : > { %5509 = vst.msk [vmem:[%s10342_s22 + $0x20] sm:$0xff] %vm941_vm0, %v5501_v22  ;;  %v5492_v59 = vpop.f32.mrf.mxu0 }
 0x5f6   : > { %v5363_v27 = vpop.f32.mrf.mxu2 }
 0x5f7   : > { %v5376_v26 = vadd.f32 %v5363_v27, %v5301_v53 }
 0x5f9   : > { %v5429_v11 = vadd.f32 %v5416_v48, %v5376_v26 }
 0x5fb   : > { %v5502_v17 = vadd.f32 %v5489_v13, %v5429_v11  ;;  %v5755_v28 = vpop.f32.mrf.mxu3  ;;  %v5827_v58 = vpop.f32.mrf.mxu1 }
 0x5fd   : > { %5510 = vst.msk [vmem:[%s10342_s22 + $0x28] sm:$0xff] %vm941_vm0, %v5502_v17  ;;  %v5494_v60 = vpop.f32.mrf.mxu0 }
 0x5fe   : > { %v5366_v34 = vpop.f32.mrf.mxu2 }
 0x5ff   : > { %v5377_v56 = vadd.f32 %v5366_v34, %v5302_v44 }
 0x601   : > { %v5430_v49 = vadd.f32 %v5419_v50, %v5377_v56 }
 0x603   : > { %v5503_v8 = vadd.f32 %v5492_v59, %v5430_v49 }
 0x605   : > { %5511 = vst.msk [vmem:[%s10342_s22 + $0x30] sm:$0xff] %vm941_vm0, %v5503_v8  ;;  %v5795_v46 = vpop.f32.mrf.mxu0 }
 0x606   : > { %v5368_v62 = vpop.f32.mrf.mxu2 }
 0x607   : > { %v5378_v36 = vadd.f32 %v5368_v62, %v5303_v1 }
 0x609   : > { %v5431_v20 = vadd.f32 %v5421_v24, %v5378_v36 }
 0x60b   : > { %v5504_v55 = vadd.f32 %v5494_v60, %v5431_v20 }
 0x60d   : > { %5512 = vst.msk [vmem:[%s10342_s22 + $0x38] sm:$0xff] %vm941_vm0, %v5504_v55 }
 0x60e   : > { %v5701_v47 = vpop.f32.mrf.mxu2 }
 0x60f   : > { %6744 = shalt.err (!%p6741_p8)
}
 0x610   : > { %s11133_s22 = smov 128   ;;  %v5667_v6 = vadd.f32 %v6596_v30, %v5662_v38  ;;  %v5757_v33 = vpop.f32.mrf.mxu3  ;;  %v5797_v4 = vpop.f32.mrf.mxu0  ;;  %v5668_v7 = vadd.f32 %v6596_v30, %v5664_v54  ;;  %s6237_s19 = sshll.u32 %s7029_s13, 4 }
 0x611   : > { %6517 = dma.vmem_to_hbm [thread:$0]  (%p6999_p3), %s6025_s3, 1024, %s6027_s18, %s10387_s2, %s11133_s22, %s11133_s22, %s6830_s16   ;;  %v5829_v12 = vpop.f32.mrf.mxu1 }
 0x612   : > { %v5706_v43 = vadd.f32 %v5701_v47, %v5667_v6  ;;  %s6505_s24 = sshll.u32 %s6952_s1, 4  ;;  %s703_s3 = scalar_lea.vmem [#allocation11], %s6237_s19 }
 0x613   : > { %s11134_s20 = sld [smem:[#allocation182_spill]]  ;;  %s6041_s13 = sshll.u32 %s703_s3, 4  ;;  %s6042_s13 = int_to_ptr.vmem [resolvable:$true] %s6041_s13 }
 0x614   : > { %v5760_v9 = vadd.f32 %v5755_v28, %v5706_v43 }
 0x616   : > { %v5703_v16 = vpop.f32.mrf.mxu2  ;;  %v5800_v51 = vadd.f32 %v5795_v46, %v5760_v9 }
 0x617   : > { %v5707_v3 = vadd.f32 %v5703_v16, %v5668_v7 }
 0x618   : > { %v5832_v21 = vadd.f32 %v5827_v58, %v5800_v51  ;;  %v5903_v14 = vpop.f32.mrf.mxu3  ;;  %v5939_v15 = vpop.f32.mrf.mxu0 }
 0x619   : > { %v5761_v23 = vadd.f32 %v5757_v33, %v5707_v3  ;;  %v5975_v29 = vpop.f32.mrf.mxu1  ;;  %s11135_s25 = smov %s11134_s20  ;;  %s6040_s26 = scalar_lea.hbm %s11134_s20, %s6505_s24 }
 0x61a   : > { %s6043_s0 = sshll.u32 %s6040_s26, 4  ;;  %s6765_s18 = scalar_lea.hbm %s11135_s25, 32  ;;  %s6044_s0 = int_to_ptr.hbm [resolvable:$true] %s6043_s0 }
 0x61b   : > { %v5801_v39 = vadd.f32 %v5797_v4, %v5761_v23  ;;  %s6759_s1 = sshra.s32 %s6044_s0, 4  ;;  %s6760_s1 = int_to_ptr.hbm [resolvable:$true] %s6759_s1 }
 0x61c   : > { %s6761_s14 = scalar_lea.hbm %s6760_s1, 16  ;;  %p6766_p10 = scmp.lt.s32.totalorder %s6760_s1, %s11135_s25 }
 0x61d   : > { %v5833_v42 = vadd.f32 %v5829_v12, %v5801_v39  ;;  %p6762_p11 = scmp.ne.s32.totalorder %s6760_s1, %s6761_s14  ;;  %p6767_p12 = scmp.lt.s32.totalorder %s6765_s18, %s6761_s14 }
 0x61e   : > { %v5867_v57 = vpop.f32.mrf.mxu2 }
 0x61f   : > { %v5872_v61 = vadd.f32 %v5867_v57, %v5832_v21  ;;  %p6763_p2 = pnand %p6762_p11, %p6999_p3  ;;  %p6768_p13 = por %p6767_p12, %p6766_p10 }
 0x620   : > { %v5905_v48 = vpop.f32.mrf.mxu3  ;;  %v5941_v13 = vpop.f32.mrf.mxu0 }
 0x621   : > { %v5908_v32 = vadd.f32 %v5903_v14, %v5872_v61  ;;  %v5977_v0 = vpop.f32.mrf.mxu1  ;;  %p6764_p9 = pneg %p6763_p2 }
 0x623   : > { %v5944_v10 = vadd.f32 %v5939_v15, %v5908_v32  ;;  %p6769_p0 = pnand %p6768_p13, %p6764_p9 }
 0x625   : > { %v5980_v45 = vadd.f32 %v5975_v29, %v5944_v10 }
 0x626   : > { %v5869_v35 = vpop.f32.mrf.mxu2 }
 0x627   : > { %5982 = vst.msk [vmem:[%s703_s3] sm:$0xff] %vm941_vm0, %v5980_v45  ;;  %v5873_v41 = vadd.f32 %v5869_v35, %v5833_v42 }
 0x629   : > { %v5909_v25 = vadd.f32 %v5905_v48, %v5873_v41 }
 0x62b   : > { %v5945_v31 = vadd.f32 %v5941_v13, %v5909_v25 }
 0x62d   : > { %v5981_v40 = vadd.f32 %v5977_v0, %v5945_v31 }
 0x62f   : > { %5983 = vst.msk [vmem:[%s703_s3 + $0x8] sm:$0xff] %vm941_vm0, %v5981_v40 }
 0x630   : > { %6772 = shalt.err (!%p6769_p0)
}
 0x631   : > { %6518 = dma.vmem_to_hbm [thread:$0]  (%p6999_p3), %s6042_s13, 256, %s6044_s0, %s10387_s2, %s11133_s22, %s11133_s22, %s6830_s16  }
 0x632 PF: > { %s11136_s3 = sld [smem:[#allocation16_spill]]  ;;  %p11138_p5 = scmp.ge.s32.totalorder %s6819_s21, 2 }
 0x634   : > { %p6534_p7 = pnand %p11138_p5, %p6968_p6 }
 0x636   : > { %p6535_p1 = pneg %p6534_p7 }
 0x638   : > { %s6058_s19 = sand.u32 1, %s11136_s3  }
 0x639   : > { %s6059_s1 = scalar_lea.sflag [#allocation4], %s6058_s19 }
 0x63a   : > { %6798 = dma.done.wait (%p6535_p1), %s6059_s1, 4096  }
 0x63b   : > { %6800 = vsyncadd (%p6535_p1), %s6059_s1, 4294963200  ;;  %s11139_s14 = sadd.s32 4294967294, %s6819_s21  }
 0x63c   : > { %s6068_s29 = sand.u32 1, %s11139_s14  }
 0x63d   : > { %s6069_s24 = scalar_lea.sflag [#allocation10], %s6068_s29 }
 0x63e   : > { %6802 = dma.done.wait (%p6535_p1), %s6069_s24, 1280  }
 0x63f   : > { %6804 = vsyncadd (%p6535_p1), %s6069_s24, 4294966016  ;;  %s11140_s21 = sld [smem:[#allocation19_spill]]  ;;  %s11143_s0 = smov %s6811_s30 }
 0x640   : > { %s11141_s16 = sld [smem:[#allocation17_spill]] }
 0x641   : > { %s11142_s20 = sld [smem:[#allocation20_spill]] }
 0x645   : > { %p37_p3 = scmp.ge.s32.totalorder %s11140_s21, 4  }
 0x646   : > { %s11144_s30 = smov %s11141_s16 }
 0x647   :  { %39 = sbr.rel (!%p37_p3) target bundleno = 18 (0x12), region = 179 }
 0x64c   :  { %6085 = vsyncpa [#allocation3], 1 }
 0x64d   :  { %6087 = vsyncpa [#allocation3 + $0x1], 1 }
 0x64e   :  { %6088 = vsyncpa [#allocation6], 1 }
 0x64f   :  { %6089 = vsyncpa [#allocation4], 1 }
 0x650   :  { %6091 = vsyncpa [#allocation4 + $0x1], 1 }
 0x651   :  { %6092 = vsyncpa [#allocation10], 1 }
 0x652   :  { %6094 = vsyncpa [#allocation10 + $0x1], 1 }

</bundles_post_ra>
